<compile_context>
chip_gen: v5e
topology: v5e:2x2
jax: 0.10.0
libtpu: 0.0.40
codegen_flags: <defaults>
</compile_context>

<pallas_src>
import functools

import jax
import jax.numpy as jnp
from jax.experimental import pallas as pl
from jax.experimental.pallas import tpu as pltpu

N_EMBED = 6 * 64          # 384
HIDDEN = 4 * N_EMBED      # 1536
DROPOUT_P = 0.2
TOKEN_TILE = 512          # rows (tokens) per grid step; 512 keeps working set ~10-17 MB


def _ffn_kernel(*refs, train):
    if train:
        x_ref, mask_ref, w1_ref, b1_ref, w2_ref, b2_ref, o_ref = refs
    else:
        x_ref, w1_ref, b1_ref, w2_ref, b2_ref, o_ref = refs

    compute_dtype = x_ref.dtype
    # (TN, C) @ (C, 4C) -> +bias -> ReLU, f32 accumulation on the MXU.
    h = jnp.dot(x_ref[...], w1_ref[...], preferred_element_type=jnp.float32)
    h = jnp.maximum(h + b1_ref[...], 0.0).astype(compute_dtype)
    # (TN, 4C) @ (4C, C) -> +bias, f32 accumulation.
    y = jnp.dot(h, w2_ref[...], preferred_element_type=jnp.float32) + b2_ref[...]
    if train:
        # Pre-scaled keep mask (0 or 1/(1-p)) streamed in per tile.
        y = y * mask_ref[...]
    o_ref[...] = y.astype(o_ref.dtype)


def feed_forward(x, w1, b1, w2, b2, *, train=False, rng=None,
                 compute_dtype=jnp.float32, token_tile=TOKEN_TILE):
    """x: (B, T, C) float32. Returns (B, T, C) with x.dtype."""
    B, T, C = x.shape
    assert C == N_EMBED
    N = B * T
    out_dtype = x.dtype

    x2 = x.reshape(N, C)

    # Pick the token tile. If N fits in one tile, the block equals the full
    # array extent (always legal); otherwise pad N up to a multiple of the tile
    # so every (TN, C) block is (8,128)-aligned.
    if N <= token_tile:
        tn = N
        n_pad = N
    else:
        tn = token_tile
        n_pad = pl.cdiv(N, tn) * tn
    if n_pad != N:
        x2 = jnp.pad(x2, ((0, n_pad - N), (0, 0)))

    # bf16 fast-MXU path on v6e/v7x (halves weight DMA); accumulation stays f32.
    x2 = x2.astype(compute_dtype)
    w1c = w1.astype(compute_dtype)
    w2c = w2.astype(compute_dtype)
    b1f = b1.astype(jnp.float32)
    b2f = b2.astype(jnp.float32)

    grid = (n_pad // tn,)

    row_spec = pl.BlockSpec((tn, C), lambda i: (i, 0))
    in_specs = [row_spec]
    operands = [x2]

    if train:
        # TODO(synk): the in-kernel HW PRNG (pltpu.prng_seed(seed + program_id)
        # + prng_random_bits) would avoid this extra mask DMA, but it has no
        # CPU/interpret lowering in this sandbox, so the mask is generated
        # host-side and streamed in with the same (TN, C) tiling as x.
        if rng is None:
            rng = jax.random.PRNGKey(0)
        keep = jax.random.uniform(rng, (n_pad, C), jnp.float32) >= DROPOUT_P
        mask = keep.astype(jnp.float32) * (1.0 / (1.0 - DROPOUT_P))
        in_specs.append(row_spec)
        operands.append(mask)

    in_specs += [
        pl.BlockSpec((C, HIDDEN), lambda i: (0, 0)),   # w1: resident
        pl.BlockSpec((1, HIDDEN), lambda i: (0, 0)),   # b1: resident
        pl.BlockSpec((HIDDEN, C), lambda i: (0, 0)),   # w2: resident
        pl.BlockSpec((1, C), lambda i: (0, 0)),        # b2: resident
    ]
    operands += [w1c, b1f, w2c, b2f]

    itemsize = jnp.dtype(compute_dtype).itemsize
    flops = 4 * n_pad * C * HIDDEN                       # two matmuls, 2*M*K*N each
    bytes_accessed = (n_pad * C * itemsize               # x
                      + C * HIDDEN * itemsize            # w1
                      + HIDDEN * C * itemsize            # w2
                      + (HIDDEN + C) * 4                 # biases
                      + n_pad * C * jnp.dtype(out_dtype).itemsize  # out
                      + (n_pad * C * 4 if train else 0))           # mask

    out = pl.pallas_call(
        functools.partial(_ffn_kernel, train=train),
        out_shape=jax.ShapeDtypeStruct((n_pad, C), out_dtype),
        grid_spec=pltpu.PrefetchScalarGridSpec(
            num_scalar_prefetch=0,
            grid=grid,
            in_specs=in_specs,
            out_specs=pl.BlockSpec((tn, C), lambda i: (i, 0)),
        ),
        compiler_params=pltpu.CompilerParams(
            dimension_semantics=("parallel",),
            vmem_limit_bytes=64 << 20,
        ),
        cost_estimate=pl.CostEstimate(
            flops=flops, transcendentals=0, bytes_accessed=bytes_accessed),
    )(*operands)

    return out[:N].reshape(B, T, C)


def init_params(key):
    # PyTorch nn.Linear default init: U(-1/sqrt(fan_in), 1/sqrt(fan_in)).
    # Weights stored as (in_features, out_features) = transpose of nn.Linear.weight.
    k1, k2, k3, k4 = jax.random.split(key, 4)
    lim1 = 1.0 / (N_EMBED ** 0.5)
    lim2 = 1.0 / (HIDDEN ** 0.5)
    w1 = jax.random.uniform(k1, (N_EMBED, HIDDEN), jnp.float32, -lim1, lim1)
    b1 = jax.random.uniform(k2, (1, HIDDEN), jnp.float32, -lim1, lim1)
    w2 = jax.random.uniform(k3, (HIDDEN, N_EMBED), jnp.float32, -lim2, lim2)
    b2 = jax.random.uniform(k4, (1, N_EMBED), jnp.float32, -lim2, lim2)
    return w1, b1, w2, b2


if __name__ == "__main__":
    key = jax.random.PRNGKey(0)
    kx, kp, kd = jax.random.split(key, 3)

    B, T = 2, 8
    x = jax.random.normal(kx, (B, T, N_EMBED), jnp.float32)
    w1, b1, w2, b2 = init_params(kp)

    # Pure-JAX reference (eval mode: dropout = identity).
    h_ref = jnp.maximum(x.reshape(-1, N_EMBED) @ w1 + b1, 0.0)
    y_ref = (h_ref @ w2 + b2).reshape(B, T, N_EMBED)

    # 1) Eval mode, f32 compute: tight check.
    y_eval = feed_forward(x, w1, b1, w2, b2, train=False)
    y_eval = jax.block_until_ready(y_eval)
    assert jnp.allclose(y_eval, y_ref, atol=1e-4, rtol=1e-4)

    # 2) Eval mode, bf16 compute (v6e/v7x fast MXU path): loose check.
    y_bf16 = feed_forward(x, w1, b1, w2, b2, train=False,
                          compute_dtype=jnp.bfloat16)
    y_bf16 = jax.block_until_ready(y_bf16)
    assert jnp.allclose(y_bf16, y_ref, atol=2e-1, rtol=1e-1)

    # 3) Training mode: inverted dropout with a host-generated mask.
    y_train = feed_forward(x, w1, b1, w2, b2, train=True, rng=kd)
    y_train = jax.block_until_ready(y_train)
    assert y_train.shape == (B, T, N_EMBED)
    zero_frac = float(jnp.mean(y_train == 0.0))
    assert 0.1 < zero_frac < 0.3, zero_frac   # ~20% of outputs dropped

    print("KERNEL_OK")
</pallas_src>

<mosaic_0001>
module attributes {stable_mosaic.version = 11 : i64} {
  func.func @_ffn_kernel(%arg0: i32, %arg1: memref<16x384xf32, #tpu.memory_space<vmem>>, %arg2: memref<384x1536xf32, #tpu.memory_space<vmem>>, %arg3: memref<1x1536xf32, #tpu.memory_space<vmem>>, %arg4: memref<1536x384xf32, #tpu.memory_space<vmem>>, %arg5: memref<1x384xf32, #tpu.memory_space<vmem>>, %arg6: memref<16x384xf32, #tpu.memory_space<vmem>>) attributes {dimension_semantics = [#tpu.dimension_semantics<parallel>], iteration_bounds = array<i64: 1>, scalar_prefetch = 0 : i64, scratch_operands = 0 : i64, tpu.core_type = #tpu.core_type<tc>, window_params = [{transform_indices = @transform_0, window_bounds = array<i64: 16, 384>}, {pipeline_mode = #tpu.pipeline_mode<synchronous>, transform_indices = @transform_1, window_bounds = array<i64: 384, 1536>}, {pipeline_mode = #tpu.pipeline_mode<synchronous>, transform_indices = @transform_2, window_bounds = array<i64: 1, 1536>}, {pipeline_mode = #tpu.pipeline_mode<synchronous>, transform_indices = @transform_3, window_bounds = array<i64: 1536, 384>}, {pipeline_mode = #tpu.pipeline_mode<synchronous>, transform_indices = @transform_4, window_bounds = array<i64: 1, 384>}, {transform_indices = @transform_5, window_bounds = array<i64: 16, 384>}]} {
    %c0 = arith.constant 0 : index
    %c0_0 = arith.constant 0 : index
    %0 = vector.load %arg1[%c0, %c0_0] : memref<16x384xf32, #tpu.memory_space<vmem>>, vector<16x384xf32>
    %c0_1 = arith.constant 0 : index
    %c0_2 = arith.constant 0 : index
    %1 = vector.load %arg2[%c0_1, %c0_2] : memref<384x1536xf32, #tpu.memory_space<vmem>>, vector<384x1536xf32>
    %cst = arith.constant dense<0.000000e+00> : vector<16x1536xf32>
    %2 = tpu.matmul %0, %1, %cst {dimension_numbers = #tpu.dot_dimension_numbers<[1], [0], [0], [1], [0, 0, 1, 1], [], []>} : vector<16x384xf32>, vector<384x1536xf32>, vector<16x1536xf32> -> vector<16x1536xf32>
    %c0_3 = arith.constant 0 : index
    %c0_4 = arith.constant 0 : index
    %3 = vector.load %arg3[%c0_3, %c0_4] : memref<1x1536xf32, #tpu.memory_space<vmem>>, vector<1x1536xf32>
    %4 = vector.broadcast %3 : vector<1x1536xf32> to vector<16x1536xf32>
    %5 = arith.addf %2, %4 : vector<16x1536xf32>
    %cst_5 = arith.constant 0.000000e+00 : f32
    %6 = vector.broadcast %cst_5 : f32 to vector<16x1536xf32>
    %7 = arith.maximumf %5, %6 : vector<16x1536xf32>
    %c0_6 = arith.constant 0 : index
    %c0_7 = arith.constant 0 : index
    %8 = vector.load %arg4[%c0_6, %c0_7] : memref<1536x384xf32, #tpu.memory_space<vmem>>, vector<1536x384xf32>
    %cst_8 = arith.constant dense<0.000000e+00> : vector<16x384xf32>
    %9 = tpu.matmul %7, %8, %cst_8 {dimension_numbers = #tpu.dot_dimension_numbers<[1], [0], [0], [1], [0, 0, 1, 1], [], []>} : vector<16x1536xf32>, vector<1536x384xf32>, vector<16x384xf32> -> vector<16x384xf32>
    %c0_9 = arith.constant 0 : index
    %c0_10 = arith.constant 0 : index
    %10 = vector.load %arg5[%c0_9, %c0_10] : memref<1x384xf32, #tpu.memory_space<vmem>>, vector<1x384xf32>
    %11 = vector.broadcast %10 : vector<1x384xf32> to vector<16x384xf32>
    %12 = arith.addf %9, %11 : vector<16x384xf32>
    %c0_11 = arith.constant 0 : index
    %c0_12 = arith.constant 0 : index
    %13 = vector.load %arg6[%c0_11, %c0_12] : memref<16x384xf32, #tpu.memory_space<vmem>>, vector<16x384xf32>
    tpu.vector_store %arg6[%c0_11, %c0_12], %12 {strides = array<i32>} : memref<16x384xf32, #tpu.memory_space<vmem>>, vector<16x384xf32>,
    return
  }
  func.func @transform_0(%arg0: i32) -> (i32, i32) {
    %c0_i32 = arith.constant 0 : i32
    %c0_i32_0 = arith.constant 0 : i32
    return %arg0, %c0_i32 : i32, i32
  }
  func.func @transform_1(%arg0: i32) -> (i32, i32) {
    %c0_i32 = arith.constant 0 : i32
    %c0_i32_0 = arith.constant 0 : i32
    %c0_i32_1 = arith.constant 0 : i32
    return %c0_i32, %c0_i32_0 : i32, i32
  }
  func.func @transform_2(%arg0: i32) -> (i32, i32) {
    %c0_i32 = arith.constant 0 : i32
    %c0_i32_0 = arith.constant 0 : i32
    %c0_i32_1 = arith.constant 0 : i32
    return %c0_i32, %c0_i32_0 : i32, i32
  }
  func.func @transform_3(%arg0: i32) -> (i32, i32) {
    %c0_i32 = arith.constant 0 : i32
    %c0_i32_0 = arith.constant 0 : i32
    %c0_i32_1 = arith.constant 0 : i32
    return %c0_i32, %c0_i32_0 : i32, i32
  }
  func.func @transform_4(%arg0: i32) -> (i32, i32) {
    %c0_i32 = arith.constant 0 : i32
    %c0_i32_0 = arith.constant 0 : i32
    %c0_i32_1 = arith.constant 0 : i32
    return %c0_i32, %c0_i32_0 : i32, i32
  }
  func.func @transform_5(%arg0: i32) -> (i32, i32) {
    %c0_i32 = arith.constant 0 : i32
    %c0_i32_0 = arith.constant 0 : i32
    return %arg0, %c0_i32 : i32, i32
  }
}

</mosaic_0001>

<bundles_post_ra>
// kernel: tpu_custom_call.1
= control target key start
LH: loop header
LB: loop body
LE: loop exit
PB: predicated region body
PF: predicated region fallthrough
CT: control target
= control target key end

     0   :  { %10 = vsyncpa [#allocation3], 0  ;;  %s3648_s0 = inlined_call_operand.hbm [shape: f32[16,384], index: 0, kind: input, shape index: {}]   ;;  %s3649_s1 = inlined_call_operand.hbm [shape: f32[384,1536], index: 1, kind: input, shape index: {}]   ;;  %s3650_s2 = inlined_call_operand.hbm [shape: f32[1,1536], index: 2, kind: input, shape index: {}]   ;;  %s3651_s3 = inlined_call_operand.hbm [shape: f32[1536,384], index: 3, kind: input, shape index: {}]   ;;  %s3652_s4 = inlined_call_operand.hbm [shape: f32[1,384], index: 4, kind: input, shape index: {}]   ;;  %s3653_s5 = inlined_call_operand.hbm [shape: f32[16,384], index: 5, kind: output, shape index: {}]  }
   0x1   :  { %11 = vsyncpa [#allocation6], 0 }
   0x2   :  { %12 = vsyncpa [#allocation9], 0  ;;  %s31_s20 = sshll.u32 %s3649_s1, 4  ;;  %s32_s20 = int_to_ptr.hbm [resolvable:$true] %s31_s20 }
   0x3   :  { %13 = vsyncpa [#allocation4], 0  ;;  %s3165_s21 = smov [#allocation5]   ;;  %s3166_s23 = smov 1536  }
   0x4   :  { %s33_s22 = sshll.u32 %s3165_s21, 4  ;;  %s3167_s24 = smov 96   ;;  %s34_s22 = int_to_ptr.vmem [resolvable:$true] %s33_s22 }
   0x5   :  { %39 = dma.hbm_to_vmem [thread:$0]  %s32_s20, 73728, %s34_s22, [#allocation6], %s3166_s23, %s3166_s23, %s3167_s24  }
   0x6   :  { %s55_s27 = sshll.u32 %s3651_s3, 4  ;;  %s3168_s28 = smov [#allocation8]   ;;  %s56_s27 = int_to_ptr.hbm [resolvable:$true] %s55_s27 }
   0x7   :  { %s57_s29 = sshll.u32 %s3168_s28, 4  ;;  %s18_s7 = sshll.u32 %s3648_s0, 4  ;;  %s58_s29 = int_to_ptr.vmem [resolvable:$true] %s57_s29  ;;  %s19_s7 = int_to_ptr.hbm [resolvable:$true] %s18_s7 }
   0x8   :  { %s3169_s1 = smov 384   ;;  %s3170_s8 = smov 24  }
   0x9   :  { %63 = dma.hbm_to_vmem [thread:$0]  %s56_s27, 73728, %s58_s29, [#allocation9], %s3169_s1, %s3169_s1, %s3170_s8  }
   0xa   :  { %s45_s11 = sshll.u32 %s3650_s2, 4  ;;  %s3171_s3 = smov [#allocation2]   ;;  %s46_s11 = int_to_ptr.hbm [resolvable:$true] %s45_s11 }
   0xb   :  { %s20_s12 = sshll.u32 %s3171_s3, 4  ;;  %s3172_s0 = smov [#allocation7]   ;;  %s21_s12 = int_to_ptr.vmem [resolvable:$true] %s20_s12 }
   0xc   :  { %26 = dma.hbm_to_vmem [thread:$0]  %s19_s7, 768, %s21_s12, [#allocation3], %s3169_s1, %s3169_s1, %s3170_s8  }
   0xd   :  { %s47_s13 = sshll.u32 %s3172_s0, 4  ;;  %s69_s16 = sshll.u32 %s3652_s4, 4  ;;  %s48_s13 = int_to_ptr.vmem [resolvable:$true] %s47_s13  ;;  %s70_s16 = int_to_ptr.hbm [resolvable:$true] %s69_s16 }
   0xe   :  { %50 = dma.hbm_to_vmem [thread:$0]  %s46_s11, 192, %s48_s13, [#allocation6]  }
   0xf   :  { %s3173_s17 = smov [#allocation10]  }
  0x10   :  { %s71_s18 = sshll.u32 %s3173_s17, 4  ;;  %s72_s18 = int_to_ptr.vmem [resolvable:$true] %s71_s18 }
  0x11   :  { %74 = dma.hbm_to_vmem [thread:$0]  %s70_s16, 48, %s72_s18, [#allocation9]  }
  0x12   :  { %3157 = dma.done.wait [#allocation3], 768  }
  0x13   :  { %3158 = vsyncadd [#allocation3], 4294966528 }
  0x14   :  { %3159 = dma.done.wait [#allocation6], 73920  }
  0x15   :  { %3160 = vsyncadd [#allocation6], 4294893376 }
  0x16   :  { %3161 = dma.done.wait [#allocation9], 73776  }
  0x17   :  { %3162 = vsyncadd [#allocation9], 4294893520  ;;  %v281_v0 = vld [vmem:[#allocation5 + $0x5a0] sm:$0xff]  ;;  %v282_v3 = vld [vmem:[#allocation5 + $0x5a8] sm:$0xff]  ;;  %s3174_s2 = smov [#allocation11]   ;;  %s2981_s21 = sshll.u32 %s3653_s5, 4  ;;  %s2982_s21 = int_to_ptr.hbm [resolvable:$true] %s2981_s21 }
  0x18   :  { %v473_v1 = vld [vmem:[#allocation5 + $0xba0] sm:$0xff]  ;;  %705 = vmatpush.msra.mxu0 %v281_v0  ;;  %774 = vmatpush.msra.mxu3 %v282_v3  ;;  %v270_v7 = vld [vmem:[#allocation5 + $0x548] sm:$0xff]  ;;  %v475_v3 = vld [vmem:[#allocation5 + $0xbb0] sm:$0xff]  ;;  %s2979_s4 = sshll.u32 %s3174_s2, 4  ;;  %s2980_s4 = int_to_ptr.vmem [resolvable:$true] %s2979_s4 }
  0x19   :  { %v665_v2 = vld [vmem:[#allocation5 + $0x11a0] sm:$0xff]  ;;  %728 = vmatpush.msra.mxu1 %v473_v1  ;;  %v258_v11 = vld [vmem:[#allocation5 + $0x4e8] sm:$0xff] }
  0x1a   :  { %v269_v4 = vld [vmem:[#allocation5 + $0x540] sm:$0xff]  ;;  %751 = vmatpush.msra.mxu2 %v665_v2  ;;  %775 = vmatpush.msra.mxu3 %v270_v7  ;;  %v246_v15 = vld [vmem:[#allocation5 + $0x488] sm:$0xff]  ;;  %v283_v2 = vld [vmem:[#allocation5 + $0x5b0] sm:$0xff] }
  0x1b   :  { %v461_v5 = vld [vmem:[#allocation5 + $0xb40] sm:$0xff]  ;;  %706 = vmatpush.msra.mxu0 %v269_v4  ;;  %v234_v19 = vld [vmem:[#allocation5 + $0x428] sm:$0xff]  ;;  %v463_v7 = vld [vmem:[#allocation5 + $0xb50] sm:$0xff] }
  0x1c   :  { %v653_v6 = vld [vmem:[#allocation5 + $0x1140] sm:$0xff]  ;;  %729 = vmatpush.msra.mxu1 %v461_v5  ;;  %776 = vmatpush.msra.mxu3 %v258_v11  ;;  %v222_v23 = vld [vmem:[#allocation5 + $0x3c8] sm:$0xff]  ;;  %v451_v11 = vld [vmem:[#allocation5 + $0xaf0] sm:$0xff] }
  0x1d   :  { %v257_v8 = vld [vmem:[#allocation5 + $0x4e0] sm:$0xff]  ;;  %752 = vmatpush.msra.mxu2 %v653_v6  ;;  %v210_v27 = vld [vmem:[#allocation5 + $0x368] sm:$0xff]  ;;  %v271_v6 = vld [vmem:[#allocation5 + $0x550] sm:$0xff] }
  0x1e   :  { %v449_v9 = vld [vmem:[#allocation5 + $0xae0] sm:$0xff]  ;;  %707 = vmatpush.msra.mxu0 %v257_v8  ;;  %777 = vmatpush.msra.mxu3 %v246_v15  ;;  %v198_v31 = vld [vmem:[#allocation5 + $0x308] sm:$0xff]  ;;  %v439_v15 = vld [vmem:[#allocation5 + $0xa90] sm:$0xff] }
  0x1f   :  { %v641_v10 = vld [vmem:[#allocation5 + $0x10e0] sm:$0xff]  ;;  %730 = vmatpush.msra.mxu1 %v449_v9  ;;  %v186_v35 = vld [vmem:[#allocation5 + $0x2a8] sm:$0xff] }
  0x20   :  { %v245_v12 = vld [vmem:[#allocation5 + $0x480] sm:$0xff]  ;;  %753 = vmatpush.msra.mxu2 %v641_v10  ;;  %778 = vmatpush.msra.mxu3 %v234_v19  ;;  %v174_v39 = vld [vmem:[#allocation5 + $0x248] sm:$0xff]  ;;  %v259_v10 = vld [vmem:[#allocation5 + $0x4f0] sm:$0xff] }
  0x21   :  { %v437_v13 = vld [vmem:[#allocation5 + $0xa80] sm:$0xff]  ;;  %708 = vmatpush.msra.mxu0 %v245_v12  ;;  %v162_v43 = vld [vmem:[#allocation5 + $0x1e8] sm:$0xff]  ;;  %v427_v19 = vld [vmem:[#allocation5 + $0xa30] sm:$0xff] }
  0x22   :  { %v629_v14 = vld [vmem:[#allocation5 + $0x1080] sm:$0xff]  ;;  %731 = vmatpush.msra.mxu1 %v437_v13  ;;  %779 = vmatpush.msra.mxu3 %v222_v23  ;;  %v150_v47 = vld [vmem:[#allocation5 + $0x188] sm:$0xff]  ;;  %v415_v23 = vld [vmem:[#allocation5 + $0x9d0] sm:$0xff] }
  0x23   :  { %v233_v16 = vld [vmem:[#allocation5 + $0x420] sm:$0xff]  ;;  %754 = vmatpush.msra.mxu2 %v629_v14  ;;  %v138_v51 = vld [vmem:[#allocation5 + $0x128] sm:$0xff]  ;;  %v247_v14 = vld [vmem:[#allocation5 + $0x490] sm:$0xff] }
  0x24   :  { %v425_v17 = vld [vmem:[#allocation5 + $0xa20] sm:$0xff]  ;;  %709 = vmatpush.msra.mxu0 %v233_v16  ;;  %780 = vmatpush.msra.mxu3 %v210_v27  ;;  %v126_v55 = vld [vmem:[#allocation5 + $0xc8] sm:$0xff]  ;;  %v403_v27 = vld [vmem:[#allocation5 + $0x970] sm:$0xff] }
  0x25   :  { %v617_v18 = vld [vmem:[#allocation5 + $0x1020] sm:$0xff]  ;;  %732 = vmatpush.msra.mxu1 %v425_v17  ;;  %v114_v59 = vld [vmem:[#allocation5 + $0x68] sm:$0xff] }
  0x26   :  { %v221_v20 = vld [vmem:[#allocation5 + $0x3c0] sm:$0xff]  ;;  %755 = vmatpush.msra.mxu2 %v617_v18  ;;  %781 = vmatpush.msra.mxu3 %v198_v31  ;;  %v102_v63 = vld [vmem:[#allocation5 + $0x8] sm:$0xff]  ;;  %v235_v18 = vld [vmem:[#allocation5 + $0x430] sm:$0xff] }
  0x27   :  { %v413_v21 = vld [vmem:[#allocation5 + $0x9c0] sm:$0xff]  ;;  %710 = vmatpush.msra.mxu0 %v221_v20  ;;  %v474_v0 = vld [vmem:[#allocation5 + $0xba8] sm:$0xff]  ;;  %v391_v31 = vld [vmem:[#allocation5 + $0x910] sm:$0xff] }
  0x28   :  { %v605_v22 = vld [vmem:[#allocation5 + $0xfc0] sm:$0xff]  ;;  %733 = vmatpush.msra.mxu1 %v413_v21  ;;  %782 = vmatpush.msra.mxu3 %v186_v35  ;;  %v666_v1 = vld [vmem:[#allocation5 + $0x11a8] sm:$0xff]  ;;  %v379_v35 = vld [vmem:[#allocation5 + $0x8b0] sm:$0xff] }
  0x29   :  { %v209_v24 = vld [vmem:[#allocation5 + $0x360] sm:$0xff]  ;;  %756 = vmatpush.msra.mxu2 %v605_v22  ;;  %v462_v4 = vld [vmem:[#allocation5 + $0xb48] sm:$0xff]  ;;  %v223_v22 = vld [vmem:[#allocation5 + $0x3d0] sm:$0xff] }
  0x2a   :  { %v401_v25 = vld [vmem:[#allocation5 + $0x960] sm:$0xff]  ;;  %711 = vmatpush.msra.mxu0 %v209_v24  ;;  %783 = vmatpush.msra.mxu3 %v174_v39  ;;  %v654_v5 = vld [vmem:[#allocation5 + $0x1148] sm:$0xff]  ;;  %v367_v39 = vld [vmem:[#allocation5 + $0x850] sm:$0xff] }
  0x2b   :  { %v593_v26 = vld [vmem:[#allocation5 + $0xf60] sm:$0xff]  ;;  %734 = vmatpush.msra.mxu1 %v401_v25  ;;  %v450_v8 = vld [vmem:[#allocation5 + $0xae8] sm:$0xff] }
  0x2c   :  { %v197_v28 = vld [vmem:[#allocation5 + $0x300] sm:$0xff]  ;;  %757 = vmatpush.msra.mxu2 %v593_v26  ;;  %784 = vmatpush.msra.mxu3 %v162_v43  ;;  %v642_v9 = vld [vmem:[#allocation5 + $0x10e8] sm:$0xff]  ;;  %v211_v26 = vld [vmem:[#allocation5 + $0x370] sm:$0xff] }
  0x2d   :  { %v389_v29 = vld [vmem:[#allocation5 + $0x900] sm:$0xff]  ;;  %712 = vmatpush.msra.mxu0 %v197_v28  ;;  %v438_v12 = vld [vmem:[#allocation5 + $0xa88] sm:$0xff]  ;;  %v355_v43 = vld [vmem:[#allocation5 + $0x7f0] sm:$0xff] }
  0x2e   :  { %v581_v30 = vld [vmem:[#allocation5 + $0xf00] sm:$0xff]  ;;  %735 = vmatpush.msra.mxu1 %v389_v29  ;;  %785 = vmatpush.msra.mxu3 %v150_v47  ;;  %v630_v13 = vld [vmem:[#allocation5 + $0x1088] sm:$0xff]  ;;  %v343_v47 = vld [vmem:[#allocation5 + $0x790] sm:$0xff] }
  0x2f   :  { %v185_v32 = vld [vmem:[#allocation5 + $0x2a0] sm:$0xff]  ;;  %758 = vmatpush.msra.mxu2 %v581_v30  ;;  %v426_v16 = vld [vmem:[#allocation5 + $0xa28] sm:$0xff]  ;;  %v199_v30 = vld [vmem:[#allocation5 + $0x310] sm:$0xff] }
  0x30   :  { %v377_v33 = vld [vmem:[#allocation5 + $0x8a0] sm:$0xff]  ;;  %713 = vmatpush.msra.mxu0 %v185_v32  ;;  %786 = vmatpush.msra.mxu3 %v138_v51  ;;  %v618_v17 = vld [vmem:[#allocation5 + $0x1028] sm:$0xff]  ;;  %v331_v51 = vld [vmem:[#allocation5 + $0x730] sm:$0xff] }
  0x31   :  { %v569_v34 = vld [vmem:[#allocation5 + $0xea0] sm:$0xff]  ;;  %736 = vmatpush.msra.mxu1 %v377_v33  ;;  %v414_v20 = vld [vmem:[#allocation5 + $0x9c8] sm:$0xff] }
  0x32   :  { %v173_v36 = vld [vmem:[#allocation5 + $0x240] sm:$0xff]  ;;  %759 = vmatpush.msra.mxu2 %v569_v34  ;;  %787 = vmatpush.msra.mxu3 %v126_v55  ;;  %v606_v21 = vld [vmem:[#allocation5 + $0xfc8] sm:$0xff]  ;;  %v187_v34 = vld [vmem:[#allocation5 + $0x2b0] sm:$0xff] }
  0x33   :  { %v365_v37 = vld [vmem:[#allocation5 + $0x840] sm:$0xff]  ;;  %714 = vmatpush.msra.mxu0 %v173_v36  ;;  %v402_v24 = vld [vmem:[#allocation5 + $0x968] sm:$0xff]  ;;  %v127_v55 = vld [vmem:[#allocation5 + $0xd0] sm:$0xff] }
  0x34   :  { %v557_v38 = vld [vmem:[#allocation5 + $0xe40] sm:$0xff]  ;;  %737 = vmatpush.msra.mxu1 %v365_v37  ;;  %788 = vmatpush.msra.mxu3 %v114_v59  ;;  %v594_v25 = vld [vmem:[#allocation5 + $0xf68] sm:$0xff] }
  0x35   :  { %v161_v40 = vld [vmem:[#allocation5 + $0x1e0] sm:$0xff]  ;;  %760 = vmatpush.msra.mxu2 %v557_v38  ;;  %v390_v28 = vld [vmem:[#allocation5 + $0x908] sm:$0xff]  ;;  %v175_v38 = vld [vmem:[#allocation5 + $0x250] sm:$0xff] }
  0x36   :  { %v353_v41 = vld [vmem:[#allocation5 + $0x7e0] sm:$0xff]  ;;  %715 = vmatpush.msra.mxu0 %v161_v40  ;;  %789 = vmatpush.msra.mxu3 %v102_v63  ;;  %v582_v29 = vld [vmem:[#allocation5 + $0xf08] sm:$0xff] }
  0x37   :  { %v545_v42 = vld [vmem:[#allocation5 + $0xde0] sm:$0xff]  ;;  %738 = vmatpush.msra.mxu1 %v353_v41  ;;  %v378_v32 = vld [vmem:[#allocation5 + $0x8a8] sm:$0xff] }
  0x38   :  { %v149_v44 = vld [vmem:[#allocation5 + $0x180] sm:$0xff]  ;;  %761 = vmatpush.msra.mxu2 %v545_v42  ;;  %866 = vmatpush.msrb.mxu3 %v475_v3  ;;  %v570_v33 = vld [vmem:[#allocation5 + $0xea8] sm:$0xff]  ;;  %v163_v42 = vld [vmem:[#allocation5 + $0x1f0] sm:$0xff] }
  0x39   :  { %v341_v45 = vld [vmem:[#allocation5 + $0x780] sm:$0xff]  ;;  %716 = vmatpush.msra.mxu0 %v149_v44  ;;  %v366_v36 = vld [vmem:[#allocation5 + $0x848] sm:$0xff]  ;;  %v667_v3 = vld [vmem:[#allocation5 + $0x11b0] sm:$0xff] }
  0x3a   :  { %v533_v46 = vld [vmem:[#allocation5 + $0xd80] sm:$0xff]  ;;  %739 = vmatpush.msra.mxu1 %v341_v45  ;;  %867 = vmatpush.msrb.mxu3 %v463_v7  ;;  %v558_v37 = vld [vmem:[#allocation5 + $0xe48] sm:$0xff] }
  0x3b   :  { %v137_v48 = vld [vmem:[#allocation5 + $0x120] sm:$0xff]  ;;  %762 = vmatpush.msra.mxu2 %v533_v46  ;;  %v354_v40 = vld [vmem:[#allocation5 + $0x7e8] sm:$0xff]  ;;  %v151_v46 = vld [vmem:[#allocation5 + $0x190] sm:$0xff] }
  0x3c   :  { %v329_v49 = vld [vmem:[#allocation5 + $0x720] sm:$0xff]  ;;  %717 = vmatpush.msra.mxu0 %v137_v48  ;;  %868 = vmatpush.msrb.mxu3 %v451_v11  ;;  %v546_v41 = vld [vmem:[#allocation5 + $0xde8] sm:$0xff]  ;;  %v656_v11 = vld [vmem:[#allocation5 + $0x1158] sm:$0xff] }
  0x3d   :  { %v521_v50 = vld [vmem:[#allocation5 + $0xd20] sm:$0xff]  ;;  %740 = vmatpush.msra.mxu1 %v329_v49  ;;  %v342_v44 = vld [vmem:[#allocation5 + $0x788] sm:$0xff] }
  0x3e   :  { %v125_v52 = vld [vmem:[#allocation5 + $0xc0] sm:$0xff]  ;;  %763 = vmatpush.msra.mxu2 %v521_v50  ;;  %869 = vmatpush.msrb.mxu3 %v439_v15  ;;  %v534_v45 = vld [vmem:[#allocation5 + $0xd88] sm:$0xff]  ;;  %v139_v50 = vld [vmem:[#allocation5 + $0x130] sm:$0xff] }
  0x3f   :  { %v317_v53 = vld [vmem:[#allocation5 + $0x6c0] sm:$0xff]  ;;  %718 = vmatpush.msra.mxu0 %v125_v52  ;;  %v330_v48 = vld [vmem:[#allocation5 + $0x728] sm:$0xff]  ;;  %v3226_v52 = vld [vmem:[#allocation2] sm:$0xff] }
  0x40   :  { %v509_v54 = vld [vmem:[#allocation5 + $0xcc0] sm:$0xff]  ;;  %741 = vmatpush.msra.mxu1 %v317_v53  ;;  %870 = vmatpush.msrb.mxu3 %v427_v19  ;;  %v522_v49 = vld [vmem:[#allocation5 + $0xd28] sm:$0xff]  ;;  %v452_v15 = vld [vmem:[#allocation5 + $0xaf8] sm:$0xff] }
  0x41   :  { %v113_v56 = vld [vmem:[#allocation5 + $0x60] sm:$0xff]  ;;  %764 = vmatpush.msra.mxu2 %v509_v54  ;;  %v510_v53 = vld [vmem:[#allocation5 + $0xcc8] sm:$0xff]  ;;  %790 = vmatmul.f32.vlgmr.msra.gmra.mxu3 %v3226_v52  ;;  %v440_v19 = vld [vmem:[#allocation5 + $0xa98] sm:$0xff] }
  0x42   :  { %v305_v57 = vld [vmem:[#allocation5 + $0x660] sm:$0xff]  ;;  %719 = vmatpush.msra.mxu0 %v113_v56  ;;  %871 = vmatpush.msrb.mxu3 %v415_v23  ;;  %v318_v54 = vld [vmem:[#allocation5 + $0x6c8] sm:$0xff]  ;;  %v319_v56 = vld [vmem:[#allocation5 + $0x6d0] sm:$0xff] }
  0x43   :  { %v497_v58 = vld [vmem:[#allocation5 + $0xc60] sm:$0xff]  ;;  %742 = vmatpush.msra.mxu1 %v305_v57  ;;  %v3228_v57 = vld [vmem:[#allocation2 + $0x8] sm:$0xff]  ;;  %v498_v59 = vld [vmem:[#allocation5 + $0xc68] sm:$0xff] }
  0x44   :  { %v101_v60 = vld [vmem:[#allocation5] sm:$0xff]  ;;  %765 = vmatpush.msra.mxu2 %v497_v58  ;;  %872 = vmatpush.msrb.mxu3 %v403_v27  ;;  %v306_v58 = vld [vmem:[#allocation5 + $0x668] sm:$0xff]  ;;  %v428_v23 = vld [vmem:[#allocation5 + $0xa38] sm:$0xff] }
  0x45   :  { %v293_v61 = vld [vmem:[#allocation5 + $0x600] sm:$0xff]  ;;  %720 = vmatpush.msra.mxu0 %v101_v60  ;;  %v115_v60 = vld [vmem:[#allocation5 + $0x70] sm:$0xff]  ;;  %v486_v63 = vld [vmem:[#allocation5 + $0xc08] sm:$0xff] }
  0x46   :  { %v485_v62 = vld [vmem:[#allocation5 + $0xc00] sm:$0xff]  ;;  %743 = vmatpush.msra.mxu1 %v293_v61  ;;  %873 = vmatpush.msrb.mxu3 %v391_v31  ;;  %v307_v61 = vld [vmem:[#allocation5 + $0x670] sm:$0xff]  ;;  %v3236_v7 = vld [vmem:[#allocation2 + $0x18] sm:$0xff] }
  0x47   :  { %766 = vmatpush.msra.mxu2 %v485_v62  ;;  %797 = vmatpush.msrb.mxu0 %v474_v0  ;;  %v294_v62 = vld [vmem:[#allocation5 + $0x608] sm:$0xff]  ;;  %v103_v0 = vld [vmem:[#allocation5 + $0x10] sm:$0xff]  ;;  %v416_v27 = vld [vmem:[#allocation5 + $0x9d8] sm:$0xff] }
  0x48   :  { %820 = vmatpush.msrb.mxu1 %v666_v1  ;;  %874 = vmatpush.msrb.mxu3 %v379_v35  ;;  %v295_v1 = vld [vmem:[#allocation5 + $0x610] sm:$0xff]  ;;  %v404_v31 = vld [vmem:[#allocation5 + $0x978] sm:$0xff] }
  0x49   :  { %843 = vmatpush.msrb.mxu2 %v283_v2  ;;  %798 = vmatpush.msrb.mxu0 %v462_v4  ;;  %v3232_v2 = vld [vmem:[#allocation2 + $0x10] sm:$0xff]  ;;  %v284_v4 = vld [vmem:[#allocation5 + $0x5b8] sm:$0xff] }
  0x4a   :  { %821 = vmatpush.msrb.mxu1 %v654_v5  ;;  %875 = vmatpush.msrb.mxu3 %v367_v39  ;;  %v476_v5 = vld [vmem:[#allocation5 + $0xbb8] sm:$0xff] }
  0x4b   :  { %844 = vmatpush.msrb.mxu2 %v271_v6  ;;  %799 = vmatpush.msrb.mxu0 %v450_v8  ;;  %v668_v6 = vld [vmem:[#allocation5 + $0x11b8] sm:$0xff] }
  0x4c   :  { %822 = vmatpush.msrb.mxu1 %v642_v9  ;;  %876 = vmatpush.msrb.mxu3 %v355_v43  ;;  %v272_v8 = vld [vmem:[#allocation5 + $0x558] sm:$0xff]  ;;  %v655_v9 = vld [vmem:[#allocation5 + $0x1150] sm:$0xff] }
  0x4d   :  { %845 = vmatpush.msrb.mxu2 %v259_v10  ;;  %800 = vmatpush.msrb.mxu0 %v438_v12  ;;  %v464_v10 = vld [vmem:[#allocation5 + $0xb58] sm:$0xff]  ;;  %v3238_v12 = vld [vmem:[#allocation2 + $0x20] sm:$0xff] }
  0x4e   :  { %823 = vmatpush.msrb.mxu1 %v630_v13  ;;  %877 = vmatpush.msrb.mxu3 %v343_v47  ;;  %v643_v13 = vld [vmem:[#allocation5 + $0x10f0] sm:$0xff]  ;;  %v392_v35 = vld [vmem:[#allocation5 + $0x918] sm:$0xff] }
  0x4f   :  { %846 = vmatpush.msrb.mxu2 %v247_v14  ;;  %801 = vmatpush.msrb.mxu0 %v426_v16  ;;  %v260_v14 = vld [vmem:[#allocation5 + $0x4f8] sm:$0xff] }
  0x50   :  { %824 = vmatpush.msrb.mxu1 %v618_v17  ;;  %878 = vmatpush.msrb.mxu3 %v331_v51  ;;  %v644_v16 = vld [vmem:[#allocation5 + $0x10f8] sm:$0xff]  ;;  %v631_v17 = vld [vmem:[#allocation5 + $0x1090] sm:$0xff] }
  0x51   :  { %847 = vmatpush.msrb.mxu2 %v235_v18  ;;  %802 = vmatpush.msrb.mxu0 %v414_v20  ;;  %v248_v18 = vld [vmem:[#allocation5 + $0x498] sm:$0xff] }
  0x52   :  { %825 = vmatpush.msrb.mxu1 %v606_v21  ;;  %721 = vmatmul.f32.vlgmr.msra.gmra.mxu0 %v3226_v52  ;;  %v632_v20 = vld [vmem:[#allocation5 + $0x1098] sm:$0xff]  ;;  %v619_v21 = vld [vmem:[#allocation5 + $0x1030] sm:$0xff] }
  0x53   :  { %848 = vmatpush.msrb.mxu2 %v223_v22  ;;  %803 = vmatpush.msrb.mxu0 %v402_v24  ;;  %v236_v22 = vld [vmem:[#allocation5 + $0x438] sm:$0xff] }
  0x54   :  { %826 = vmatpush.msrb.mxu1 %v594_v25  ;;  %879 = vmatpush.msrb.mxu3 %v319_v56  ;;  %v620_v24 = vld [vmem:[#allocation5 + $0x1038] sm:$0xff] }
  0x55   :  { %849 = vmatpush.msrb.mxu2 %v211_v26  ;;  %804 = vmatpush.msrb.mxu0 %v390_v28  ;;  %v224_v25 = vld [vmem:[#allocation5 + $0x3d8] sm:$0xff]  ;;  %v607_v26 = vld [vmem:[#allocation5 + $0xfd0] sm:$0xff] }
  0x56   :  { %827 = vmatpush.msrb.mxu1 %v582_v29  ;;  %880 = vmatpush.msrb.mxu3 %v307_v61  ;;  %v608_v28 = vld [vmem:[#allocation5 + $0xfd8] sm:$0xff]  ;;  %v595_v29 = vld [vmem:[#allocation5 + $0xf70] sm:$0xff] }
  0x57   :  { %850 = vmatpush.msrb.mxu2 %v199_v30  ;;  %805 = vmatpush.msrb.mxu0 %v378_v32  ;;  %v212_v30 = vld [vmem:[#allocation5 + $0x378] sm:$0xff] }
  0x58   :  { %828 = vmatpush.msrb.mxu1 %v570_v33  ;;  %881 = vmatpush.msrb.mxu3 %v295_v1  ;;  %v596_v32 = vld [vmem:[#allocation5 + $0xf78] sm:$0xff]  ;;  %v583_v33 = vld [vmem:[#allocation5 + $0xf10] sm:$0xff] }
  0x59   :  { %851 = vmatpush.msrb.mxu2 %v187_v34  ;;  %806 = vmatpush.msrb.mxu0 %v366_v36  ;;  %v200_v34 = vld [vmem:[#allocation5 + $0x318] sm:$0xff] }
  0x5a   :  { %829 = vmatpush.msrb.mxu1 %v558_v37  ;;  %767 = vmatmul.f32.vlgmr.msra.gmra.mxu2 %v3232_v2  ;;  %v584_v36 = vld [vmem:[#allocation5 + $0xf18] sm:$0xff]  ;;  %v571_v37 = vld [vmem:[#allocation5 + $0xeb0] sm:$0xff] }
  0x5b   :  { %852 = vmatpush.msrb.mxu2 %v175_v38  ;;  %807 = vmatpush.msrb.mxu0 %v354_v40  ;;  %v188_v38 = vld [vmem:[#allocation5 + $0x2b8] sm:$0xff] }
  0x5c   :  { %830 = vmatpush.msrb.mxu1 %v546_v41  ;;  %958 = vmatpush.msra.mxu3 %v668_v6  ;;  %v380_v39 = vld [vmem:[#allocation5 + $0x8b8] sm:$0xff]  ;;  %v559_v41 = vld [vmem:[#allocation5 + $0xe50] sm:$0xff] }
  0x5d   :  { %853 = vmatpush.msrb.mxu2 %v163_v42  ;;  %808 = vmatpush.msrb.mxu0 %v342_v44  ;;  %v572_v40 = vld [vmem:[#allocation5 + $0xeb8] sm:$0xff] }
  0x5e   :  { %831 = vmatpush.msrb.mxu1 %v534_v45  ;;  %724 = vmatmul.f32.gmra.mxu0 %v3236_v7  ;;  %v176_v42 = vld [vmem:[#allocation5 + $0x258] sm:$0xff]  ;;  %v547_v45 = vld [vmem:[#allocation5 + $0xdf0] sm:$0xff] }
  0x5f   :  { %854 = vmatpush.msrb.mxu2 %v151_v46  ;;  %809 = vmatpush.msrb.mxu0 %v330_v48  ;;  %v368_v43 = vld [vmem:[#allocation5 + $0x858] sm:$0xff] }
  0x60   :  { %832 = vmatpush.msrb.mxu1 %v522_v49  ;;  %959 = vmatpush.msra.mxu3 %v656_v11  ;;  %v560_v44 = vld [vmem:[#allocation5 + $0xe58] sm:$0xff]  ;;  %v535_v49 = vld [vmem:[#allocation5 + $0xd90] sm:$0xff]  ;;  %v477_v11 = vld [vmem:[#allocation5 + $0xbc0] sm:$0xff] }
  0x61   :  { %855 = vmatpush.msrb.mxu2 %v139_v50  ;;  %810 = vmatpush.msrb.mxu0 %v318_v54  ;;  %v164_v46 = vld [vmem:[#allocation5 + $0x1f8] sm:$0xff] }
  0x62   :  { %833 = vmatpush.msrb.mxu1 %v510_v53  ;;  %960 = vmatpush.msra.mxu3 %v644_v16  ;;  %v356_v47 = vld [vmem:[#allocation5 + $0x7f8] sm:$0xff]  ;;  %v273_v16 = vld [vmem:[#allocation5 + $0x560] sm:$0xff] }
  0x63   :  { %856 = vmatpush.msrb.mxu2 %v127_v55  ;;  %744 = vmatmul.f32.vlgmr.msra.gmra.mxu1 %v3228_v57  ;;  %v548_v48 = vld [vmem:[#allocation5 + $0xdf8] sm:$0xff]  ;;  %v523_v55 = vld [vmem:[#allocation5 + $0xd30] sm:$0xff] }
  0x64   :  { %811 = vmatpush.msrb.mxu0 %v306_v58  ;;  %834 = vmatpush.msrb.mxu1 %v498_v59  ;;  %v152_v50 = vld [vmem:[#allocation5 + $0x198] sm:$0xff] }
  0x65   :  { %857 = vmatpush.msrb.mxu2 %v115_v60  ;;  %961 = vmatpush.msra.mxu3 %v632_v20  ;;  %v344_v51 = vld [vmem:[#allocation5 + $0x798] sm:$0xff]  ;;  %v511_v60 = vld [vmem:[#allocation5 + $0xcd0] sm:$0xff]  ;;  %v453_v20 = vld [vmem:[#allocation5 + $0xb00] sm:$0xff] }
  0x66   :  { %812 = vmatpush.msrb.mxu0 %v294_v62  ;;  %835 = vmatpush.msrb.mxu1 %v486_v63  ;;  %v536_v53 = vld [vmem:[#allocation5 + $0xd98] sm:$0xff] }
  0x67   :  { %858 = vmatpush.msrb.mxu2 %v103_v0  ;;  %962 = vmatpush.msra.mxu3 %v620_v24  ;;  %v3244_v54 = vld [vmem:[#allocation2 + $0x28] sm:$0xff]  ;;  %v499_v0 = vld [vmem:[#allocation5 + $0xc70] sm:$0xff]  ;;  %v441_v24 = vld [vmem:[#allocation5 + $0xaa0] sm:$0xff] }
  0x68   :  { %889 = vmatpush.msra.mxu0 %v667_v3  ;;  %912 = vmatpush.msra.mxu1 %v284_v4  ;;  %v140_v56 = vld [vmem:[#allocation5 + $0x138] sm:$0xff] }
  0x69   :  { %935 = vmatpush.msra.mxu2 %v476_v5  ;;  %813 = vmatmul.f32.vlgmr.msrb.gmra.mxu0 %v3228_v57  ;;  %v332_v58 = vld [vmem:[#allocation5 + $0x738] sm:$0xff]  ;;  %v487_v5 = vld [vmem:[#allocation5 + $0xc10] sm:$0xff] }
  0x6a   :  { %913 = vmatpush.msra.mxu1 %v272_v8  ;;  %890 = vmatpush.msra.mxu0 %v655_v9  ;;  %v524_v59 = vld [vmem:[#allocation5 + $0xd38] sm:$0xff] }
  0x6b   :  { %936 = vmatpush.msra.mxu2 %v464_v10  ;;  %747 = vmatmul.f32.gmra.mxu1 %v3238_v12  ;;  %v128_v61 = vld [vmem:[#allocation5 + $0xd8] sm:$0xff]  ;;  %v285_v10 = vld [vmem:[#allocation5 + $0x5c0] sm:$0xff] }
  0x6c   :  { %891 = vmatpush.msra.mxu0 %v643_v13  ;;  %914 = vmatpush.msra.mxu1 %v260_v14  ;;  %v320_v62 = vld [vmem:[#allocation5 + $0x6d8] sm:$0xff]  ;;  %v669_v13 = vld [vmem:[#allocation5 + $0x11c0] sm:$0xff]  ;;  %v286_v14 = vld [vmem:[#allocation5 + $0x5c8] sm:$0xff] }
  0x6d   :  { %937 = vmatpush.msra.mxu2 %v452_v15  ;;  %963 = vmatpush.msra.mxu3 %v608_v28  ;;  %v512_v63 = vld [vmem:[#allocation5 + $0xcd8] sm:$0xff]  ;;  %v465_v15 = vld [vmem:[#allocation5 + $0xb60] sm:$0xff] }
  0x6e   :  { %892 = vmatpush.msra.mxu0 %v631_v17  ;;  %915 = vmatpush.msra.mxu1 %v248_v18  ;;  %v116_v1 = vld [vmem:[#allocation5 + $0x78] sm:$0xff]  ;;  %v657_v17 = vld [vmem:[#allocation5 + $0x1160] sm:$0xff]  ;;  %v274_v18 = vld [vmem:[#allocation5 + $0x568] sm:$0xff] }
  0x6f   :  { %938 = vmatpush.msra.mxu2 %v440_v19  ;;  %964 = vmatpush.msra.mxu3 %v596_v32  ;;  %v308_v3 = vld [vmem:[#allocation5 + $0x678] sm:$0xff]  ;;  %v261_v19 = vld [vmem:[#allocation5 + $0x500] sm:$0xff] }
  0x70   :  { %893 = vmatpush.msra.mxu0 %v619_v21  ;;  %916 = vmatpush.msra.mxu1 %v236_v22  ;;  %v500_v4 = vld [vmem:[#allocation5 + $0xc78] sm:$0xff]  ;;  %v645_v21 = vld [vmem:[#allocation5 + $0x1100] sm:$0xff]  ;;  %v262_v22 = vld [vmem:[#allocation5 + $0x508] sm:$0xff] }
  0x71   :  { %939 = vmatpush.msra.mxu2 %v428_v23  ;;  %965 = vmatpush.msra.mxu3 %v584_v36  ;;  %v104_v6 = vld [vmem:[#allocation5 + $0x18] sm:$0xff]  ;;  %v249_v23 = vld [vmem:[#allocation5 + $0x4a0] sm:$0xff] }
  0x72   :  { %917 = vmatpush.msra.mxu1 %v224_v25  ;;  %894 = vmatpush.msra.mxu0 %v607_v26  ;;  %v296_v8 = vld [vmem:[#allocation5 + $0x618] sm:$0xff]  ;;  %v633_v25 = vld [vmem:[#allocation5 + $0x10a0] sm:$0xff]  ;;  %v250_v26 = vld [vmem:[#allocation5 + $0x4a8] sm:$0xff] }
  0x73   :  { %940 = vmatpush.msra.mxu2 %v416_v27  ;;  %836 = vmatmul.f32.vlgmr.msrb.gmra.mxu1 %v3232_v2  ;;  %v488_v9 = vld [vmem:[#allocation5 + $0xc18] sm:$0xff]  ;;  %v237_v27 = vld [vmem:[#allocation5 + $0x440] sm:$0xff] }
  0x74   :  { %895 = vmatpush.msra.mxu0 %v595_v29  ;;  %918 = vmatpush.msra.mxu1 %v212_v30  ;;  %v429_v28 = vld [vmem:[#allocation5 + $0xa40] sm:$0xff]  ;;  %v238_v30 = vld [vmem:[#allocation5 + $0x448] sm:$0xff] }
  0x75   :  { %941 = vmatpush.msra.mxu2 %v404_v31  ;;  %966 = vmatpush.msra.mxu3 %v572_v40  ;;  %v621_v29 = vld [vmem:[#allocation5 + $0x1040] sm:$0xff] }
  0x76   :  { %896 = vmatpush.msra.mxu0 %v583_v33  ;;  %919 = vmatpush.msra.mxu1 %v200_v34  ;;  %v417_v31 = vld [vmem:[#allocation5 + $0x9e0] sm:$0xff]  ;;  %v226_v34 = vld [vmem:[#allocation5 + $0x3e8] sm:$0xff] }
  0x77   :  { %942 = vmatpush.msra.mxu2 %v392_v35  ;;  %967 = vmatpush.msra.mxu3 %v560_v44  ;;  %v225_v32 = vld [vmem:[#allocation5 + $0x3e0] sm:$0xff] }
  0x78   :  { %897 = vmatpush.msra.mxu0 %v571_v37  ;;  %920 = vmatpush.msra.mxu1 %v188_v38  ;;  %v609_v33 = vld [vmem:[#allocation5 + $0xfe0] sm:$0xff]  ;;  %v214_v38 = vld [vmem:[#allocation5 + $0x388] sm:$0xff] }
  0x79   :  { %943 = vmatpush.msra.mxu2 %v380_v39  ;;  %968 = vmatpush.msra.mxu3 %v548_v48  ;;  %v405_v35 = vld [vmem:[#allocation5 + $0x980] sm:$0xff] }
  0x7a   :  { %898 = vmatpush.msra.mxu0 %v559_v41  ;;  %921 = vmatpush.msra.mxu1 %v176_v42  ;;  %v213_v36 = vld [vmem:[#allocation5 + $0x380] sm:$0xff]  ;;  %v202_v42 = vld [vmem:[#allocation5 + $0x328] sm:$0xff] }
  0x7b   :  { %944 = vmatpush.msra.mxu2 %v368_v43  ;;  %969 = vmatpush.msra.mxu3 %v536_v53  ;;  %v597_v37 = vld [vmem:[#allocation5 + $0xf80] sm:$0xff] }
  0x7c   :  { %899 = vmatpush.msra.mxu0 %v547_v45  ;;  %922 = vmatpush.msra.mxu1 %v164_v46  ;;  %v393_v39 = vld [vmem:[#allocation5 + $0x920] sm:$0xff]  ;;  %v190_v46 = vld [vmem:[#allocation5 + $0x2c8] sm:$0xff] }
  0x7d   :  { %945 = vmatpush.msra.mxu2 %v356_v47  ;;  %793 = vmatmul.f32.gmra.mxu3 %v3236_v7  ;;  %v201_v40 = vld [vmem:[#allocation5 + $0x320] sm:$0xff] }
  0x7e   :  { %900 = vmatpush.msra.mxu0 %v535_v49  ;;  %923 = vmatpush.msra.mxu1 %v152_v50  ;;  %v585_v41 = vld [vmem:[#allocation5 + $0xf20] sm:$0xff]  ;;  %v178_v50 = vld [vmem:[#allocation5 + $0x268] sm:$0xff] }
  0x7f   :  { %946 = vmatpush.msra.mxu2 %v344_v51  ;;  %970 = vmatpush.msra.mxu3 %v524_v59  ;;  %v381_v43 = vld [vmem:[#allocation5 + $0x8c0] sm:$0xff] }
  0x80   :  { %770 = vmatmul.f32.gmra.mxu2 %v3244_v54  ;;  %901 = vmatpush.msra.mxu0 %v523_v55  ;;  %v189_v44 = vld [vmem:[#allocation5 + $0x2c0] sm:$0xff] }
  0x81   :  { %924 = vmatpush.msra.mxu1 %v140_v56  ;;  %947 = vmatpush.msra.mxu2 %v332_v58  ;;  %v573_v45 = vld [vmem:[#allocation5 + $0xec0] sm:$0xff]  ;;  %v166_v56 = vld [vmem:[#allocation5 + $0x208] sm:$0xff] }
  0x82   :  { %902 = vmatpush.msra.mxu0 %v511_v60  ;;  %971 = vmatpush.msra.mxu3 %v512_v63  ;;  %v369_v47 = vld [vmem:[#allocation5 + $0x860] sm:$0xff] }
  0x83   :  { %925 = vmatpush.msra.mxu1 %v128_v61  ;;  %948 = vmatpush.msra.mxu2 %v320_v62  ;;  %v177_v48 = vld [vmem:[#allocation5 + $0x260] sm:$0xff]  ;;  %v154_v61 = vld [vmem:[#allocation5 + $0x1a8] sm:$0xff] }
  0x84   :  { %903 = vmatpush.msra.mxu0 %v499_v0  ;;  %972 = vmatpush.msra.mxu3 %v500_v4  ;;  %v561_v49 = vld [vmem:[#allocation5 + $0xe60] sm:$0xff] }
  0x85   :  { %926 = vmatpush.msra.mxu1 %v116_v1  ;;  %949 = vmatpush.msra.mxu2 %v308_v3  ;;  %v357_v51 = vld [vmem:[#allocation5 + $0x800] sm:$0xff]  ;;  %v142_v1 = vld [vmem:[#allocation5 + $0x148] sm:$0xff] }
  0x86   :  { %904 = vmatpush.msra.mxu0 %v487_v5  ;;  %973 = vmatpush.msra.mxu3 %v488_v9  ;;  %v165_v53 = vld [vmem:[#allocation5 + $0x200] sm:$0xff] }
  0x87   :  { %927 = vmatpush.msra.mxu1 %v104_v6  ;;  %950 = vmatpush.msra.mxu2 %v296_v8  ;;  %v549_v55 = vld [vmem:[#allocation5 + $0xe00] sm:$0xff]  ;;  %v130_v6 = vld [vmem:[#allocation5 + $0xe8] sm:$0xff] }
  0x88   :  { %859 = vmatmul.f32.vlgmr.msrb.gmra.mxu2 %v3226_v52  ;;  %882 = vmatmul.f32.vlgmr.msrb.gmra.mxu3 %v3228_v57  ;;  %v345_v58 = vld [vmem:[#allocation5 + $0x7a0] sm:$0xff] }
  0x89   :  { %981 = vmatpush.msrb.mxu0 %v285_v10  ;;  %1004 = vmatpush.msrb.mxu1 %v477_v11  ;;  %v153_v59 = vld [vmem:[#allocation5 + $0x1a0] sm:$0xff]  ;;  %v118_v11 = vld [vmem:[#allocation5 + $0x88] sm:$0xff] }
  0x8a   :  { %1027 = vmatpush.msrb.mxu2 %v669_v13  ;;  %1050 = vmatpush.msrb.mxu3 %v286_v14  ;;  %v537_v60 = vld [vmem:[#allocation5 + $0xda0] sm:$0xff] }
  0x8b   :  { %816 = vmatmul.f32.gmra.mxu0 %v3238_v12  ;;  %1005 = vmatpush.msrb.mxu1 %v465_v15  ;;  %v141_v62 = vld [vmem:[#allocation5 + $0x140] sm:$0xff] }
  0x8c   :  { %982 = vmatpush.msrb.mxu0 %v273_v16  ;;  %1028 = vmatpush.msrb.mxu2 %v657_v17  ;;  %v333_v63 = vld [vmem:[#allocation5 + $0x740] sm:$0xff]  ;;  %v106_v16 = vld [vmem:[#allocation5 + $0x28] sm:$0xff] }
  0x8d   :  { %1051 = vmatpush.msrb.mxu3 %v274_v18  ;;  %839 = vmatmul.f32.gmra.mxu1 %v3244_v54  ;;  %v525_v0 = vld [vmem:[#allocation5 + $0xd40] sm:$0xff]  ;;  %v478_v17 = vld [vmem:[#allocation5 + $0xbc8] sm:$0xff] }
  0x8e   :  { %983 = vmatpush.msrb.mxu0 %v261_v19  ;;  %1006 = vmatpush.msrb.mxu1 %v453_v20  ;;  %v129_v3 = vld [vmem:[#allocation5 + $0xe0] sm:$0xff]  ;;  %v670_v18 = vld [vmem:[#allocation5 + $0x11c8] sm:$0xff]  ;;  %v287_v19 = vld [vmem:[#allocation5 + $0x5d0] sm:$0xff] }
  0x8f   :  { %1029 = vmatpush.msrb.mxu2 %v645_v21  ;;  %1052 = vmatpush.msrb.mxu3 %v262_v22  ;;  %v321_v4 = vld [vmem:[#allocation5 + $0x6e0] sm:$0xff]  ;;  %v479_v20 = vld [vmem:[#allocation5 + $0xbd0] sm:$0xff]  ;;  %v658_v21 = vld [vmem:[#allocation5 + $0x1168] sm:$0xff] }
  0x90   :  { %984 = vmatpush.msrb.mxu0 %v249_v23  ;;  %1007 = vmatpush.msrb.mxu1 %v441_v24  ;;  %v513_v5 = vld [vmem:[#allocation5 + $0xce0] sm:$0xff]  ;;  %v466_v22 = vld [vmem:[#allocation5 + $0xb68] sm:$0xff]  ;;  %v275_v23 = vld [vmem:[#allocation5 + $0x570] sm:$0xff] }
  0x91   :  { %1030 = vmatpush.msrb.mxu2 %v633_v25  ;;  %1053 = vmatpush.msrb.mxu3 %v250_v26  ;;  %v117_v8 = vld [vmem:[#allocation5 + $0x80] sm:$0xff]  ;;  %v467_v24 = vld [vmem:[#allocation5 + $0xb70] sm:$0xff]  ;;  %v646_v25 = vld [vmem:[#allocation5 + $0x1108] sm:$0xff] }
  0x92   :  { %985 = vmatpush.msrb.mxu0 %v237_v27  ;;  %1008 = vmatpush.msrb.mxu1 %v429_v28  ;;  %v309_v9 = vld [vmem:[#allocation5 + $0x680] sm:$0xff]  ;;  %v454_v26 = vld [vmem:[#allocation5 + $0xb08] sm:$0xff]  ;;  %v263_v27 = vld [vmem:[#allocation5 + $0x510] sm:$0xff] }
  0x93   :  { %1031 = vmatpush.msrb.mxu2 %v621_v29  ;;  %1054 = vmatpush.msrb.mxu3 %v238_v30  ;;  %v501_v10 = vld [vmem:[#allocation5 + $0xc80] sm:$0xff]  ;;  %v455_v28 = vld [vmem:[#allocation5 + $0xb10] sm:$0xff]  ;;  %v634_v29 = vld [vmem:[#allocation5 + $0x10a8] sm:$0xff] }
  0x94   :  { %905 = vmatmul.f32.vlgmr.msra.gmra.mxu0 %v3232_v2  ;;  %1009 = vmatpush.msrb.mxu1 %v417_v31  ;;  %v105_v13 = vld [vmem:[#allocation5 + $0x20] sm:$0xff]  ;;  %v442_v30 = vld [vmem:[#allocation5 + $0xaa8] sm:$0xff]  ;;  %v251_v31 = vld [vmem:[#allocation5 + $0x4b0] sm:$0xff] }
  0x95   :  { %986 = vmatpush.msrb.mxu0 %v225_v32  ;;  %1032 = vmatpush.msrb.mxu2 %v609_v33  ;;  %v297_v14 = vld [vmem:[#allocation5 + $0x620] sm:$0xff]  ;;  %v443_v32 = vld [vmem:[#allocation5 + $0xab0] sm:$0xff]  ;;  %v622_v33 = vld [vmem:[#allocation5 + $0x1048] sm:$0xff] }
  0x96   :  { %1055 = vmatpush.msrb.mxu3 %v226_v34  ;;  %1010 = vmatpush.msrb.mxu1 %v405_v35  ;;  %v489_v15 = vld [vmem:[#allocation5 + $0xc20] sm:$0xff]  ;;  %v430_v34 = vld [vmem:[#allocation5 + $0xa48] sm:$0xff]  ;;  %v239_v35 = vld [vmem:[#allocation5 + $0x450] sm:$0xff] }
  0x97   :  { %987 = vmatpush.msrb.mxu0 %v213_v36  ;;  %1033 = vmatpush.msrb.mxu2 %v597_v37  ;;  %v431_v36 = vld [vmem:[#allocation5 + $0xa50] sm:$0xff]  ;;  %v610_v37 = vld [vmem:[#allocation5 + $0xfe8] sm:$0xff] }
  0x98   :  { %1056 = vmatpush.msrb.mxu3 %v214_v38  ;;  %1011 = vmatpush.msrb.mxu1 %v393_v39  ;;  %v418_v38 = vld [vmem:[#allocation5 + $0x9e8] sm:$0xff]  ;;  %v227_v39 = vld [vmem:[#allocation5 + $0x3f0] sm:$0xff] }
  0x99   :  { %988 = vmatpush.msrb.mxu0 %v201_v40  ;;  %1034 = vmatpush.msrb.mxu2 %v585_v41  ;;  %v419_v40 = vld [vmem:[#allocation5 + $0x9f0] sm:$0xff]  ;;  %v598_v41 = vld [vmem:[#allocation5 + $0xf88] sm:$0xff] }
  0x9a   :  { %1057 = vmatpush.msrb.mxu3 %v202_v42  ;;  %1012 = vmatpush.msrb.mxu1 %v381_v43  ;;  %v406_v42 = vld [vmem:[#allocation5 + $0x988] sm:$0xff]  ;;  %v215_v43 = vld [vmem:[#allocation5 + $0x390] sm:$0xff] }
  0x9b   :  { %989 = vmatpush.msrb.mxu0 %v189_v44  ;;  %1035 = vmatpush.msrb.mxu2 %v573_v45  ;;  %v407_v44 = vld [vmem:[#allocation5 + $0x990] sm:$0xff]  ;;  %v586_v45 = vld [vmem:[#allocation5 + $0xf28] sm:$0xff] }
  0x9c   :  { %1058 = vmatpush.msrb.mxu3 %v190_v46  ;;  %1013 = vmatpush.msrb.mxu1 %v369_v47  ;;  %v394_v46 = vld [vmem:[#allocation5 + $0x928] sm:$0xff]  ;;  %v203_v47 = vld [vmem:[#allocation5 + $0x330] sm:$0xff] }
  0x9d   :  { %990 = vmatpush.msrb.mxu0 %v177_v48  ;;  %1036 = vmatpush.msrb.mxu2 %v561_v49  ;;  %v395_v48 = vld [vmem:[#allocation5 + $0x930] sm:$0xff]  ;;  %v574_v49 = vld [vmem:[#allocation5 + $0xec8] sm:$0xff] }
  0x9e   :  { %1059 = vmatpush.msrb.mxu3 %v178_v50  ;;  %1014 = vmatpush.msrb.mxu1 %v357_v51  ;;  %v382_v50 = vld [vmem:[#allocation5 + $0x8c8] sm:$0xff]  ;;  %v191_v51 = vld [vmem:[#allocation5 + $0x2d0] sm:$0xff] }
  0x9f   :  { %991 = vmatpush.msrb.mxu0 %v165_v53  ;;  %1037 = vmatpush.msrb.mxu2 %v549_v55  ;;  %v383_v53 = vld [vmem:[#allocation5 + $0x8d0] sm:$0xff]  ;;  %v562_v55 = vld [vmem:[#allocation5 + $0xe68] sm:$0xff] }
  0xa0   :  { %1060 = vmatpush.msrb.mxu3 %v166_v56  ;;  %1015 = vmatpush.msrb.mxu1 %v345_v58  ;;  %v370_v56 = vld [vmem:[#allocation5 + $0x868] sm:$0xff]  ;;  %v179_v58 = vld [vmem:[#allocation5 + $0x270] sm:$0xff] }
  0xa1   :  { %992 = vmatpush.msrb.mxu0 %v153_v59  ;;  %1038 = vmatpush.msrb.mxu2 %v537_v60  ;;  %v371_v59 = vld [vmem:[#allocation5 + $0x870] sm:$0xff]  ;;  %v358_v60 = vld [vmem:[#allocation5 + $0x808] sm:$0xff] }
  0xa2   :  { %1061 = vmatpush.msrb.mxu3 %v154_v61  ;;  %862 = vmatmul.f32.gmra.mxu2 %v3236_v7  ;;  %v550_v61 = vld [vmem:[#allocation5 + $0xe08] sm:$0xff] }
  0xa3   :  { %885 = vmatmul.f32.gmra.mxu3 %v3238_v12  ;;  %993 = vmatpush.msrb.mxu0 %v141_v62  ;;  %v167_v62 = vld [vmem:[#allocation5 + $0x210] sm:$0xff] }
  0xa4   :  { %1016 = vmatpush.msrb.mxu1 %v333_v63  ;;  %1039 = vmatpush.msrb.mxu2 %v525_v0  ;;  %v359_v63 = vld [vmem:[#allocation5 + $0x810] sm:$0xff]  ;;  %v346_v0 = vld [vmem:[#allocation5 + $0x7a8] sm:$0xff] }
  0xa5   :  { %1062 = vmatpush.msrb.mxu3 %v142_v1  ;;  %994 = vmatpush.msrb.mxu0 %v129_v3  ;;  %v538_v1 = vld [vmem:[#allocation5 + $0xda8] sm:$0xff]  ;;  %v155_v3 = vld [vmem:[#allocation5 + $0x1b0] sm:$0xff] }
  0xa6   :  { %1017 = vmatpush.msrb.mxu1 %v321_v4  ;;  %1040 = vmatpush.msrb.mxu2 %v513_v5  ;;  %v347_v4 = vld [vmem:[#allocation5 + $0x7b0] sm:$0xff]  ;;  %v334_v5 = vld [vmem:[#allocation5 + $0x748] sm:$0xff] }
  0xa7   :  { %1063 = vmatpush.msrb.mxu3 %v130_v6  ;;  %995 = vmatpush.msrb.mxu0 %v117_v8  ;;  %v526_v6 = vld [vmem:[#allocation5 + $0xd48] sm:$0xff]  ;;  %v143_v8 = vld [vmem:[#allocation5 + $0x150] sm:$0xff] }
  0xa8   :  { %1018 = vmatpush.msrb.mxu1 %v309_v9  ;;  %1041 = vmatpush.msrb.mxu2 %v501_v10  ;;  %v335_v9 = vld [vmem:[#allocation5 + $0x750] sm:$0xff]  ;;  %v514_v10 = vld [vmem:[#allocation5 + $0xce8] sm:$0xff] }
  0xa9   :  { %1064 = vmatpush.msrb.mxu3 %v118_v11  ;;  %996 = vmatpush.msrb.mxu0 %v105_v13  ;;  %v322_v11 = vld [vmem:[#allocation5 + $0x6e8] sm:$0xff]  ;;  %v131_v13 = vld [vmem:[#allocation5 + $0xf0] sm:$0xff] }
  0xaa   :  { %1019 = vmatpush.msrb.mxu1 %v297_v14  ;;  %1042 = vmatpush.msrb.mxu2 %v489_v15  ;;  %v323_v14 = vld [vmem:[#allocation5 + $0x6f0] sm:$0xff]  ;;  %v310_v15 = vld [vmem:[#allocation5 + $0x688] sm:$0xff] }
  0xab   :  { %1065 = vmatpush.msrb.mxu3 %v106_v16  ;;  %928 = vmatmul.f32.vlgmr.msra.gmra.mxu1 %v3226_v52  ;;  %v502_v16 = vld [vmem:[#allocation5 + $0xc88] sm:$0xff] }
  0xac   :  { %951 = vmatmul.f32.vlgmr.msra.gmra.mxu2 %v3228_v57  ;;  %974 = vmatmul.f32.vlgmr.msra.gmra.mxu3 %v3232_v2 }
  0xad   :  { %1073 = vmatpush.msra.mxu0 %v478_v17  ;;  %1096 = vmatpush.msra.mxu1 %v670_v18  ;;  %v119_v17 = vld [vmem:[#allocation5 + $0x90] sm:$0xff] }
  0xae   :  { %1119 = vmatpush.msra.mxu2 %v287_v19  ;;  %1142 = vmatpush.msra.mxu3 %v479_v20  ;;  %v311_v18 = vld [vmem:[#allocation5 + $0x690] sm:$0xff]  ;;  %v298_v19 = vld [vmem:[#allocation5 + $0x628] sm:$0xff] }
  0xaf   :  { %908 = vmatmul.f32.gmra.mxu0 %v3244_v54  ;;  %1097 = vmatpush.msra.mxu1 %v658_v21  ;;  %v490_v20 = vld [vmem:[#allocation5 + $0xc28] sm:$0xff]  ;;  %v107_v21 = vld [vmem:[#allocation5 + $0x30] sm:$0xff] }
  0xb0   :  { %1074 = vmatpush.msra.mxu0 %v466_v22  ;;  %1120 = vmatpush.msra.mxu2 %v275_v23  ;;  %v299_v22 = vld [vmem:[#allocation5 + $0x630] sm:$0xff] }
  0xb1   :  { %1143 = vmatpush.msra.mxu3 %v467_v24  ;;  %1098 = vmatpush.msra.mxu1 %v646_v25  ;;  %v671_v23 = vld [vmem:[#allocation5 + $0x11d0] sm:$0xff]  ;;  %v288_v24 = vld [vmem:[#allocation5 + $0x5d8] sm:$0xff] }
  0xb2   :  { %1075 = vmatpush.msra.mxu0 %v454_v26  ;;  %1121 = vmatpush.msra.mxu2 %v263_v27  ;;  %v480_v25 = vld [vmem:[#allocation5 + $0xbd8] sm:$0xff] }
  0xb3   :  { %1144 = vmatpush.msra.mxu3 %v455_v28  ;;  %1099 = vmatpush.msra.mxu1 %v634_v29  ;;  %v672_v26 = vld [vmem:[#allocation5 + $0x11d8] sm:$0xff]  ;;  %v659_v28 = vld [vmem:[#allocation5 + $0x1170] sm:$0xff] }
  0xb4   :  { %1076 = vmatpush.msra.mxu0 %v442_v30  ;;  %1122 = vmatpush.msra.mxu2 %v251_v31  ;;  %v276_v27 = vld [vmem:[#allocation5 + $0x578] sm:$0xff]  ;;  %v647_v31 = vld [vmem:[#allocation5 + $0x1110] sm:$0xff] }
  0xb5   :  { %1145 = vmatpush.msra.mxu3 %v443_v32  ;;  %1100 = vmatpush.msra.mxu1 %v622_v33  ;;  %v468_v29 = vld [vmem:[#allocation5 + $0xb78] sm:$0xff] }
  0xb6   :  { %1077 = vmatpush.msra.mxu0 %v430_v34  ;;  %1123 = vmatpush.msra.mxu2 %v239_v35  ;;  %v660_v30 = vld [vmem:[#allocation5 + $0x1178] sm:$0xff] }
  0xb7   :  { %1146 = vmatpush.msra.mxu3 %v431_v36  ;;  %1101 = vmatpush.msra.mxu1 %v610_v37  ;;  %v264_v32 = vld [vmem:[#allocation5 + $0x518] sm:$0xff] }
  0xb8   :  { %1078 = vmatpush.msra.mxu0 %v418_v38  ;;  %1124 = vmatpush.msra.mxu2 %v227_v39  ;;  %v456_v33 = vld [vmem:[#allocation5 + $0xb18] sm:$0xff]  ;;  %v623_v38 = vld [vmem:[#allocation5 + $0x1050] sm:$0xff] }
  0xb9   :  { %1147 = vmatpush.msra.mxu3 %v419_v40  ;;  %1102 = vmatpush.msra.mxu1 %v598_v41  ;;  %v648_v34 = vld [vmem:[#allocation5 + $0x1118] sm:$0xff] }
  0xba   :  { %1079 = vmatpush.msra.mxu0 %v406_v42  ;;  %1125 = vmatpush.msra.mxu2 %v215_v43  ;;  %v252_v35 = vld [vmem:[#allocation5 + $0x4b8] sm:$0xff] }
  0xbb   :  { %1148 = vmatpush.msra.mxu3 %v407_v44  ;;  %1103 = vmatpush.msra.mxu1 %v586_v45  ;;  %v444_v36 = vld [vmem:[#allocation5 + $0xab8] sm:$0xff]  ;;  %v599_v44 = vld [vmem:[#allocation5 + $0xf90] sm:$0xff] }
  0xbc   :  { %1080 = vmatpush.msra.mxu0 %v394_v46  ;;  %1126 = vmatpush.msra.mxu2 %v203_v47  ;;  %v636_v37 = vld [vmem:[#allocation5 + $0x10b8] sm:$0xff] }
  0xbd   :  { %1149 = vmatpush.msra.mxu3 %v395_v48  ;;  %1104 = vmatpush.msra.mxu1 %v574_v49  ;;  %v432_v39 = vld [vmem:[#allocation5 + $0xa58] sm:$0xff]  ;;  %v587_v48 = vld [vmem:[#allocation5 + $0xf30] sm:$0xff] }
  0xbe   :  { %1081 = vmatpush.msra.mxu0 %v382_v50  ;;  %1127 = vmatpush.msra.mxu2 %v191_v51  ;;  %v624_v40 = vld [vmem:[#allocation5 + $0x1058] sm:$0xff] }
  0xbf   :  { %1150 = vmatpush.msra.mxu3 %v383_v53  ;;  %1105 = vmatpush.msra.mxu1 %v562_v55  ;;  %v228_v41 = vld [vmem:[#allocation5 + $0x3f8] sm:$0xff]  ;;  %v575_v53 = vld [vmem:[#allocation5 + $0xed0] sm:$0xff] }
  0xc0   :  { %1082 = vmatpush.msra.mxu0 %v370_v56  ;;  %1128 = vmatpush.msra.mxu2 %v179_v58  ;;  %v420_v42 = vld [vmem:[#allocation5 + $0x9f8] sm:$0xff]  ;;  %v563_v58 = vld [vmem:[#allocation5 + $0xe70] sm:$0xff] }
  0xc1   :  { %1151 = vmatpush.msra.mxu3 %v371_v59  ;;  %931 = vmatmul.f32.gmra.mxu1 %v3236_v7  ;;  %v612_v43 = vld [vmem:[#allocation5 + $0xff8] sm:$0xff] }
  0xc2   :  { %1083 = vmatpush.msra.mxu0 %v358_v60  ;;  %1106 = vmatpush.msra.mxu1 %v550_v61  ;;  %v216_v45 = vld [vmem:[#allocation5 + $0x398] sm:$0xff]  ;;  %v551_v61 = vld [vmem:[#allocation5 + $0xe10] sm:$0xff] }
  0xc3   :  { %1129 = vmatpush.msra.mxu2 %v167_v62  ;;  %1152 = vmatpush.msra.mxu3 %v359_v63  ;;  %v408_v46 = vld [vmem:[#allocation5 + $0x998] sm:$0xff] }
  0xc4   :  { %1084 = vmatpush.msra.mxu0 %v346_v0  ;;  %1107 = vmatpush.msra.mxu1 %v538_v1  ;;  %v600_v47 = vld [vmem:[#allocation5 + $0xf98] sm:$0xff]  ;;  %v539_v1 = vld [vmem:[#allocation5 + $0xdb0] sm:$0xff] }
  0xc5   :  { %1130 = vmatpush.msra.mxu2 %v155_v3  ;;  %1153 = vmatpush.msra.mxu3 %v347_v4  ;;  %v204_v49 = vld [vmem:[#allocation5 + $0x338] sm:$0xff] }
  0xc6   :  { %954 = vmatmul.f32.gmra.mxu2 %v3238_v12  ;;  %977 = vmatmul.f32.gmra.mxu3 %v3244_v54  ;;  %v396_v50 = vld [vmem:[#allocation5 + $0x938] sm:$0xff] }
  0xc7   :  { %1085 = vmatpush.msra.mxu0 %v334_v5  ;;  %1108 = vmatpush.msra.mxu1 %v526_v6  ;;  %v588_v51 = vld [vmem:[#allocation5 + $0xf38] sm:$0xff]  ;;  %v527_v6 = vld [vmem:[#allocation5 + $0xd50] sm:$0xff] }
  0xc8   :  { %1131 = vmatpush.msra.mxu2 %v143_v8  ;;  %1154 = vmatpush.msra.mxu3 %v335_v9  ;;  %v384_v55 = vld [vmem:[#allocation5 + $0x8d8] sm:$0xff] }
  0xc9   :  { %997 = vmatmul.f32.vlgmr.msrb.gmra.mxu0 %v3226_v52  ;;  %1109 = vmatpush.msra.mxu1 %v514_v10  ;;  %v576_v56 = vld [vmem:[#allocation5 + $0xed8] sm:$0xff] }
  0xca   :  { %1086 = vmatpush.msra.mxu0 %v322_v11  ;;  %1132 = vmatpush.msra.mxu2 %v131_v13  ;;  %v180_v59 = vld [vmem:[#allocation5 + $0x278] sm:$0xff]  ;;  %v3271_v11 = vld [vmem:[#allocation2 + $0x18] sm:$0xff]  ;;  %v515_v13 = vld [vmem:[#allocation5 + $0xcf0] sm:$0xff] }
  0xcb   :  { %1155 = vmatpush.msra.mxu3 %v323_v14  ;;  %1020 = vmatmul.f32.vlgmr.msrb.gmra.mxu1 %v3228_v57  ;;  %v564_v60 = vld [vmem:[#allocation5 + $0xe78] sm:$0xff] }
  0xcc   :  { %1087 = vmatpush.msra.mxu0 %v310_v15  ;;  %1110 = vmatpush.msra.mxu1 %v502_v16  ;;  %v168_v62 = vld [vmem:[#allocation5 + $0x218] sm:$0xff] }
  0xcd   :  { %1133 = vmatpush.msra.mxu2 %v119_v17  ;;  %1156 = vmatpush.msra.mxu3 %v311_v18  ;;  %v360_v63 = vld [vmem:[#allocation5 + $0x818] sm:$0xff]  ;;  %v503_v17 = vld [vmem:[#allocation5 + $0xc90] sm:$0xff] }
  0xce   :  { %1088 = vmatpush.msra.mxu0 %v298_v19  ;;  %1111 = vmatpush.msra.mxu1 %v490_v20  ;;  %v552_v0 = vld [vmem:[#allocation5 + $0xe18] sm:$0xff] }
  0xcf   :  { %1134 = vmatpush.msra.mxu2 %v107_v21  ;;  %1157 = vmatpush.msra.mxu3 %v299_v22  ;;  %v156_v3 = vld [vmem:[#allocation5 + $0x1b8] sm:$0xff]  ;;  %v491_v21 = vld [vmem:[#allocation5 + $0xc30] sm:$0xff] }
  0xd0   :  { %1043 = vmatmul.f32.vlgmr.msrb.gmra.mxu2 %v3232_v2  ;;  %1066 = vmatmul.f32.vlgmr.msrb.gmra.mxu3 %v3226_v52  ;;  %v635_v52 = vld [vmem:[#allocation5 + $0x10b0] sm:$0xff]  ;;  %v348_v4 = vld [vmem:[#allocation5 + $0x7b8] sm:$0xff] }
  0xd1   :  { %1165 = vmatpush.msrb.mxu0 %v671_v23  ;;  %1188 = vmatpush.msrb.mxu1 %v288_v24  ;;  %v540_v5 = vld [vmem:[#allocation5 + $0xdb8] sm:$0xff] }
  0xd2   :  { %1211 = vmatpush.msrb.mxu2 %v480_v25  ;;  %1234 = vmatpush.msrb.mxu3 %v672_v26  ;;  %v144_v8 = vld [vmem:[#allocation5 + $0x158] sm:$0xff]  ;;  %v289_v25 = vld [vmem:[#allocation5 + $0x5e0] sm:$0xff] }
  0xd3   :  { %1000 = vmatmul.f32.gmra.mxu0 %v3236_v7  ;;  %1189 = vmatpush.msrb.mxu1 %v276_v27  ;;  %v240_v7 = vld [vmem:[#allocation5 + $0x458] sm:$0xff]  ;;  %v481_v26 = vld [vmem:[#allocation5 + $0xbe0] sm:$0xff] }
  0xd4   :  { %1166 = vmatpush.msrb.mxu0 %v659_v28  ;;  %1212 = vmatpush.msrb.mxu2 %v468_v29  ;;  %v336_v9 = vld [vmem:[#allocation5 + $0x758] sm:$0xff]  ;;  %v673_v27 = vld [vmem:[#allocation5 + $0x11e0] sm:$0xff]  ;;  %v290_v28 = vld [vmem:[#allocation5 + $0x5e8] sm:$0xff] }
  0xd5   :  { %1235 = vmatpush.msrb.mxu3 %v660_v30  ;;  %1023 = vmatmul.f32.gmra.mxu1 %v3238_v12  ;;  %v611_v12 = vld [vmem:[#allocation5 + $0xff0] sm:$0xff]  ;;  %v528_v10 = vld [vmem:[#allocation5 + $0xd58] sm:$0xff] }
  0xd6   :  { %1167 = vmatpush.msrb.mxu0 %v647_v31  ;;  %1190 = vmatpush.msrb.mxu1 %v264_v32  ;;  %v132_v14 = vld [vmem:[#allocation5 + $0xf8] sm:$0xff]  ;;  %v3274_v29 = vld [vmem:[#allocation2] sm:$0xff]  ;;  %v469_v31 = vld [vmem:[#allocation5 + $0xb80] sm:$0xff] }
  0xd7   :  { %1213 = vmatpush.msrb.mxu2 %v456_v33  ;;  %1236 = vmatpush.msrb.mxu3 %v648_v34  ;;  %v324_v15 = vld [vmem:[#allocation5 + $0x6f8] sm:$0xff]  ;;  %v277_v32 = vld [vmem:[#allocation5 + $0x580] sm:$0xff]  ;;  %v278_v34 = vld [vmem:[#allocation5 + $0x588] sm:$0xff] }
  0xd8   :  { %1168 = vmatpush.msrb.mxu0 %v635_v52  ;;  %1191 = vmatpush.msrb.mxu1 %v252_v35  ;;  %v516_v16 = vld [vmem:[#allocation5 + $0xcf8] sm:$0xff]  ;;  %v661_v33 = vld [vmem:[#allocation5 + $0x1180] sm:$0xff]  ;;  %v3280_v52 = vld [vmem:[#allocation2 + $0x20] sm:$0xff] }
  0xd9   :  { %1214 = vmatpush.msrb.mxu2 %v444_v36  ;;  %1237 = vmatpush.msrb.mxu3 %v636_v37  ;;  %v120_v18 = vld [vmem:[#allocation5 + $0x98] sm:$0xff]  ;;  %v265_v35 = vld [vmem:[#allocation5 + $0x520] sm:$0xff] }
  0xda   :  { %1169 = vmatpush.msrb.mxu0 %v623_v38  ;;  %1192 = vmatpush.msrb.mxu1 %v240_v7  ;;  %v312_v19 = vld [vmem:[#allocation5 + $0x698] sm:$0xff]  ;;  %v457_v36 = vld [vmem:[#allocation5 + $0xb20] sm:$0xff]  ;;  %v266_v38 = vld [vmem:[#allocation5 + $0x528] sm:$0xff] }
  0xdb   :  { %1215 = vmatpush.msrb.mxu2 %v432_v39  ;;  %1238 = vmatpush.msrb.mxu3 %v624_v40  ;;  %v504_v20 = vld [vmem:[#allocation5 + $0xc98] sm:$0xff]  ;;  %v649_v37 = vld [vmem:[#allocation5 + $0x1120] sm:$0xff] }
  0xdc   :  { %1089 = vmatmul.f32.vlgmr.msra.gmra.mxu0 %v3228_v57  ;;  %1193 = vmatpush.msrb.mxu1 %v228_v41  ;;  %v192_v57 = vld [vmem:[#allocation5 + $0x2d8] sm:$0xff]  ;;  %v253_v7 = vld [vmem:[#allocation5 + $0x4c0] sm:$0xff]  ;;  %v254_v41 = vld [vmem:[#allocation5 + $0x4c8] sm:$0xff] }
  0xdd   :  { %1170 = vmatpush.msrb.mxu0 %v611_v12  ;;  %1216 = vmatpush.msrb.mxu2 %v420_v42  ;;  %v108_v22 = vld [vmem:[#allocation5 + $0x38] sm:$0xff]  ;;  %v445_v39 = vld [vmem:[#allocation5 + $0xac0] sm:$0xff] }
  0xde   :  { %1239 = vmatpush.msrb.mxu3 %v612_v43  ;;  %1112 = vmatmul.f32.vlgmr.msra.gmra.mxu1 %v3232_v2  ;;  %v372_v2 = vld [vmem:[#allocation5 + $0x878] sm:$0xff]  ;;  %v637_v40 = vld [vmem:[#allocation5 + $0x10c0] sm:$0xff] }
  0xdf   :  { %1171 = vmatpush.msrb.mxu0 %v599_v44  ;;  %1194 = vmatpush.msrb.mxu1 %v216_v45  ;;  %v300_v23 = vld [vmem:[#allocation5 + $0x638] sm:$0xff]  ;;  %v241_v12 = vld [vmem:[#allocation5 + $0x460] sm:$0xff]  ;;  %v242_v44 = vld [vmem:[#allocation5 + $0x468] sm:$0xff] }
  0xe0   :  { %1217 = vmatpush.msrb.mxu2 %v408_v46  ;;  %1240 = vmatpush.msrb.mxu3 %v600_v47  ;;  %v492_v24 = vld [vmem:[#allocation5 + $0xc38] sm:$0xff]  ;;  %v433_v42 = vld [vmem:[#allocation5 + $0xa60] sm:$0xff]  ;;  %v230_v47 = vld [vmem:[#allocation5 + $0x408] sm:$0xff] }
  0xe1   :  { %1172 = vmatpush.msrb.mxu0 %v587_v48  ;;  %1195 = vmatpush.msrb.mxu1 %v204_v49  ;;  %v3277_v30 = vld [vmem:[#allocation2 + $0x8] sm:$0xff]  ;;  %v625_v43 = vld [vmem:[#allocation5 + $0x1060] sm:$0xff] }
  0xe2   :  { %1218 = vmatpush.msrb.mxu2 %v396_v50  ;;  %1241 = vmatpush.msrb.mxu3 %v588_v51  ;;  %v421_v45 = vld [vmem:[#allocation5 + $0xa00] sm:$0xff] }
  0xe3   :  { %1173 = vmatpush.msrb.mxu0 %v575_v53  ;;  %1196 = vmatpush.msrb.mxu1 %v192_v57  ;;  %v613_v46 = vld [vmem:[#allocation5 + $0x1000] sm:$0xff]  ;;  %v218_v53 = vld [vmem:[#allocation5 + $0x3a8] sm:$0xff] }
  0xe4   :  { %1219 = vmatpush.msrb.mxu2 %v384_v55  ;;  %1242 = vmatpush.msrb.mxu3 %v576_v56  ;;  %v3284_v48 = vld [vmem:[#allocation2 + $0x10] sm:$0xff] }
  0xe5   :  { %1174 = vmatpush.msrb.mxu0 %v563_v58  ;;  %1197 = vmatpush.msrb.mxu1 %v180_v59  ;;  %v217_v49 = vld [vmem:[#allocation5 + $0x3a0] sm:$0xff]  ;;  %v206_v58 = vld [vmem:[#allocation5 + $0x348] sm:$0xff] }
  0xe6   :  { %1220 = vmatpush.msrb.mxu2 %v372_v2  ;;  %1243 = vmatpush.msrb.mxu3 %v564_v60  ;;  %v409_v50 = vld [vmem:[#allocation5 + $0x9a0] sm:$0xff] }
  0xe7   :  { %1175 = vmatpush.msrb.mxu0 %v551_v61  ;;  %1198 = vmatpush.msrb.mxu1 %v168_v62  ;;  %v601_v51 = vld [vmem:[#allocation5 + $0xfa0] sm:$0xff]  ;;  %v194_v61 = vld [vmem:[#allocation5 + $0x2e8] sm:$0xff] }
  0xe8   :  { %1221 = vmatpush.msrb.mxu2 %v360_v63  ;;  %1244 = vmatpush.msrb.mxu3 %v552_v0  ;;  %v205_v57 = vld [vmem:[#allocation5 + $0x340] sm:$0xff] }
  0xe9   :  { %1176 = vmatpush.msrb.mxu0 %v539_v1  ;;  %1199 = vmatpush.msrb.mxu1 %v156_v3  ;;  %v397_v55 = vld [vmem:[#allocation5 + $0x940] sm:$0xff]  ;;  %v182_v1 = vld [vmem:[#allocation5 + $0x288] sm:$0xff] }
  0xea   :  { %1222 = vmatpush.msrb.mxu2 %v348_v4  ;;  %1245 = vmatpush.msrb.mxu3 %v540_v5  ;;  %v589_v56 = vld [vmem:[#allocation5 + $0xf40] sm:$0xff] }
  0xeb   :  { %1046 = vmatmul.f32.gmra.mxu2 %v3244_v54  ;;  %1069 = vmatmul.f32.gmra.mxu3 %v3271_v11  ;;  %v193_v59 = vld [vmem:[#allocation5 + $0x2e0] sm:$0xff] }
  0xec   :  { %1177 = vmatpush.msrb.mxu0 %v527_v6  ;;  %1200 = vmatpush.msrb.mxu1 %v144_v8  ;;  %v385_v2 = vld [vmem:[#allocation5 + $0x8e0] sm:$0xff]  ;;  %v170_v6 = vld [vmem:[#allocation5 + $0x228] sm:$0xff] }
  0xed   :  { %1223 = vmatpush.msrb.mxu2 %v336_v9  ;;  %1246 = vmatpush.msrb.mxu3 %v528_v10  ;;  %v577_v60 = vld [vmem:[#allocation5 + $0xee0] sm:$0xff] }
  0xee   :  { %1178 = vmatpush.msrb.mxu0 %v515_v13  ;;  %1201 = vmatpush.msrb.mxu1 %v132_v14  ;;  %v181_v62 = vld [vmem:[#allocation5 + $0x280] sm:$0xff]  ;;  %v158_v13 = vld [vmem:[#allocation5 + $0x1c8] sm:$0xff] }
  0xef   :  { %1224 = vmatpush.msrb.mxu2 %v324_v15  ;;  %1247 = vmatpush.msrb.mxu3 %v516_v16  ;;  %v373_v63 = vld [vmem:[#allocation5 + $0x880] sm:$0xff] }
  0xf0   :  { %1179 = vmatpush.msrb.mxu0 %v503_v17  ;;  %1202 = vmatpush.msrb.mxu1 %v120_v18  ;;  %v565_v0 = vld [vmem:[#allocation5 + $0xe80] sm:$0xff]  ;;  %v146_v17 = vld [vmem:[#allocation5 + $0x168] sm:$0xff] }
  0xf1   :  { %1225 = vmatpush.msrb.mxu2 %v312_v19  ;;  %1248 = vmatpush.msrb.mxu3 %v504_v20  ;;  %v169_v3 = vld [vmem:[#allocation5 + $0x220] sm:$0xff] }
  0xf2   :  { %1180 = vmatpush.msrb.mxu0 %v491_v21  ;;  %1203 = vmatpush.msrb.mxu1 %v108_v22  ;;  %v361_v4 = vld [vmem:[#allocation5 + $0x820] sm:$0xff]  ;;  %v134_v21 = vld [vmem:[#allocation5 + $0x108] sm:$0xff] }
  0xf3   :  { %1226 = vmatpush.msrb.mxu2 %v300_v23  ;;  %1249 = vmatpush.msrb.mxu3 %v492_v24  ;;  %v553_v5 = vld [vmem:[#allocation5 + $0xe20] sm:$0xff] }
  0xf4   :  { %1135 = vmatmul.f32.vlgmr.msra.gmra.mxu2 %v3274_v29  ;;  %1158 = vmatmul.f32.vlgmr.msra.gmra.mxu3 %v3277_v30  ;;  %v157_v8 = vld [vmem:[#allocation5 + $0x1c0] sm:$0xff] }
  0xf5   :  { %1257 = vmatpush.msra.mxu0 %v289_v25  ;;  %1280 = vmatpush.msra.mxu1 %v481_v26  ;;  %v349_v9 = vld [vmem:[#allocation5 + $0x7c0] sm:$0xff]  ;;  %v122_v25 = vld [vmem:[#allocation5 + $0xa8] sm:$0xff] }
  0xf6   :  { %1303 = vmatpush.msra.mxu2 %v673_v27  ;;  %1326 = vmatpush.msra.mxu3 %v290_v28  ;;  %v541_v10 = vld [vmem:[#allocation5 + $0xdc0] sm:$0xff] }
  0xf7   :  { %1092 = vmatmul.f32.gmra.mxu0 %v3280_v52  ;;  %1281 = vmatpush.msra.mxu1 %v469_v31  ;;  %v145_v14 = vld [vmem:[#allocation5 + $0x160] sm:$0xff]  ;;  %v110_v31 = vld [vmem:[#allocation5 + $0x48] sm:$0xff] }
  0xf8   :  { %1258 = vmatpush.msra.mxu0 %v277_v32  ;;  %1304 = vmatpush.msra.mxu2 %v661_v33  ;;  %v337_v15 = vld [vmem:[#allocation5 + $0x760] sm:$0xff]  ;;  %v482_v32 = vld [vmem:[#allocation5 + $0xbe8] sm:$0xff]  ;;  %v3293_v33 = vld [vmem:[#allocation2 + $0x28] sm:$0xff] }
  0xf9   :  { %1327 = vmatpush.msra.mxu3 %v278_v34  ;;  %1115 = vmatmul.f32.gmra.mxu1 %v3244_v54  ;;  %v229_v54 = vld [vmem:[#allocation5 + $0x400] sm:$0xff]  ;;  %v674_v34 = vld [vmem:[#allocation5 + $0x11e8] sm:$0xff] }
  0xfa   :  { %1259 = vmatpush.msra.mxu0 %v265_v35  ;;  %1282 = vmatpush.msra.mxu1 %v457_v36  ;;  %v529_v16 = vld [vmem:[#allocation5 + $0xd60] sm:$0xff]  ;;  %v291_v35 = vld [vmem:[#allocation5 + $0x5f0] sm:$0xff] }
  0xfb   :  { %1305 = vmatpush.msra.mxu2 %v649_v37  ;;  %1328 = vmatpush.msra.mxu3 %v266_v38  ;;  %v133_v18 = vld [vmem:[#allocation5 + $0x100] sm:$0xff]  ;;  %v483_v36 = vld [vmem:[#allocation5 + $0xbf0] sm:$0xff]  ;;  %v470_v37 = vld [vmem:[#allocation5 + $0xb88] sm:$0xff] }
  0xfc   :  { %1260 = vmatpush.msra.mxu0 %v253_v7  ;;  %1283 = vmatpush.msra.mxu1 %v445_v39  ;;  %v325_v19 = vld [vmem:[#allocation5 + $0x700] sm:$0xff]  ;;  %v662_v38 = vld [vmem:[#allocation5 + $0x1188] sm:$0xff]  ;;  %v279_v7 = vld [vmem:[#allocation5 + $0x590] sm:$0xff] }
  0xfd   :  { %1306 = vmatpush.msra.mxu2 %v637_v40  ;;  %1329 = vmatpush.msra.mxu3 %v254_v41  ;;  %v517_v20 = vld [vmem:[#allocation5 + $0xd00] sm:$0xff]  ;;  %v471_v39 = vld [vmem:[#allocation5 + $0xb90] sm:$0xff]  ;;  %v458_v40 = vld [vmem:[#allocation5 + $0xb28] sm:$0xff] }
  0xfe   :  { %1261 = vmatpush.msra.mxu0 %v241_v12  ;;  %1284 = vmatpush.msra.mxu1 %v433_v42  ;;  %v121_v22 = vld [vmem:[#allocation5 + $0xa0] sm:$0xff]  ;;  %v650_v41 = vld [vmem:[#allocation5 + $0x1128] sm:$0xff]  ;;  %v267_v12 = vld [vmem:[#allocation5 + $0x530] sm:$0xff] }
  0xff   :  { %1307 = vmatpush.msra.mxu2 %v625_v43  ;;  %1330 = vmatpush.msra.mxu3 %v242_v44  ;;  %v313_v23 = vld [vmem:[#allocation5 + $0x6a0] sm:$0xff]  ;;  %v459_v42 = vld [vmem:[#allocation5 + $0xb30] sm:$0xff]  ;;  %v446_v43 = vld [vmem:[#allocation5 + $0xac8] sm:$0xff] }
 0x100   :  { %1181 = vmatmul.f32.vlgmr.msrb.gmra.mxu0 %v3284_v48  ;;  %1285 = vmatpush.msra.mxu1 %v421_v45  ;;  %v505_v24 = vld [vmem:[#allocation5 + $0xca0] sm:$0xff]  ;;  %v638_v44 = vld [vmem:[#allocation5 + $0x10c8] sm:$0xff]  ;;  %v255_v45 = vld [vmem:[#allocation5 + $0x4d0] sm:$0xff] }
 0x101   :  { %1262 = vmatpush.msra.mxu0 %v229_v54  ;;  %1308 = vmatpush.msra.mxu2 %v613_v46  ;;  %v109_v26 = vld [vmem:[#allocation5 + $0x40] sm:$0xff]  ;;  %v447_v54 = vld [vmem:[#allocation5 + $0xad0] sm:$0xff]  ;;  %v434_v46 = vld [vmem:[#allocation5 + $0xa68] sm:$0xff] }
 0x102   :  { %1331 = vmatpush.msra.mxu3 %v230_v47  ;;  %1138 = vmatmul.f32.gmra.mxu2 %v3271_v11  ;;  %v301_v27 = vld [vmem:[#allocation5 + $0x640] sm:$0xff]  ;;  %v626_v47 = vld [vmem:[#allocation5 + $0x1068] sm:$0xff] }
 0x103   :  { %1263 = vmatpush.msra.mxu0 %v217_v49  ;;  %1286 = vmatpush.msra.mxu1 %v409_v50  ;;  %v493_v28 = vld [vmem:[#allocation5 + $0xc40] sm:$0xff]  ;;  %v243_v49 = vld [vmem:[#allocation5 + $0x470] sm:$0xff] }
 0x104   :  { %1309 = vmatpush.msra.mxu2 %v601_v51  ;;  %1332 = vmatpush.msra.mxu3 %v218_v53  ;;  %v435_v50 = vld [vmem:[#allocation5 + $0xa70] sm:$0xff]  ;;  %v422_v51 = vld [vmem:[#allocation5 + $0xa08] sm:$0xff] }
 0x105   :  { %1161 = vmatmul.f32.gmra.mxu3 %v3280_v52  ;;  %1264 = vmatpush.msra.mxu0 %v205_v57  ;;  %v614_v53 = vld [vmem:[#allocation5 + $0x1008] sm:$0xff]  ;;  %v231_v57 = vld [vmem:[#allocation5 + $0x410] sm:$0xff] }
 0x106   :  { %1287 = vmatpush.msra.mxu1 %v397_v55  ;;  %1310 = vmatpush.msra.mxu2 %v589_v56  ;;  %v423_v55 = vld [vmem:[#allocation5 + $0xa10] sm:$0xff]  ;;  %v410_v56 = vld [vmem:[#allocation5 + $0x9a8] sm:$0xff] }
 0x107   :  { %1333 = vmatpush.msra.mxu3 %v206_v58  ;;  %1265 = vmatpush.msra.mxu0 %v193_v59  ;;  %v602_v58 = vld [vmem:[#allocation5 + $0xfa8] sm:$0xff]  ;;  %v219_v59 = vld [vmem:[#allocation5 + $0x3b0] sm:$0xff] }
 0x108   :  { %1288 = vmatpush.msra.mxu1 %v385_v2  ;;  %1311 = vmatpush.msra.mxu2 %v577_v60  ;;  %v411_v2 = vld [vmem:[#allocation5 + $0x9b0] sm:$0xff]  ;;  %v398_v60 = vld [vmem:[#allocation5 + $0x948] sm:$0xff] }
 0x109   :  { %1334 = vmatpush.msra.mxu3 %v194_v61  ;;  %1266 = vmatpush.msra.mxu0 %v181_v62  ;;  %v590_v61 = vld [vmem:[#allocation5 + $0xf48] sm:$0xff]  ;;  %v207_v62 = vld [vmem:[#allocation5 + $0x350] sm:$0xff] }
 0x10a   :  { %1289 = vmatpush.msra.mxu1 %v373_v63  ;;  %1312 = vmatpush.msra.mxu2 %v565_v0  ;;  %v399_v63 = vld [vmem:[#allocation5 + $0x950] sm:$0xff]  ;;  %v578_v0 = vld [vmem:[#allocation5 + $0xee8] sm:$0xff] }
 0x10b   :  { %1335 = vmatpush.msra.mxu3 %v182_v1  ;;  %1227 = vmatmul.f32.vlgmr.msrb.gmra.mxu2 %v3277_v30  ;;  %v386_v1 = vld [vmem:[#allocation5 + $0x8e8] sm:$0xff] }
 0x10c   :  { %1267 = vmatpush.msra.mxu0 %v169_v3  ;;  %1290 = vmatpush.msra.mxu1 %v361_v4  ;;  %v195_v3 = vld [vmem:[#allocation5 + $0x2f0] sm:$0xff] }
 0x10d   :  { %1313 = vmatpush.msra.mxu2 %v553_v5  ;;  %1336 = vmatpush.msra.mxu3 %v170_v6  ;;  %v387_v4 = vld [vmem:[#allocation5 + $0x8f0] sm:$0xff]  ;;  %v374_v5 = vld [vmem:[#allocation5 + $0x888] sm:$0xff] }
 0x10e   :  { %1250 = vmatmul.f32.vlgmr.msrb.gmra.mxu3 %v3284_v48  ;;  %1268 = vmatpush.msra.mxu0 %v157_v8  ;;  %v566_v6 = vld [vmem:[#allocation5 + $0xe88] sm:$0xff]  ;;  %v183_v8 = vld [vmem:[#allocation5 + $0x290] sm:$0xff] }
 0x10f   :  { %1291 = vmatpush.msra.mxu1 %v349_v9  ;;  %1314 = vmatpush.msra.mxu2 %v541_v10  ;;  %v375_v9 = vld [vmem:[#allocation5 + $0x890] sm:$0xff]  ;;  %v362_v10 = vld [vmem:[#allocation5 + $0x828] sm:$0xff] }
 0x110   :  { %1337 = vmatpush.msra.mxu3 %v158_v13  ;;  %1204 = vmatmul.f32.vlgmr.msrb.gmra.mxu1 %v3274_v29  ;;  %v554_v13 = vld [vmem:[#allocation5 + $0xe28] sm:$0xff] }
 0x111   :  { %1269 = vmatpush.msra.mxu0 %v145_v14  ;;  %1292 = vmatpush.msra.mxu1 %v337_v15  ;;  %v171_v14 = vld [vmem:[#allocation5 + $0x230] sm:$0xff] }
 0x112   :  { %1315 = vmatpush.msra.mxu2 %v529_v16  ;;  %1338 = vmatpush.msra.mxu3 %v146_v17  ;;  %v363_v15 = vld [vmem:[#allocation5 + $0x830] sm:$0xff]  ;;  %v350_v16 = vld [vmem:[#allocation5 + $0x7c8] sm:$0xff] }
 0x113   :  { %1270 = vmatpush.msra.mxu0 %v133_v18  ;;  %1293 = vmatpush.msra.mxu1 %v325_v19  ;;  %v542_v17 = vld [vmem:[#allocation5 + $0xdc8] sm:$0xff]  ;;  %v159_v18 = vld [vmem:[#allocation5 + $0x1d0] sm:$0xff] }
 0x114   :  { %1316 = vmatpush.msra.mxu2 %v517_v20  ;;  %1339 = vmatpush.msra.mxu3 %v134_v21  ;;  %v351_v19 = vld [vmem:[#allocation5 + $0x7d0] sm:$0xff]  ;;  %v338_v20 = vld [vmem:[#allocation5 + $0x768] sm:$0xff] }
 0x115   :  { %1230 = vmatmul.f32.gmra.mxu2 %v3280_v52  ;;  %1271 = vmatpush.msra.mxu0 %v121_v22  ;;  %v530_v21 = vld [vmem:[#allocation5 + $0xd68] sm:$0xff]  ;;  %v147_v22 = vld [vmem:[#allocation5 + $0x170] sm:$0xff] }
 0x116   :  { %1294 = vmatpush.msra.mxu1 %v313_v23  ;;  %1317 = vmatpush.msra.mxu2 %v505_v24  ;;  %v339_v23 = vld [vmem:[#allocation5 + $0x770] sm:$0xff]  ;;  %v326_v24 = vld [vmem:[#allocation5 + $0x708] sm:$0xff] }
 0x117   :  { %1340 = vmatpush.msra.mxu3 %v122_v25  ;;  %1272 = vmatpush.msra.mxu0 %v109_v26  ;;  %v518_v25 = vld [vmem:[#allocation5 + $0xd08] sm:$0xff]  ;;  %v135_v26 = vld [vmem:[#allocation5 + $0x110] sm:$0xff] }
 0x118   :  { %1253 = vmatmul.f32.gmra.mxu3 %v3293_v33  ;;  %1295 = vmatpush.msra.mxu1 %v301_v27  ;;  %v327_v27 = vld [vmem:[#allocation5 + $0x710] sm:$0xff] }
 0x119   :  { %1318 = vmatpush.msra.mxu2 %v493_v28  ;;  %1341 = vmatpush.msra.mxu3 %v110_v31  ;;  %v314_v28 = vld [vmem:[#allocation5 + $0x6a8] sm:$0xff] }
 0x11a   :  { %1207 = vmatmul.f32.gmra.mxu1 %v3271_v11  ;;  %1349 = vmatpush.msrb.mxu0 %v482_v32  ;;  %v506_v31 = vld [vmem:[#allocation5 + $0xca8] sm:$0xff]  ;;  %v123_v32 = vld [vmem:[#allocation5 + $0xb0] sm:$0xff] }
 0x11b   :  { %1372 = vmatpush.msrb.mxu1 %v674_v34  ;;  %1395 = vmatpush.msrb.mxu2 %v291_v35  ;;  %v315_v34 = vld [vmem:[#allocation5 + $0x6b0] sm:$0xff]  ;;  %v302_v35 = vld [vmem:[#allocation5 + $0x648] sm:$0xff] }
 0x11c   :  { %1418 = vmatpush.msrb.mxu3 %v483_v36  ;;  %1184 = vmatmul.f32.gmra.mxu0 %v3293_v33  ;;  %v494_v36 = vld [vmem:[#allocation5 + $0xc48] sm:$0xff] }
 0x11d   :  { %1350 = vmatpush.msrb.mxu0 %v470_v37  ;;  %1373 = vmatpush.msrb.mxu1 %v662_v38  ;;  %v111_v37 = vld [vmem:[#allocation5 + $0x50] sm:$0xff] }
 0x11e   :  { %1396 = vmatpush.msrb.mxu2 %v279_v7  ;;  %1419 = vmatpush.msrb.mxu3 %v471_v39  ;;  %v303_v38 = vld [vmem:[#allocation5 + $0x650] sm:$0xff]  ;;  %v292_v39 = vld [vmem:[#allocation5 + $0x5f8] sm:$0xff] }
 0x11f   :  { %1351 = vmatpush.msrb.mxu0 %v458_v40  ;;  %1374 = vmatpush.msrb.mxu1 %v650_v41  ;;  %v675_v7 = vld [vmem:[#allocation5 + $0x11f0] sm:$0xff]  ;;  %v484_v40 = vld [vmem:[#allocation5 + $0xbf8] sm:$0xff] }
 0x120   :  { %1397 = vmatpush.msrb.mxu2 %v267_v12  ;;  %1420 = vmatpush.msrb.mxu3 %v459_v42  ;;  %v676_v41 = vld [vmem:[#allocation5 + $0x11f8] sm:$0xff]  ;;  %v3306_v12 = vpop.f32.mrf.mxu1  ;;  %v663_v42 = vld [vmem:[#allocation5 + $0x1190] sm:$0xff] }
 0x121   :  { %1352 = vmatpush.msrb.mxu0 %v446_v43  ;;  %1375 = vmatpush.msrb.mxu1 %v638_v44  ;;  %v280_v43 = vld [vmem:[#allocation5 + $0x598] sm:$0xff] }
 0x122   :  { %1398 = vmatpush.msrb.mxu2 %v255_v45  ;;  %1421 = vmatpush.msrb.mxu3 %v447_v54  ;;  %v472_v44 = vld [vmem:[#allocation5 + $0xb98] sm:$0xff]  ;;  %v651_v54 = vld [vmem:[#allocation5 + $0x1130] sm:$0xff] }
 0x123   :  { %1353 = vmatpush.msrb.mxu0 %v434_v46  ;;  %1376 = vmatpush.msrb.mxu1 %v626_v47  ;;  %v664_v45 = vld [vmem:[#allocation5 + $0x1198] sm:$0xff]  ;;  %v3310_v47 = vpop.f32.mrf.mxu0 }
 0x124   :  { %1399 = vmatpush.msrb.mxu2 %v243_v49  ;;  %1422 = vmatpush.msrb.mxu3 %v435_v50  ;;  %v268_v46 = vld [vmem:[#allocation5 + $0x538] sm:$0xff] }
 0x125   :  { %1354 = vmatpush.msrb.mxu0 %v422_v51  ;;  %1377 = vmatpush.msrb.mxu1 %v614_v53  ;;  %v460_v49 = vld [vmem:[#allocation5 + $0xb38] sm:$0xff]  ;;  %v3312_v51 = vpop.f32.mrf.mxu2  ;;  %v639_v53 = vld [vmem:[#allocation5 + $0x10d0] sm:$0xff] }
 0x126   :  { %1400 = vmatpush.msrb.mxu2 %v231_v57  ;;  %1423 = vmatpush.msrb.mxu3 %v423_v55  ;;  %v652_v50 = vld [vmem:[#allocation5 + $0x1138] sm:$0xff] }
 0x127   :  { %1355 = vmatpush.msrb.mxu0 %v410_v56  ;;  %1378 = vmatpush.msrb.mxu1 %v602_v58  ;;  %v256_v57 = vld [vmem:[#allocation5 + $0x4d8] sm:$0xff] }
 0x128   :  { %1401 = vmatpush.msrb.mxu2 %v219_v59  ;;  %1424 = vmatpush.msrb.mxu3 %v411_v2  ;;  %v448_v55 = vld [vmem:[#allocation5 + $0xad8] sm:$0xff]  ;;  %v627_v59 = vld [vmem:[#allocation5 + $0x1070] sm:$0xff] }
 0x129   :  { %1356 = vmatpush.msrb.mxu0 %v398_v60  ;;  %1379 = vmatpush.msrb.mxu1 %v590_v61  ;;  %v640_v56 = vld [vmem:[#allocation5 + $0x10d8] sm:$0xff]  ;;  %v3314_v60 = vpop.f32.mrf.mxu3 }
 0x12a   :  { %1402 = vmatpush.msrb.mxu2 %v207_v62  ;;  %1425 = vmatpush.msrb.mxu3 %v399_v63  ;;  %v244_v58 = vld [vmem:[#allocation5 + $0x478] sm:$0xff]  ;;  %v615_v62 = vld [vmem:[#allocation5 + $0x1010] sm:$0xff] }
 0x12b   :  { %1273 = vmatmul.f32.vlgmr.msra.gmra.mxu0 %v3274_v29  ;;  %1380 = vmatpush.msrb.mxu1 %v578_v0  ;;  %v436_v2 = vld [vmem:[#allocation5 + $0xa78] sm:$0xff]  ;;  %v3317_v0 = vpop.f32.mrf.mxu1 }
 0x12c   :  { %1357 = vmatpush.msrb.mxu0 %v386_v1  ;;  %1403 = vmatpush.msrb.mxu2 %v195_v3  ;;  %v628_v61 = vld [vmem:[#allocation5 + $0x1078] sm:$0xff] }
 0x12d   :  { %1426 = vmatpush.msrb.mxu3 %v387_v4  ;;  %1296 = vmatmul.f32.vlgmr.msra.gmra.mxu1 %v3277_v30  ;;  %v232_v63 = vld [vmem:[#allocation5 + $0x418] sm:$0xff]  ;;  %v603_v4 = vld [vmem:[#allocation5 + $0xfb0] sm:$0xff] }
 0x12e   :  { %1358 = vmatpush.msrb.mxu0 %v374_v5  ;;  %1381 = vmatpush.msrb.mxu1 %v566_v6  ;;  %v424_v1 = vld [vmem:[#allocation5 + $0xa18] sm:$0xff]  ;;  %v3320_v6 = vpop.f32.mrf.mxu2 }
 0x12f   :  { %1404 = vmatpush.msrb.mxu2 %v183_v8  ;;  %1427 = vmatpush.msrb.mxu3 %v375_v9  ;;  %v616_v3 = vld [vmem:[#allocation5 + $0x1018] sm:$0xff] }
 0x130   :  { %1319 = vmatmul.f32.vlgmr.msra.gmra.mxu2 %v3284_v48  ;;  %1359 = vmatpush.msrb.mxu0 %v362_v10  ;;  %v220_v5 = vld [vmem:[#allocation5 + $0x3b8] sm:$0xff]  ;;  %v3322_v10 = vpop.f32.mrf.mxu0 }
 0x131   :  { %1382 = vmatpush.msrb.mxu1 %v554_v13  ;;  %1405 = vmatpush.msrb.mxu2 %v171_v14  ;;  %v412_v8 = vld [vmem:[#allocation5 + $0x9b8] sm:$0xff]  ;;  %v591_v13 = vld [vmem:[#allocation5 + $0xf50] sm:$0xff] }
 0x132   :  { %1428 = vmatpush.msrb.mxu3 %v363_v15  ;;  %1360 = vmatpush.msrb.mxu0 %v350_v16  ;;  %v604_v9 = vld [vmem:[#allocation5 + $0xfb8] sm:$0xff] }
 0x133   :  { %1383 = vmatpush.msrb.mxu1 %v542_v17  ;;  %1406 = vmatpush.msrb.mxu2 %v159_v18  ;;  %v208_v14 = vld [vmem:[#allocation5 + $0x358] sm:$0xff]  ;;  %v579_v17 = vld [vmem:[#allocation5 + $0xef0] sm:$0xff]  ;;  %v3324_v18 = vpop.f32.mrf.mxu3 }
 0x134   :  { %1429 = vmatpush.msrb.mxu3 %v351_v19  ;;  %1276 = vmatmul.f32.gmra.mxu0 %v3271_v11  ;;  %v400_v15 = vld [vmem:[#allocation5 + $0x958] sm:$0xff] }
 0x135   :  { %1342 = vmatmul.f32.vlgmr.msra.gmra.mxu3 %v3274_v29  ;;  %1361 = vmatpush.msrb.mxu0 %v338_v20  ;;  %v592_v16 = vld [vmem:[#allocation5 + $0xf58] sm:$0xff] }
 0x136   :  { %1384 = vmatpush.msrb.mxu1 %v530_v21  ;;  %1407 = vmatpush.msrb.mxu2 %v147_v22  ;;  %v196_v19 = vld [vmem:[#allocation5 + $0x2f8] sm:$0xff]  ;;  %v567_v22 = vld [vmem:[#allocation5 + $0xe90] sm:$0xff] }
 0x137   :  { %1430 = vmatpush.msrb.mxu3 %v339_v23  ;;  %1299 = vmatmul.f32.gmra.mxu1 %v3280_v52  ;;  %v388_v20 = vld [vmem:[#allocation5 + $0x8f8] sm:$0xff] }
 0x138   :  { %1362 = vmatpush.msrb.mxu0 %v326_v24  ;;  %1385 = vmatpush.msrb.mxu1 %v518_v25  ;;  %v580_v21 = vld [vmem:[#allocation5 + $0xef8] sm:$0xff] }
 0x139   :  { %1408 = vmatpush.msrb.mxu2 %v135_v26  ;;  %1431 = vmatpush.msrb.mxu3 %v327_v27  ;;  %v184_v23 = vld [vmem:[#allocation5 + $0x298] sm:$0xff]  ;;  %v3327_v26 = vpop.f32.mrf.mxu1  ;;  %v555_v27 = vld [vmem:[#allocation5 + $0xe30] sm:$0xff] }
 0x13a   :  { %1322 = vmatmul.f32.gmra.mxu2 %v3293_v33  ;;  %1363 = vmatpush.msrb.mxu0 %v314_v28  ;;  %v376_v24 = vld [vmem:[#allocation5 + $0x898] sm:$0xff] }
 0x13b   :  { %1386 = vmatpush.msrb.mxu1 %v506_v31  ;;  %1409 = vmatpush.msrb.mxu2 %v123_v32  ;;  %v568_v25 = vld [vmem:[#allocation5 + $0xe98] sm:$0xff] }
 0x13c   :  { %1432 = vmatpush.msrb.mxu3 %v315_v34  ;;  %1364 = vmatpush.msrb.mxu0 %v302_v35  ;;  %v172_v28 = vld [vmem:[#allocation5 + $0x238] sm:$0xff]  ;;  %v3330_v34 = vpop.f32.mrf.mxu2  ;;  %v543_v35 = vld [vmem:[#allocation5 + $0xdd0] sm:$0xff] }
 0x13d   :  { %1387 = vmatpush.msrb.mxu1 %v494_v36  ;;  %1410 = vmatpush.msrb.mxu2 %v111_v37  ;;  %v364_v31 = vld [vmem:[#allocation5 + $0x838] sm:$0xff]  ;;  %v3332_v37 = vpop.f32.mrf.mxu0 }
 0x13e   :  { %1433 = vmatpush.msrb.mxu3 %v303_v38  ;;  %1365 = vmatmul.f32.vlgmr.msrb.gmra.mxu0 %v3277_v30  ;;  %v556_v32 = vld [vmem:[#allocation5 + $0xe38] sm:$0xff] }
 0x13f   :  { %1345 = vmatmul.f32.gmra.mxu3 %v3271_v11  ;;  %1441 = vmatpush.msra.mxu0 %v675_v7  ;;  %v160_v36 = vld [vmem:[#allocation5 + $0x1d8] sm:$0xff] }
 0x140   :  { %1464 = vmatpush.msra.mxu1 %v292_v39  ;;  %1487 = vmatpush.msra.mxu2 %v484_v40  ;;  %v352_v38 = vld [vmem:[#allocation5 + $0x7d8] sm:$0xff]  ;;  %v531_v39 = vld [vmem:[#allocation5 + $0xd70] sm:$0xff] }
 0x141   :  { %1510 = vmatpush.msra.mxu3 %v676_v41  ;;  %1388 = vmatmul.f32.vlgmr.msrb.gmra.mxu1 %v3284_v48  ;;  %v544_v7 = vld [vmem:[#allocation5 + $0xdd8] sm:$0xff] }
 0x142   :  { %1442 = vmatpush.msra.mxu0 %v663_v42  ;;  %1465 = vmatpush.msra.mxu1 %v280_v43  ;;  %v148_v40 = vld [vmem:[#allocation5 + $0x178] sm:$0xff]  ;;  %v3334_v42 = vpop.f32.mrf.mxu3 }
 0x143   :  { %1488 = vmatpush.msra.mxu2 %v472_v44  ;;  %1511 = vmatpush.msra.mxu3 %v664_v45  ;;  %v340_v41 = vld [vmem:[#allocation5 + $0x778] sm:$0xff]  ;;  %v519_v44 = vld [vmem:[#allocation5 + $0xd10] sm:$0xff] }
 0x144   :  { %1443 = vmatpush.msra.mxu0 %v651_v54  ;;  %1466 = vmatpush.msra.mxu1 %v268_v46  ;;  %v532_v43 = vld [vmem:[#allocation5 + $0xd78] sm:$0xff]  ;;  %v3337_v54 = vpop.f32.mrf.mxu1 }
 0x145   :  { %1489 = vmatpush.msra.mxu2 %v460_v49  ;;  %1512 = vmatpush.msra.mxu3 %v652_v50  ;;  %v136_v45 = vld [vmem:[#allocation5 + $0x118] sm:$0xff]  ;;  %v507_v50 = vld [vmem:[#allocation5 + $0xcb0] sm:$0xff] }
 0x146   :  { %1444 = vmatpush.msra.mxu0 %v639_v53  ;;  %1467 = vmatpush.msra.mxu1 %v256_v57  ;;  %v328_v46 = vld [vmem:[#allocation5 + $0x718] sm:$0xff]  ;;  %v3339_v57 = vpop.f32.mrf.mxu2 }
 0x147   :  { %1490 = vmatpush.msra.mxu2 %v448_v55  ;;  %1513 = vmatpush.msra.mxu3 %v640_v56  ;;  %v520_v49 = vld [vmem:[#allocation5 + $0xd18] sm:$0xff] }
 0x148   :  { %1368 = vmatmul.f32.gmra.mxu0 %v3280_v52  ;;  %1468 = vmatpush.msra.mxu1 %v244_v58  ;;  %v124_v53 = vld [vmem:[#allocation5 + $0xb8] sm:$0xff]  ;;  %v495_v58 = vld [vmem:[#allocation5 + $0xc50] sm:$0xff] }
 0x149   :  { %1445 = vmatpush.msra.mxu0 %v627_v59  ;;  %1491 = vmatpush.msra.mxu2 %v436_v2  ;;  %v316_v55 = vld [vmem:[#allocation5 + $0x6b8] sm:$0xff] }
 0x14a   :  { %1514 = vmatpush.msra.mxu3 %v628_v61  ;;  %1391 = vmatmul.f32.gmra.mxu1 %v3293_v33  ;;  %v508_v56 = vld [vmem:[#allocation5 + $0xcb8] sm:$0xff] }
 0x14b   :  { %1446 = vmatpush.msra.mxu0 %v615_v62  ;;  %1469 = vmatpush.msra.mxu1 %v232_v63  ;;  %v112_v59 = vld [vmem:[#allocation5 + $0x58] sm:$0xff]  ;;  %v3344_v62 = vpop.f32.mrf.mxu3 }
 0x14c   :  { %1492 = vmatpush.msra.mxu2 %v424_v1  ;;  %1515 = vmatpush.msra.mxu3 %v616_v3  ;;  %v304_v2 = vld [vmem:[#allocation5 + $0x658] sm:$0xff] }
 0x14d   :  { %1447 = vmatpush.msra.mxu0 %v603_v4  ;;  %1470 = vmatpush.msra.mxu1 %v220_v5  ;;  %v496_v61 = vld [vmem:[#allocation5 + $0xc58] sm:$0xff]  ;;  %v3346_v5 = vpop.f32.mrf.mxu1 }
 0x14e   :  { %1493 = vmatpush.msra.mxu2 %v412_v8  ;;  %1516 = vmatpush.msra.mxu3 %v604_v9  ;;  %v1602_v63 = vld [vmem:[#allocation8 + $0x168] sm:$0xff]  ;;  %v1599_v8 = vld [vmem:[#allocation8 + $0x150] sm:$0xff] }
 0x14f   :  { %1448 = vmatpush.msra.mxu0 %v591_v13  ;;  %1471 = vmatpush.msra.mxu1 %v208_v14  ;;  %v1650_v1 = vld [vmem:[#allocation8 + $0x2e8] sm:$0xff]  ;;  %v1647_v9 = vld [vmem:[#allocation8 + $0x2d0] sm:$0xff] }
 0x150   :  { %1494 = vmatpush.msra.mxu2 %v400_v15  ;;  %1517 = vmatpush.msra.mxu3 %v592_v16  ;;  %v1698_v3 = vld [vmem:[#allocation8 + $0x468] sm:$0xff]  ;;  %v1695_v13 = vld [vmem:[#allocation8 + $0x450] sm:$0xff]  ;;  %v1596_v15 = vld [vmem:[#allocation8 + $0x138] sm:$0xff] }
 0x151   :  { %1411 = vmatmul.f32.vlgmr.msrb.gmra.mxu2 %v3274_v29  ;;  %1449 = vmatpush.msra.mxu0 %v579_v17  ;;  %v1746_v4 = vld [vmem:[#allocation8 + $0x5e8] sm:$0xff]  ;;  %v1743_v14 = vld [vmem:[#allocation8 + $0x5d0] sm:$0xff]  ;;  %v1644_v16 = vld [vmem:[#allocation8 + $0x2b8] sm:$0xff]  ;;  %v3351_v17 = vpop.f32.mrf.mxu2 }
 0x152   :  { %1472 = vmatpush.msra.mxu1 %v196_v19  ;;  %1495 = vmatpush.msra.mxu2 %v388_v20  ;;  %v1692_v19 = vld [vmem:[#allocation8 + $0x438] sm:$0xff] }
 0x153   :  { %1518 = vmatpush.msra.mxu3 %v580_v21  ;;  %1450 = vmatpush.msra.mxu0 %v567_v22  ;;  %v1740_v20 = vld [vmem:[#allocation8 + $0x5b8] sm:$0xff]  ;;  %v1593_v21 = vld [vmem:[#allocation8 + $0x120] sm:$0xff] }
 0x154   :  { %1434 = vmatmul.f32.vlgmr.msrb.gmra.mxu3 %v3277_v30  ;;  %1473 = vmatpush.msra.mxu1 %v184_v23  ;;  %v1641_v22 = vld [vmem:[#allocation8 + $0x2a0] sm:$0xff] }
 0x155   :  { %1496 = vmatpush.msra.mxu2 %v376_v24  ;;  %1519 = vmatpush.msra.mxu3 %v568_v25  ;;  %v1689_v23 = vld [vmem:[#allocation8 + $0x420] sm:$0xff]  ;;  %v3356_v24 = vpop.f32.mrf.mxu3  ;;  %v3358_v25 = vpop.f32.mrf.mxu1 }
 0x156   :  { %1451 = vmatpush.msra.mxu0 %v555_v27  ;;  %1474 = vmatpush.msra.mxu1 %v172_v28  ;;  %v1590_v27 = vld [vmem:[#allocation8 + $0x108] sm:$0xff] }
 0x157   :  { %1497 = vmatpush.msra.mxu2 %v364_v31  ;;  %1520 = vmatpush.msra.mxu3 %v556_v32  ;;  %v1638_v28 = vld [vmem:[#allocation8 + $0x288] sm:$0xff]  ;;  %v1587_v32 = vld [vmem:[#allocation8 + $0xf0] sm:$0xff] }
 0x158   :  { %1452 = vmatpush.msra.mxu0 %v543_v35  ;;  %1475 = vmatpush.msra.mxu1 %v160_v36  ;;  %v1686_v31 = vld [vmem:[#allocation8 + $0x408] sm:$0xff]  ;;  %v1635_v35 = vld [vmem:[#allocation8 + $0x270] sm:$0xff] }
 0x159   :  { %1498 = vmatpush.msra.mxu2 %v352_v38  ;;  %1521 = vmatpush.msra.mxu3 %v544_v7  ;;  %v1683_v36 = vld [vmem:[#allocation8 + $0x3f0] sm:$0xff]  ;;  %v3362_v38 = vpop.f32.mrf.mxu2 }
 0x15a   :  { %1414 = vmatmul.f32.gmra.mxu2 %v3271_v11  ;;  %1453 = vmatpush.msra.mxu0 %v531_v39  ;;  %v3342_v11 = vpop.f32.mrf.mxu0  ;;  %v1731_v7 = vld [vmem:[#allocation8 + $0x570] sm:$0xff] }
 0x15b   :  { %1476 = vmatpush.msra.mxu1 %v148_v40  ;;  %1499 = vmatpush.msra.mxu2 %v340_v41  ;;  %v1584_v40 = vld [vmem:[#allocation8 + $0xd8] sm:$0xff] }
 0x15c   :  { %1522 = vmatpush.msra.mxu3 %v532_v43  ;;  %1454 = vmatpush.msra.mxu0 %v519_v44  ;;  %v1632_v41 = vld [vmem:[#allocation8 + $0x258] sm:$0xff] }
 0x15d   :  { %1437 = vmatmul.f32.gmra.mxu3 %v3280_v52  ;;  %1477 = vmatpush.msra.mxu1 %v136_v45  ;;  %v1728_v43 = vld [vmem:[#allocation8 + $0x558] sm:$0xff] }
 0x15e   :  { %1500 = vmatpush.msra.mxu2 %v328_v46  ;;  %1523 = vmatpush.msra.mxu3 %v520_v49  ;;  %v3367_v44 = vld [vmem:[#allocation7] sm:$0xff]  ;;  %v3012_v45 = vld [vmem:[#allocation2 + $0x18] sm:$0xff] }
 0x15f   :  { %1455 = vmatpush.msra.mxu0 %v507_v50  ;;  %1478 = vmatpush.msra.mxu1 %v124_v53  ;;  %v1581_v46 = vld [vmem:[#allocation8 + $0xc0] sm:$0xff]  ;;  %v3369_v50 = vpop.f32.mrf.mxu3 }
 0x160   :  { %1501 = vmatpush.msra.mxu2 %v316_v55  ;;  %1524 = vmatpush.msra.mxu3 %v508_v56  ;;  %v1629_v49 = vld [vmem:[#allocation8 + $0x240] sm:$0xff]  ;;  %v1578_v55 = vld [vmem:[#allocation8 + $0xa8] sm:$0xff] }
 0x161   :  { %1456 = vmatpush.msra.mxu0 %v495_v58  ;;  %1479 = vmatpush.msra.mxu1 %v112_v59  ;;  %v1677_v53 = vld [vmem:[#allocation8 + $0x3c0] sm:$0xff]  ;;  %v1626_v56 = vld [vmem:[#allocation8 + $0x228] sm:$0xff]  ;;  %v681_v58 = vperm.slane %v3367_v44, 0  ;;  %v682_v59 = vperm.slane %v3367_v44, 1 }
 0x162   :  { %1502 = vmatpush.msra.mxu2 %v304_v2  ;;  %1525 = vmatpush.msra.mxu3 %v496_v61  ;;  %v3373_v2 = vpop.f32.mrf.mxu1  ;;  %v1674_v61 = vld [vmem:[#allocation8 + $0x3a8] sm:$0xff] }
 0x163   :  { %1457 = vmatmul.f32.vlgmr.msra.gmra.mxu0 %v3284_v48  ;;  %1503 = vmatmul.f32.vlgmr.msra.gmra.mxu2 %v3277_v30  ;;  %v3353_v30 = vpop.f32.mrf.mxu0 }
 0x164   :  { %2141 = vmatpush.msrb.mxu0 %v1602_v63  ;;  %2164 = vmatpush.msrb.mxu1 %v1650_v1  ;;  %v1722_v63 = vld [vmem:[#allocation8 + $0x528] sm:$0xff]  ;;  %v683_v1 = vperm.slane %v3367_v44, 2 }
 0x165   :  { %2187 = vmatpush.msrb.mxu2 %v1698_v3  ;;  %2210 = vmatpush.msrb.mxu3 %v1746_v4  ;;  %v684_v3 = vperm.slane %v3367_v44, 3  ;;  %v1575_v4 = vld [vmem:[#allocation8 + $0x90] sm:$0xff] }
 0x166   :  { %1526 = vmatmul.f32.vlgmr.msra.gmra.mxu3 %v3284_v48  ;;  %2142 = vmatpush.msrb.mxu0 %v1599_v8  ;;  %v1737_v48 = vld [vmem:[#allocation8 + $0x5a0] sm:$0xff]  ;;  %v1623_v8 = vld [vmem:[#allocation8 + $0x210] sm:$0xff] }
 0x167   :  { %2165 = vmatpush.msrb.mxu1 %v1647_v9  ;;  %2188 = vmatpush.msrb.mxu2 %v1695_v13  ;;  %v1671_v9 = vld [vmem:[#allocation8 + $0x390] sm:$0xff] }
 0x168   :  { %2211 = vmatpush.msrb.mxu3 %v1743_v14  ;;  %1480 = vmatmul.f32.vlgmr.msra.gmra.mxu1 %v3274_v29  ;;  %v1734_v29 = vld [vmem:[#allocation8 + $0x588] sm:$0xff]  ;;  %v1719_v13 = vld [vmem:[#allocation8 + $0x510] sm:$0xff] }
 0x169   :  { %2143 = vmatpush.msrb.mxu0 %v1596_v15  ;;  %2166 = vmatpush.msrb.mxu1 %v1644_v16  ;;  %v1572_v15 = vld [vmem:[#allocation8 + $0x78] sm:$0xff] }
 0x16a   :  { %2189 = vmatpush.msrb.mxu2 %v1692_v19  ;;  %2212 = vmatpush.msrb.mxu3 %v1740_v20  ;;  %v1620_v16 = vld [vmem:[#allocation8 + $0x1f8] sm:$0xff]  ;;  %v723_v19 = vadd.f32 %v3310_v47, %v681_v58  ;;  %v792_v20 = vadd.f32 %v3314_v60, %v682_v59  ;;  %v1569_v47 = vld [vmem:[#allocation8 + $0x60] sm:$0xff] }
 0x16b   :  { %2144 = vmatpush.msrb.mxu0 %v1593_v21  ;;  %2167 = vmatpush.msrb.mxu1 %v1641_v22  ;;  %v3364_v39 = vpop.f32.mrf.mxu0  ;;  %v3385_v21 = vpop.f32.mrf.mxu2  ;;  %v1668_v22 = vld [vmem:[#allocation8 + $0x378] sm:$0xff]  ;;  %v1665_v60 = vld [vmem:[#allocation8 + $0x360] sm:$0xff] }
 0x16c   :  { %2190 = vmatpush.msrb.mxu2 %v1689_v23  ;;  %2213 = vmatpush.msrb.mxu3 %v1737_v48  ;;  %v1716_v23 = vld [vmem:[#allocation8 + $0x4f8] sm:$0xff]  ;;  %v861_v48 = vadd.f32 %v3330_v34, %v683_v1  ;;  %v815_v34 = vadd.f32 %v3332_v37, %v792_v20  ;;  %v1707_v37 = vld [vmem:[#allocation8 + $0x4b0] sm:$0xff]  ;;  %v1938_v20 = vld [vmem:[#allocation8 + $0xbe8] sm:$0xff] }
 0x16d   :  { %1460 = vmatmul.f32.gmra.mxu0 %v3293_v33  ;;  %1506 = vmatmul.f32.gmra.mxu2 %v3280_v52  ;;  %v1680_v52 = vld [vmem:[#allocation8 + $0x3d8] sm:$0xff] }
 0x16e   :  { %2145 = vmatpush.msrb.mxu0 %v1590_v27  ;;  %2168 = vmatpush.msrb.mxu1 %v1638_v28  ;;  %v930_v27 = vadd.f32 %v3346_v5, %v684_v3  ;;  %v1617_v28 = vld [vmem:[#allocation8 + $0x1e0] sm:$0xff]  ;;  %v1662_v5 = vld [vmem:[#allocation8 + $0x348] sm:$0xff] }
 0x16f   :  { %2191 = vmatpush.msrb.mxu2 %v1686_v31  ;;  %2214 = vmatpush.msrb.mxu3 %v1734_v29  ;;  %v1713_v31 = vld [vmem:[#allocation8 + $0x4e0] sm:$0xff]  ;;  %v1566_v29 = vld [vmem:[#allocation8 + $0x48] sm:$0xff] }
 0x170   :  { %1529 = vmatmul.f32.gmra.mxu3 %v3293_v33  ;;  %2146 = vmatpush.msrb.mxu0 %v1587_v32  ;;  %v1725_v33 = vld [vmem:[#allocation8 + $0x540] sm:$0xff]  ;;  %v1614_v32 = vld [vmem:[#allocation8 + $0x1c8] sm:$0xff] }
 0x171   :  { %2169 = vmatpush.msrb.mxu1 %v1635_v35  ;;  %2192 = vmatpush.msrb.mxu2 %v1683_v36  ;;  %v746_v35 = vadd.f32 %v3306_v12, %v723_v19  ;;  %v3395_v36 = vpop.f32.mrf.mxu3  ;;  %v1659_v12 = vld [vmem:[#allocation8 + $0x330] sm:$0xff]  ;;  %v1890_v19 = vld [vmem:[#allocation8 + $0xa68] sm:$0xff] }
 0x172   :  { %2215 = vmatpush.msrb.mxu3 %v1731_v7  ;;  %1483 = vmatmul.f32.gmra.mxu1 %v3012_v45  ;;  %v1710_v7 = vld [vmem:[#allocation8 + $0x4c8] sm:$0xff]  ;;  %v3399_v45 = vpop.f32.mrf.mxu1 }
 0x173   :  { %2147 = vmatpush.msrb.mxu0 %v1584_v40  ;;  %2170 = vmatpush.msrb.mxu1 %v1632_v41  ;;  %v3377_v14 = vpop.f32.mrf.mxu0  ;;  %v884_v40 = vadd.f32 %v3334_v42, %v861_v48  ;;  %v953_v41 = vadd.f32 %v3351_v17, %v930_v27  ;;  %v838_v42 = vadd.f32 %v3327_v26, %v815_v34  ;;  %v1656_v17 = vld [vmem:[#allocation8 + $0x318] sm:$0xff]  ;;  %v1605_v26 = vld [vmem:[#allocation8 + $0x180] sm:$0xff] }
 0x174   :  { %2193 = vmatpush.msrb.mxu2 %v1680_v52  ;;  %2216 = vmatpush.msrb.mxu3 %v1728_v43  ;;  %v1563_v52 = vld [vmem:[#allocation8 + $0x30] sm:$0xff] }
 0x175   :  { %2148 = vmatpush.msrb.mxu0 %v1581_v46  ;;  %2171 = vmatpush.msrb.mxu1 %v1629_v49  ;;  %v1611_v43 = vld [vmem:[#allocation8 + $0x1b0] sm:$0xff]  ;;  %v1560_v46 = vld [vmem:[#allocation8 + $0x18] sm:$0xff] }
 0x176   :  { %2194 = vmatpush.msrb.mxu2 %v1677_v53  ;;  %2217 = vmatpush.msrb.mxu3 %v1725_v33  ;;  %v1608_v49 = vld [vmem:[#allocation8 + $0x198] sm:$0xff]  ;;  %v769_v53 = vadd.f32 %v3312_v51, %v746_v35  ;;  %v1557_v51 = vld [vmem:[#allocation8] sm:$0xff] }
 0x177   :  { %2149 = vmatpush.msrb.mxu0 %v1578_v55  ;;  %2172 = vmatpush.msrb.mxu1 %v1626_v56  ;;  %v1704_v33 = vld [vmem:[#allocation8 + $0x498] sm:$0xff]  ;;  %v3403_v55 = vpop.f32.mrf.mxu2  ;;  %v726_v56 = vadd.f32 %v3322_v10, %v681_v58  ;;  %v1653_v10 = vld [vmem:[#allocation8 + $0x300] sm:$0xff] }
 0x178   :  { %2195 = vmatpush.msrb.mxu2 %v1674_v61  ;;  %2218 = vmatpush.msrb.mxu3 %v1722_v63  ;;  %v907_v61 = vadd.f32 %v3353_v30, %v884_v40  ;;  %v976_v63 = vadd.f32 %v3356_v24, %v953_v41  ;;  %v1701_v30 = vld [vmem:[#allocation8 + $0x480] sm:$0xff]  ;;  %v933_v24 = vadd.f32 %v3358_v25, %v684_v3  ;;  %v3421_v58 = vmax.f32 %v769_v53, 0.0  ;;  %v1842_v25 = vld [vmem:[#allocation8 + $0x8e8] sm:$0xff]  ;;  %v1827_v53 = vld [vmem:[#allocation8 + $0x870] sm:$0xff] }
 0x179   :  { %2150 = vmatpush.msrb.mxu0 %v1575_v4  ;;  %2173 = vmatpush.msrb.mxu1 %v1623_v8  ;;  %v795_v8 = vadd.f32 %v3324_v18, %v682_v59  ;;  %v3425_v18 = vpop.f32.mrf.mxu3 }
 0x17a   :  { %2196 = vmatpush.msrb.mxu2 %v1671_v9  ;;  %2219 = vmatpush.msrb.mxu3 %v1719_v13  ;;  %v864_v9 = vadd.f32 %v3339_v57, %v683_v1  ;;  %v3423_v13 = vmax.f32 %v838_v42, 0.0  ;;  %v749_v57 = vadd.f32 %v3317_v0, %v726_v56  ;;  %v3428_v59 = vmax.f32 %v907_v61, 0.0  ;;  %v3439_v48 = vpop.f32.mrf.mxu1  ;;  %v1875_v42 = vld [vmem:[#allocation8 + $0x9f0] sm:$0xff] }
 0x17b   :  { %2151 = vmatpush.msrb.mxu0 %v1572_v15  ;;  %2174 = vmatpush.msrb.mxu1 %v1620_v16  ;;  %v3410_v4 = vpop.f32.mrf.mxu0  ;;  %v3430_v1 = vmax.f32 %v976_v63, 0.0  ;;  %v1794_v15 = vld [vmem:[#allocation8 + $0x768] sm:$0xff]  ;;  %v818_v3 = vadd.f32 %v3342_v11, %v795_v8  ;;  %v956_v0 = vadd.f32 %v3362_v38, %v933_v24  ;;  %v1887_v11 = vld [vmem:[#allocation8 + $0xa50] sm:$0xff]  ;;  %v1824_v63 = vld [vmem:[#allocation8 + $0x858] sm:$0xff] }
 0x17c   :  { %2197 = vmatpush.msrb.mxu2 %v1668_v22  ;;  %2220 = vmatpush.msrb.mxu3 %v1716_v23  ;;  %v887_v16 = vadd.f32 %v3344_v62, %v864_v9  ;;  %v1791_v22 = vld [vmem:[#allocation8 + $0x750] sm:$0xff]  ;;  %v772_v27 = vadd.f32 %v3320_v6, %v749_v57  ;;  %v1785_v6 = vld [vmem:[#allocation8 + $0x720] sm:$0xff]  ;;  %v1770_v24 = vld [vmem:[#allocation8 + $0x6a8] sm:$0xff] }
 0x17d   :  { %2152 = vmatpush.msrb.mxu0 %v1569_v47  ;;  %2175 = vmatpush.msrb.mxu1 %v1617_v28  ;;  %v1839_v23 = vld [vmem:[#allocation8 + $0x8d0] sm:$0xff]  ;;  %v1788_v47 = vld [vmem:[#allocation8 + $0x738] sm:$0xff]  ;;  %v841_v38 = vadd.f32 %v3337_v54, %v818_v3  ;;  %v979_v35 = vadd.f32 %v3369_v50, %v956_v0  ;;  %v1782_v50 = vld [vmem:[#allocation8 + $0x708] sm:$0xff] }
 0x17e   :  { %2198 = vmatpush.msrb.mxu2 %v1665_v60  ;;  %2221 = vmatpush.msrb.mxu3 %v1713_v31  ;;  %v1935_v62 = vld [vmem:[#allocation8 + $0xbd0] sm:$0xff]  ;;  %v1836_v28 = vld [vmem:[#allocation8 + $0x8b8] sm:$0xff]  ;;  %v910_v60 = vadd.f32 %v3364_v39, %v887_v16  ;;  %v3449_v54 = vmax.f32 %v772_v27, 0.0  ;;  %v1773_v8 = vld [vmem:[#allocation8 + $0x6c0] sm:$0xff]  ;;  %v686_v16 = vperm.slane %v3367_v44, 5 }
 0x17f   :  { %2153 = vmatpush.msrb.mxu0 %v1566_v29  ;;  %2176 = vmatpush.msrb.mxu1 %v1614_v32  ;;  %v1884_v31 = vld [vmem:[#allocation8 + $0xa38] sm:$0xff]  ;;  %v3444_v32 = vpop.f32.mrf.mxu2  ;;  %v3451_v39 = vmax.f32 %v841_v38, 0.0  ;;  %v1821_v9 = vld [vmem:[#allocation8 + $0x840] sm:$0xff]  ;;  %v1866_v3 = vld [vmem:[#allocation8 + $0x9a8] sm:$0xff] }
 0x180   :  { %2199 = vmatpush.msrb.mxu2 %v1662_v5  ;;  %2222 = vmatpush.msrb.mxu3 %v1710_v7  ;;  %v1932_v29 = vld [vmem:[#allocation8 + $0xbb8] sm:$0xff]  ;;  %v1833_v5 = vld [vmem:[#allocation8 + $0x8a0] sm:$0xff]  ;;  %v3453_v40 = vmax.f32 %v910_v60, 0.0  ;;  %v1767_v0 = vld [vmem:[#allocation8 + $0x690] sm:$0xff] }
 0x181   :  { %2154 = vmatpush.msrb.mxu0 %v1563_v52  ;;  %2177 = vmatpush.msrb.mxu1 %v1611_v43  ;;  %v1881_v7 = vld [vmem:[#allocation8 + $0xa20] sm:$0xff]  ;;  %v3455_v41 = vpop.f32.mrf.mxu3  ;;  %v3457_v52 = vmax.f32 %v979_v35, 0.0  ;;  %v1830_v43 = vld [vmem:[#allocation8 + $0x888] sm:$0xff]  ;;  %v1812_v38 = vld [vmem:[#allocation8 + $0x7f8] sm:$0xff] }
 0x182   :  { %2200 = vmatpush.msrb.mxu2 %v1659_v12  ;;  %2223 = vmatpush.msrb.mxu3 %v1707_v37  ;;  %v1878_v12 = vld [vmem:[#allocation8 + $0xa08] sm:$0xff]  ;;  %v3460_v37 = vpop.f32.mrf.mxu1  ;;  %v1860_v60 = vld [vmem:[#allocation8 + $0x978] sm:$0xff]  ;;  %v1911_v35 = vld [vmem:[#allocation8 + $0xb10] sm:$0xff] }
 0x183   :  { %2155 = vmatpush.msrb.mxu0 %v1560_v46  ;;  %2178 = vmatpush.msrb.mxu1 %v1608_v49  ;;  %v3447_v34 = vpop.f32.mrf.mxu0  ;;  %v1929_v46 = vld [vmem:[#allocation8 + $0xba0] sm:$0xff]  ;;  %v1779_v49 = vld [vmem:[#allocation8 + $0x6f0] sm:$0xff]  ;;  %v1914_v27 = vld [vmem:[#allocation8 + $0xb28] sm:$0xff] }
 0x184   :  { %2201 = vmatpush.msrb.mxu2 %v1656_v17  ;;  %2224 = vmatpush.msrb.mxu3 %v1704_v33  ;;  %v1926_v17 = vld [vmem:[#allocation8 + $0xb88] sm:$0xff]  ;;  %v1776_v33 = vld [vmem:[#allocation8 + $0x6d8] sm:$0xff] }
 0x185   :  { %2156 = vmatpush.msrb.mxu0 %v1557_v51  ;;  %2179 = vmatpush.msrb.mxu1 %v1605_v26  ;;  %v1872_v51 = vld [vmem:[#allocation8 + $0x9d8] sm:$0xff]  ;;  %v1923_v26 = vld [vmem:[#allocation8 + $0xb70] sm:$0xff] }
 0x186   :  { %2202 = vmatpush.msrb.mxu2 %v1653_v10  ;;  %2225 = vmatpush.msrb.mxu3 %v1701_v30  ;;  %v1869_v10 = vld [vmem:[#allocation8 + $0x9c0] sm:$0xff]  ;;  %v1920_v30 = vld [vmem:[#allocation8 + $0xb58] sm:$0xff] }
 0x187   :  { %2157 = vmatmul.f32.vlgmr.msrb.gmra.mxu0 %v3421_v58  ;;  %2180 = vmatmul.f32.vlgmr.msrb.gmra.mxu1 %v3423_v13  ;;  %v3465_v56 = vpop.f32.mrf.mxu2 }
 0x188   :  { %2203 = vmatmul.f32.vlgmr.msrb.gmra.mxu2 %v3428_v59  ;;  %2226 = vmatmul.f32.vlgmr.msrb.gmra.mxu3 %v3430_v1 }
 0x189   :  { %2233 = vmatpush.msra.mxu0 %v1794_v15  ;;  %2256 = vmatpush.msra.mxu1 %v1842_v25  ;;  %v3469_v57 = vpop.f32.mrf.mxu3  ;;  %v685_v15 = vperm.slane %v3367_v44, 4  ;;  %v1818_v25 = vld [vmem:[#allocation8 + $0x828] sm:$0xff] }
 0x18a   :  { %2279 = vmatpush.msra.mxu2 %v1890_v19  ;;  %2302 = vmatpush.msra.mxu3 %v1938_v20  ;;  %v687_v19 = vperm.slane %v3367_v44, 6  ;;  %v1917_v20 = vld [vmem:[#allocation8 + $0xb40] sm:$0xff] }
 0x18b   :  { %2234 = vmatpush.msra.mxu0 %v1791_v22  ;;  %2257 = vmatpush.msra.mxu1 %v1839_v23  ;;  %v3467_v61 = vpop.f32.mrf.mxu0  ;;  %v1815_v23 = vld [vmem:[#allocation8 + $0x810] sm:$0xff] }
 0x18c   :  { %2280 = vmatpush.msra.mxu2 %v1887_v11  ;;  %2303 = vmatpush.msra.mxu3 %v1935_v62  ;;  %v1863_v11 = vld [vmem:[#allocation8 + $0x990] sm:$0xff]  ;;  %v688_v62 = vperm.slane %v3367_v44, 7  ;;  %v1986_v44 = vld [vmem:[#allocation8 + $0xd68] sm:$0xff] }
 0x18d   :  { %2235 = vmatpush.msra.mxu0 %v1788_v47  ;;  %2258 = vmatpush.msra.mxu1 %v1836_v28  ;;  %v1205_v22 = vpop.f32.mrf.mxu1  ;;  %v1764_v47 = vld [vmem:[#allocation8 + $0x678] sm:$0xff]  ;;  %v999_v28 = vadd.f32 %v3377_v14, %v685_v15  ;;  %v1857_v14 = vld [vmem:[#allocation8 + $0x960] sm:$0xff] }
 0x18e   :  { %2281 = vmatpush.msra.mxu2 %v1884_v31  ;;  %2304 = vmatpush.msra.mxu3 %v1932_v29  ;;  %v1068_v31 = vadd.f32 %v3395_v36, %v686_v16  ;;  %v1137_v29 = vadd.f32 %v3444_v32, %v687_v19  ;;  %v1806_v32 = vld [vmem:[#allocation8 + $0x7c8] sm:$0xff] }
 0x18f   :  { %2236 = vmatpush.msra.mxu0 %v1785_v6  ;;  %2259 = vmatpush.msra.mxu1 %v1833_v5  ;;  %v1761_v6 = vld [vmem:[#allocation8 + $0x660] sm:$0xff]  ;;  %v1228_v5 = vpop.f32.mrf.mxu2  ;;  %v1022_v36 = vadd.f32 %v3373_v2, %v999_v28  ;;  %v1902_v2 = vld [vmem:[#allocation8 + $0xac8] sm:$0xff] }
 0x190   :  { %2282 = vmatpush.msra.mxu2 %v1881_v7  ;;  %2160 = vmatmul.f32.gmra.mxu0 %v3449_v54 }
 0x191   :  { %2183 = vmatmul.f32.gmra.mxu1 %v3451_v39  ;;  %2206 = vmatmul.f32.gmra.mxu2 %v3453_v40 }
 0x192   :  { %2229 = vmatmul.f32.gmra.mxu3 %v3457_v52  ;;  %2237 = vmatpush.msra.mxu0 %v1782_v50  ;;  %v1809_v50 = vld [vmem:[#allocation8 + $0x7e0] sm:$0xff] }
 0x193   :  { %2260 = vmatpush.msra.mxu1 %v1830_v43  ;;  %2283 = vmatpush.msra.mxu2 %v1878_v12  ;;  %v1182_v7 = vpop.f32.mrf.mxu0  ;;  %v1206_v43 = vadd.f32 %v1205_v22, %v688_v62  ;;  %v1908_v12 = vld [vmem:[#allocation8 + $0xaf8] sm:$0xff]  ;;  %v1749_v22 = vld [vmem:[#allocation8 + $0x600] sm:$0xff] }
 0x194   :  { %2305 = vmatpush.msra.mxu3 %v1929_v46  ;;  %2238 = vmatpush.msra.mxu0 %v1779_v49  ;;  %v1758_v46 = vld [vmem:[#allocation8 + $0x648] sm:$0xff] }
 0x195   :  { %2261 = vmatpush.msra.mxu1 %v1827_v53  ;;  %2284 = vmatpush.msra.mxu2 %v1875_v42  ;;  %v1854_v49 = vld [vmem:[#allocation8 + $0x948] sm:$0xff]  ;;  %v1091_v53 = vadd.f32 %v3447_v34, %v1068_v31  ;;  %v1160_v42 = vadd.f32 %v3455_v41, %v1137_v29  ;;  %v1140_v34 = vadd.f32 %v3465_v56, %v687_v19  ;;  %v1800_v41 = vld [vmem:[#allocation8 + $0x798] sm:$0xff]  ;;  %v1797_v19 = vld [vmem:[#allocation8 + $0x780] sm:$0xff] }
 0x196   :  { %2306 = vmatpush.msra.mxu3 %v1926_v17  ;;  %2239 = vmatpush.msra.mxu0 %v1776_v33  ;;  %v1905_v17 = vld [vmem:[#allocation8 + $0xae0] sm:$0xff]  ;;  %v1755_v33 = vld [vmem:[#allocation8 + $0x630] sm:$0xff]  ;;  %v2082_v29 = vld [vmem:[#allocation8 + $0x1068] sm:$0xff] }
 0x197   :  { %2262 = vmatpush.msra.mxu1 %v1824_v63  ;;  %2285 = vmatpush.msra.mxu2 %v1872_v51  ;;  %v1251_v63 = vpop.f32.mrf.mxu3  ;;  %v1229_v51 = vadd.f32 %v1228_v5, %v1206_v43 }
 0x198   :  { %2307 = vmatpush.msra.mxu3 %v1923_v26  ;;  %2240 = vmatpush.msra.mxu0 %v1773_v8  ;;  %v1803_v26 = vld [vmem:[#allocation8 + $0x7b0] sm:$0xff] }
 0x199   :  { %2263 = vmatpush.msra.mxu1 %v1821_v9  ;;  %2286 = vmatpush.msra.mxu2 %v1869_v10  ;;  %v1851_v8 = vld [vmem:[#allocation8 + $0x930] sm:$0xff]  ;;  %v1752_v9 = vld [vmem:[#allocation8 + $0x618] sm:$0xff]  ;;  %v1208_v10 = vpop.f32.mrf.mxu1  ;;  %v1252_v56 = vadd.f32 %v1251_v63, %v1229_v51  ;;  %v1974_v63 = vld [vmem:[#allocation8 + $0xd08] sm:$0xff] }
 0x19a   :  { %2308 = vmatpush.msra.mxu3 %v1920_v30  ;;  %2241 = vmatpush.msra.mxu0 %v1770_v24  ;;  %v1045_v30 = vadd.f32 %v3385_v21, %v1022_v36  ;;  %v1848_v24 = vld [vmem:[#allocation8 + $0x918] sm:$0xff]  ;;  %v1071_v21 = vadd.f32 %v3425_v18, %v686_v16  ;;  %v2022_v51 = vld [vmem:[#allocation8 + $0xe88] sm:$0xff] }
 0x19b   :  { %2264 = vmatpush.msra.mxu1 %v1818_v25  ;;  %2287 = vmatpush.msra.mxu2 %v1866_v3  ;;  %v1002_v25 = vadd.f32 %v3410_v4, %v685_v15  ;;  %v1114_v3 = vadd.f32 %v3439_v48, %v1091_v53  ;;  %v1185_v4 = vpop.f32.mrf.mxu0  ;;  %v1896_v48 = vld [vmem:[#allocation8 + $0xa98] sm:$0xff]  ;;  %v1231_v15 = vpop.f32.mrf.mxu2  ;;  %v2127_v53 = vld [vmem:[#allocation8 + $0x11d0] sm:$0xff] }
 0x19c   :  { %2309 = vmatpush.msra.mxu3 %v1917_v20  ;;  %2242 = vmatpush.msra.mxu0 %v1767_v0  ;;  %v1183_v20 = vadd.f32 %v1182_v7, %v1160_v42  ;;  %v1899_v0 = vld [vmem:[#allocation8 + $0xab0] sm:$0xff]  ;;  %v2076_v36 = vld [vmem:[#allocation8 + $0x1038] sm:$0xff] }
 0x19d   :  { %2265 = vmatpush.msra.mxu1 %v1815_v23  ;;  %2288 = vmatpush.msra.mxu2 %v1863_v11  ;;  %v1845_v23 = vld [vmem:[#allocation8 + $0x900] sm:$0xff]  ;;  %v1209_v11 = vadd.f32 %v1208_v10, %v688_v62  ;;  %v1025_v18 = vadd.f32 %v3399_v45, %v1002_v25  ;;  %v3502_v16 = vmax.f32 %v1114_v3, 0.0  ;;  %v2034_v62 = vld [vmem:[#allocation8 + $0xee8] sm:$0xff]  ;;  %v1983_v45 = vld [vmem:[#allocation8 + $0xd50] sm:$0xff] }
 0x19e   :  { %2310 = vmatpush.msra.mxu3 %v1914_v27  ;;  %2243 = vmatpush.msra.mxu0 %v1764_v47  ;;  %v3498_v27 = vmax.f32 %v1045_v30, 0.0  ;;  %v1163_v47 = vadd.f32 %v3469_v57, %v1140_v34  ;;  %v3504_v28 = vmax.f32 %v1183_v20, 0.0  ;;  %v1893_v57 = vld [vmem:[#allocation8 + $0xa80] sm:$0xff]  ;;  %v2079_v7 = vld [vmem:[#allocation8 + $0x1050] sm:$0xff]  ;;  %v2070_v10 = vld [vmem:[#allocation8 + $0x1008] sm:$0xff] }
 0x19f   :  { %2266 = vmatpush.msra.mxu1 %v1812_v38  ;;  %2289 = vmatpush.msra.mxu2 %v1860_v60  ;;  %v1094_v38 = vadd.f32 %v3467_v61, %v1071_v21  ;;  %v3507_v60 = vmax.f32 %v1252_v56, 0.0  ;;  %v1232_v31 = vadd.f32 %v1231_v15, %v1209_v11  ;;  %v1048_v61 = vadd.f32 %v3403_v55, %v1025_v18  ;;  %v2025_v55 = vld [vmem:[#allocation8 + $0xea0] sm:$0xff]  ;;  %v3526_v30 = vld [vmem:[#allocation7 + $0x8] sm:$0xf]  ;;  %v2067_v25 = vld [vmem:[#allocation8 + $0xff0] sm:$0xff] }
 0x1a0   :  { %2311 = vmatpush.msra.mxu3 %v1911_v35  ;;  %2244 = vmatpush.msra.mxu0 %v1761_v6  ;;  %v1254_v35 = vpop.f32.mrf.mxu3  ;;  %v2031_v6 = vld [vmem:[#allocation8 + $0xed0] sm:$0xff]  ;;  %v1186_v5 = vadd.f32 %v1185_v4, %v1163_v47  ;;  %v2124_v34 = vld [vmem:[#allocation8 + $0x11b8] sm:$0xff]  ;;  %v2121_v3 = vld [vmem:[#allocation8 + $0x11a0] sm:$0xff] }
 0x1a1   :  { %2267 = vmatpush.msra.mxu1 %v1809_v50  ;;  %2290 = vmatpush.msra.mxu2 %v1857_v14  ;;  %v1980_v50 = vld [vmem:[#allocation8 + $0xd38] sm:$0xff]  ;;  %v2130_v14 = vld [vmem:[#allocation8 + $0x11e8] sm:$0xff]  ;;  %v1117_v43 = vadd.f32 %v3460_v37, %v1094_v38  ;;  %v1965_v20 = vld [vmem:[#allocation8 + $0xcc0] sm:$0xff] }
 0x1a2   :  { %2312 = vmatpush.msra.mxu3 %v1908_v12  ;;  %2245 = vmatpush.msra.mxu0 %v1758_v46  ;;  %v2028_v12 = vld [vmem:[#allocation8 + $0xeb8] sm:$0xff]  ;;  %v1255_v46 = vadd.f32 %v1254_v35, %v1232_v31  ;;  %v3515_v42 = vmax.f32 %v1186_v5, 0.0  ;;  %v2010_v11 = vld [vmem:[#allocation8 + $0xe28] sm:$0xff]  ;;  %v2061_v4 = vld [vmem:[#allocation8 + $0xfc0] sm:$0xff] }
 0x1a3   :  { %2268 = vmatpush.msra.mxu1 %v1806_v32  ;;  %2291 = vmatpush.msra.mxu2 %v1854_v49  ;;  %v1977_v49 = vld [vmem:[#allocation8 + $0xd20] sm:$0xff]  ;;  %v3519_v37 = vmax.f32 %v1117_v43, 0.0  ;;  %v2064_v56 = vld [vmem:[#allocation8 + $0xfd8] sm:$0xff]  ;;  %v1959_v47 = vld [vmem:[#allocation8 + $0xc90] sm:$0xff] }
 0x1a4   :  { %2313 = vmatpush.msra.mxu3 %v1905_v17  ;;  %2246 = vmatpush.msra.mxu0 %v1755_v33  ;;  %v3517_v17 = vmax.f32 %v1048_v61, 0.0  ;;  %v3521_v33 = vmax.f32 %v1255_v46, 0.0  ;;  %v2007_v18 = vld [vmem:[#allocation8 + $0xe10] sm:$0xff]  ;;  %v2112_v38 = vld [vmem:[#allocation8 + $0x1158] sm:$0xff]  ;;  %v2109_v5 = vld [vmem:[#allocation8 + $0x1140] sm:$0xff] }
 0x1a5   :  { %2269 = vmatpush.msra.mxu1 %v1803_v26  ;;  %2292 = vmatpush.msra.mxu2 %v1851_v8  ;;  %v2073_v8 = vld [vmem:[#allocation8 + $0x1020] sm:$0xff]  ;;  %v1956_v31 = vld [vmem:[#allocation8 + $0xc78] sm:$0xff]  ;;  %v2055_v35 = vld [vmem:[#allocation8 + $0xf90] sm:$0xff] }
 0x1a6   :  { %2314 = vmatpush.msra.mxu3 %v1902_v2  ;;  %2247 = vmatpush.msra.mxu0 %v1752_v9  ;;  %v1971_v2 = vld [vmem:[#allocation8 + $0xcf0] sm:$0xff]  ;;  %v1953_v61 = vld [vmem:[#allocation8 + $0xc60] sm:$0xff]  ;;  %v1950_v46 = vld [vmem:[#allocation8 + $0xc48] sm:$0xff] }
 0x1a7   :  { %2270 = vmatpush.msra.mxu1 %v1800_v41  ;;  %2293 = vmatpush.msra.mxu2 %v1848_v24  ;;  %v2019_v9 = vld [vmem:[#allocation8 + $0xe70] sm:$0xff]  ;;  %v1968_v41 = vld [vmem:[#allocation8 + $0xcd8] sm:$0xff] }
 0x1a8   :  { %2315 = vmatpush.msra.mxu3 %v1899_v0  ;;  %2248 = vmatpush.msra.mxu0 %v1749_v22  ;;  %v1274_v32 = vpop.f32.mrf.mxu0  ;;  %v2016_v24 = vld [vmem:[#allocation8 + $0xe58] sm:$0xff]  ;;  %v2013_v0 = vld [vmem:[#allocation8 + $0xe40] sm:$0xff]  ;;  %v689_v22 = vperm.slane %v3526_v30, 0 }
 0x1a9   :  { %2271 = vmatpush.msra.mxu1 %v1797_v19  ;;  %2294 = vmatpush.msra.mxu2 %v1845_v23  ;;  %v2118_v19 = vld [vmem:[#allocation8 + $0x1188] sm:$0xff] }
 0x1aa   :  { %2316 = vmatpush.msra.mxu3 %v1896_v48  ;;  %2249 = vmatmul.f32.vlgmr.msra.gmra.mxu0 %v3498_v27  ;;  %v1297_v26 = vpop.f32.mrf.mxu1  ;;  %v1962_v23 = vld [vmem:[#allocation8 + $0xca8] sm:$0xff]  ;;  %v2115_v48 = vld [vmem:[#allocation8 + $0x1170] sm:$0xff]  ;;  %v1275_v15 = vadd.f32 %v1274_v32, %v689_v22 }
 0x1ab   :  { %2272 = vmatmul.f32.vlgmr.msra.gmra.mxu1 %v3502_v16  ;;  %2295 = vmatmul.f32.vlgmr.msra.gmra.mxu2 %v3504_v28 }
 0x1ac   :  { %2325 = vmatpush.msrb.mxu0 %v1986_v44  ;;  %2348 = vmatpush.msrb.mxu1 %v2034_v62  ;;  %v2058_v62 = vld [vmem:[#allocation8 + $0xfa8] sm:$0xff] }
 0x1ad   :  { %2317 = vmatpush.msra.mxu3 %v1893_v57  ;;  %2371 = vmatpush.msrb.mxu2 %v2082_v29  ;;  %v690_v57 = vperm.slane %v3526_v30, 1  ;;  %v2004_v29 = vld [vmem:[#allocation8 + $0xdf8] sm:$0xff] }
 0x1ae   :  { %2318 = vmatmul.f32.vlgmr.msra.gmra.mxu3 %v3507_v60  ;;  %2326 = vmatpush.msrb.mxu0 %v1983_v45 }
 0x1af   :  { %2349 = vmatpush.msrb.mxu1 %v2031_v6  ;;  %2372 = vmatpush.msrb.mxu2 %v2079_v7  ;;  %v1298_v7 = vadd.f32 %v1297_v26, %v1275_v15  ;;  %v1995_v26 = vld [vmem:[#allocation8 + $0xdb0] sm:$0xff] }
 0x1b0   :  { %2327 = vmatpush.msrb.mxu0 %v1980_v50  ;;  %2394 = vmatpush.msrb.mxu3 %v2130_v14  ;;  %v2001_v50 = vld [vmem:[#allocation8 + $0xde0] sm:$0xff]  ;;  %v2052_v14 = vld [vmem:[#allocation8 + $0xf78] sm:$0xff] }
 0x1b1   :  { %2350 = vmatpush.msrb.mxu1 %v2028_v12  ;;  %2373 = vmatpush.msrb.mxu2 %v2076_v36  ;;  %v1277_v21 = vpop.f32.mrf.mxu0  ;;  %v2106_v12 = vld [vmem:[#allocation8 + $0x1128] sm:$0xff] }
 0x1b2   :  { %2328 = vmatpush.msrb.mxu0 %v1977_v49  ;;  %2395 = vmatpush.msrb.mxu3 %v2127_v53  ;;  %v1998_v36 = vld [vmem:[#allocation8 + $0xdc8] sm:$0xff]  ;;  %v2049_v49 = vld [vmem:[#allocation8 + $0xf60] sm:$0xff]  ;;  %v2103_v53 = vld [vmem:[#allocation8 + $0x1110] sm:$0xff] }
 0x1b3   :  { %2351 = vmatpush.msrb.mxu1 %v2025_v55  ;;  %2252 = vmatmul.f32.gmra.mxu0 %v3517_v17  ;;  %v1320_v6 = vpop.f32.mrf.mxu2  ;;  %v1278_v55 = vadd.f32 %v1277_v21, %v689_v22  ;;  %v1989_v22 = vld [vmem:[#allocation8 + $0xd80] sm:$0xff] }
 0x1b4   :  { %2275 = vmatmul.f32.gmra.mxu1 %v3519_v37  ;;  %2298 = vmatmul.f32.gmra.mxu2 %v3515_v42  ;;  %v1300_v44 = vpop.f32.mrf.mxu1 }
 0x1b5   :  { %2329 = vmatpush.msrb.mxu0 %v1974_v63  ;;  %2352 = vmatpush.msrb.mxu1 %v2022_v51  ;;  %v1321_v63 = vadd.f32 %v1320_v6, %v1298_v7  ;;  %v1947_v51 = vld [vmem:[#allocation8 + $0xc30] sm:$0xff]  ;;  %v1696_v6 = vld [vmem:[#allocation8 + $0x458] sm:$0xff] }
 0x1b6   :  { %2321 = vmatmul.f32.gmra.mxu3 %v3521_v33  ;;  %2374 = vmatpush.msrb.mxu2 %v2073_v8  ;;  %v2046_v8 = vld [vmem:[#allocation8 + $0xf48] sm:$0xff] }
 0x1b7   :  { %2330 = vmatpush.msrb.mxu0 %v1971_v2  ;;  %2353 = vmatpush.msrb.mxu1 %v2019_v9  ;;  %v2100_v9 = vld [vmem:[#allocation8 + $0x10f8] sm:$0xff] }
 0x1b8   :  { %2375 = vmatpush.msrb.mxu2 %v2070_v10  ;;  %2396 = vmatpush.msrb.mxu3 %v2124_v34  ;;  %v1343_v45 = vpop.f32.mrf.mxu3  ;;  %v1944_v10 = vld [vmem:[#allocation8 + $0xc18] sm:$0xff] }
 0x1b9   :  { %2331 = vmatpush.msrb.mxu0 %v1968_v41  ;;  %2354 = vmatpush.msrb.mxu1 %v2016_v24  ;;  %v1344_v43 = vadd.f32 %v1343_v45, %v690_v57  ;;  %v1992_v34 = vld [vmem:[#allocation8 + $0xd98] sm:$0xff]  ;;  %v2043_v24 = vld [vmem:[#allocation8 + $0xf30] sm:$0xff] }
 0x1ba   :  { %2376 = vmatpush.msrb.mxu2 %v2067_v25  ;;  %2397 = vmatpush.msrb.mxu3 %v2121_v3  ;;  %v2097_v25 = vld [vmem:[#allocation8 + $0x10e0] sm:$0xff]  ;;  %v1301_v3 = vadd.f32 %v1300_v44, %v1278_v55  ;;  %v1699_v45 = vld [vmem:[#allocation8 + $0x470] sm:$0xff]  ;;  %v1690_v55 = vld [vmem:[#allocation8 + $0x428] sm:$0xff] }
 0x1bb   :  { %2332 = vmatpush.msrb.mxu0 %v1965_v20  ;;  %2355 = vmatpush.msrb.mxu1 %v2013_v0  ;;  %v1366_v32 = vpop.f32.mrf.mxu0  ;;  %v3533_v20 = vmax.f32 %v1321_v63, 0.0  ;;  %v1941_v0 = vld [vmem:[#allocation8 + $0xc00] sm:$0xff] }
 0x1bc   :  { %2377 = vmatpush.msrb.mxu2 %v2064_v56  ;;  %2398 = vmatpush.msrb.mxu3 %v2118_v19  ;;  %v1367_v2 = vadd.f32 %v1366_v32, %v1344_v43  ;;  %v1651_v56 = vld [vmem:[#allocation8 + $0x2f0] sm:$0xff]  ;;  %v1633_v63 = vld [vmem:[#allocation8 + $0x260] sm:$0xff] }
 0x1bd   :  { %2333 = vmatpush.msrb.mxu0 %v1962_v23  ;;  %2356 = vmatpush.msrb.mxu1 %v2010_v11  ;;  %v1323_v19 = vpop.f32.mrf.mxu2  ;;  %v1603_v11 = vld [vmem:[#allocation8 + $0x170] sm:$0xff] }
 0x1be   :  { %2378 = vmatpush.msrb.mxu2 %v2061_v4  ;;  %2399 = vmatpush.msrb.mxu3 %v2115_v48  ;;  %v1389_v41 = vpop.f32.mrf.mxu1  ;;  %v2040_v4 = vld [vmem:[#allocation8 + $0xf18] sm:$0xff]  ;;  %v1324_v44 = vadd.f32 %v1323_v19, %v1301_v3  ;;  %v1639_v43 = vld [vmem:[#allocation8 + $0x290] sm:$0xff]  ;;  %v1741_v19 = vld [vmem:[#allocation8 + $0x5c0] sm:$0xff] }
 0x1bf   :  { %2334 = vmatpush.msrb.mxu0 %v1959_v47  ;;  %2357 = vmatpush.msrb.mxu1 %v2007_v18  ;;  %v1390_v23 = vadd.f32 %v1389_v41, %v1367_v2  ;;  %v1648_v48 = vld [vmem:[#allocation8 + $0x2d8] sm:$0xff]  ;;  %v2094_v47 = vld [vmem:[#allocation8 + $0x10c8] sm:$0xff]  ;;  %v1627_v41 = vld [vmem:[#allocation8 + $0x230] sm:$0xff] }
 0x1c0   :  { %2379 = vmatpush.msrb.mxu2 %v2058_v62  ;;  %2400 = vmatpush.msrb.mxu3 %v2112_v38  ;;  %v1600_v18 = vld [vmem:[#allocation8 + $0x158] sm:$0xff]  ;;  %v2037_v62 = vld [vmem:[#allocation8 + $0xf00] sm:$0xff]  ;;  %v3540_v7 = vmax.f32 %v1324_v44, 0.0  ;;  %v1579_v3 = vld [vmem:[#allocation8 + $0xb0] sm:$0xff] }
 0x1c1   :  { %2335 = vmatpush.msrb.mxu0 %v1956_v31  ;;  %2358 = vmatpush.msrb.mxu1 %v2004_v29  ;;  %v3538_v31 = vmax.f32 %v1390_v23, 0.0  ;;  %v1645_v29 = vld [vmem:[#allocation8 + $0x2c0] sm:$0xff]  ;;  %v1570_v44 = vld [vmem:[#allocation8 + $0x68] sm:$0xff] }
 0x1c2   :  { %2380 = vmatpush.msrb.mxu2 %v2055_v35  ;;  %2401 = vmatpush.msrb.mxu3 %v2109_v5  ;;  %v1346_v21 = vpop.f32.mrf.mxu3  ;;  %v1597_v35 = vld [vmem:[#allocation8 + $0x140] sm:$0xff] }
 0x1c3   :  { %2336 = vmatpush.msrb.mxu0 %v1953_v61  ;;  %2359 = vmatpush.msrb.mxu1 %v2001_v50  ;;  %v1347_v15 = vadd.f32 %v1346_v21, %v690_v57  ;;  %v1642_v57 = vld [vmem:[#allocation8 + $0x2a8] sm:$0xff]  ;;  %v2091_v50 = vld [vmem:[#allocation8 + $0x10b0] sm:$0xff]  ;;  %v1681_v21 = vld [vmem:[#allocation8 + $0x3e0] sm:$0xff] }
 0x1c4   :  { %2381 = vmatpush.msrb.mxu2 %v2052_v14  ;;  %2402 = vmatpush.msrb.mxu3 %v2106_v12  ;;  %v1594_v61 = vld [vmem:[#allocation8 + $0x128] sm:$0xff]  ;;  %v1591_v12 = vld [vmem:[#allocation8 + $0x110] sm:$0xff]  ;;  %v1621_v23 = vld [vmem:[#allocation8 + $0x200] sm:$0xff] }
 0x1c5   :  { %2337 = vmatpush.msrb.mxu0 %v1950_v46  ;;  %2360 = vmatpush.msrb.mxu1 %v1998_v36  ;;  %v1369_v38 = vpop.f32.mrf.mxu0  ;;  %v1693_v46 = vld [vmem:[#allocation8 + $0x440] sm:$0xff]  ;;  %v1636_v36 = vld [vmem:[#allocation8 + $0x278] sm:$0xff] }
 0x1c6   :  { %2382 = vmatpush.msrb.mxu2 %v2049_v49  ;;  %2403 = vmatpush.msrb.mxu3 %v2103_v53  ;;  %v1370_v5 = vadd.f32 %v1369_v38, %v1347_v15  ;;  %v2088_v49 = vld [vmem:[#allocation8 + $0x1098] sm:$0xff]  ;;  %v1738_v15 = vld [vmem:[#allocation8 + $0x5a8] sm:$0xff]  ;;  %v691_v38 = vperm.slane %v3526_v30, 2 }
 0x1c7   :  { %2338 = vmatpush.msrb.mxu0 %v1947_v51  ;;  %2361 = vmatpush.msrb.mxu1 %v1995_v26  ;;  %v1392_v14 = vpop.f32.mrf.mxu1  ;;  %v1588_v53 = vld [vmem:[#allocation8 + $0xf8] sm:$0xff]  ;;  %v2085_v51 = vld [vmem:[#allocation8 + $0x1080] sm:$0xff] }
 0x1c8   :  { %2383 = vmatpush.msrb.mxu2 %v2046_v8  ;;  %2404 = vmatpush.msrb.mxu3 %v2100_v9  ;;  %v1393_v32 = vadd.f32 %v1392_v14, %v1370_v5  ;;  %v1585_v26 = vld [vmem:[#allocation8 + $0xe0] sm:$0xff]  ;;  %v1687_v8 = vld [vmem:[#allocation8 + $0x410] sm:$0xff]  ;;  %v1630_v9 = vld [vmem:[#allocation8 + $0x248] sm:$0xff] }
 0x1c9   :  { %2339 = vmatpush.msrb.mxu0 %v1944_v10  ;;  %2362 = vmatpush.msrb.mxu1 %v1992_v34  ;;  %v1747_v10 = vld [vmem:[#allocation8 + $0x5f0] sm:$0xff]  ;;  %v1582_v34 = vld [vmem:[#allocation8 + $0xc8] sm:$0xff]  ;;  %v1669_v5 = vld [vmem:[#allocation8 + $0x380] sm:$0xff] }
 0x1ca   :  { %2384 = vmatpush.msrb.mxu2 %v2043_v24  ;;  %2405 = vmatpush.msrb.mxu3 %v2097_v25  ;;  %v3544_v2 = vmax.f32 %v1393_v32, 0.0  ;;  %v1684_v24 = vld [vmem:[#allocation8 + $0x3f8] sm:$0xff]  ;;  %v1729_v14 = vld [vmem:[#allocation8 + $0x560] sm:$0xff]  ;;  %v1726_v32 = vld [vmem:[#allocation8 + $0x548] sm:$0xff] }
 0x1cb   :  { %2340 = vmatpush.msrb.mxu0 %v1941_v0  ;;  %2363 = vmatpush.msrb.mxu1 %v1989_v22  ;;  %v1744_v0 = vld [vmem:[#allocation8 + $0x5d8] sm:$0xff] }
 0x1cc   :  { %2341 = vmatmul.f32.vlgmr.msrb.gmra.mxu0 %v3533_v20  ;;  %2385 = vmatpush.msrb.mxu2 %v2040_v4  ;;  %v1624_v22 = vld [vmem:[#allocation8 + $0x218] sm:$0xff] }
 0x1cd   :  { %2440 = vmatpush.msra.mxu1 %v1651_v56  ;;  %2417 = vmatpush.msra.mxu0 %v1603_v11  ;;  %v1576_v56 = vld [vmem:[#allocation8 + $0x98] sm:$0xff]  ;;  %v1678_v11 = vld [vmem:[#allocation8 + $0x3c8] sm:$0xff] }
 0x1ce   :  { %2406 = vmatpush.msrb.mxu3 %v2094_v47  ;;  %2386 = vmatpush.msrb.mxu2 %v2037_v62  ;;  %v1618_v47 = vld [vmem:[#allocation8 + $0x1e8] sm:$0xff]  ;;  %v1735_v62 = vld [vmem:[#allocation8 + $0x590] sm:$0xff] }
 0x1cf   :  { %2441 = vmatpush.msra.mxu1 %v1648_v48  ;;  %2418 = vmatpush.msra.mxu0 %v1600_v18  ;;  %v1573_v48 = vld [vmem:[#allocation8 + $0x80] sm:$0xff]  ;;  %v1675_v18 = vld [vmem:[#allocation8 + $0x3b0] sm:$0xff] }
 0x1d0   :  { %2463 = vmatpush.msra.mxu2 %v1699_v45  ;;  %2364 = vmatmul.f32.vlgmr.msrb.gmra.mxu1 %v3538_v31  ;;  %v1672_v45 = vld [vmem:[#allocation8 + $0x398] sm:$0xff] }
 0x1d1   :  { %2442 = vmatpush.msra.mxu1 %v1645_v29  ;;  %2419 = vmatpush.msra.mxu0 %v1597_v35  ;;  %v1615_v29 = vld [vmem:[#allocation8 + $0x1d0] sm:$0xff] }
 0x1d2   :  { %2464 = vmatpush.msra.mxu2 %v1696_v6  ;;  %2407 = vmatpush.msrb.mxu3 %v2091_v50  ;;  %v1567_v35 = vld [vmem:[#allocation8 + $0x50] sm:$0xff]  ;;  %v1612_v6 = vld [vmem:[#allocation8 + $0x1b8] sm:$0xff] }
 0x1d3   :  { %2443 = vmatpush.msra.mxu1 %v1642_v57  ;;  %2420 = vmatpush.msra.mxu0 %v1594_v61  ;;  %v1732_v57 = vld [vmem:[#allocation8 + $0x578] sm:$0xff] }
 0x1d4   :  { %2344 = vmatmul.f32.gmra.mxu0 %v3540_v7  ;;  %2465 = vmatpush.msra.mxu2 %v1693_v46  ;;  %v1412_v25 = vpop.f32.mrf.mxu2  ;;  %v1564_v50 = vld [vmem:[#allocation8 + $0x38] sm:$0xff]  ;;  %v1666_v46 = vld [vmem:[#allocation8 + $0x368] sm:$0xff] }
 0x1d5   :  { %2444 = vmatpush.msra.mxu1 %v1639_v43  ;;  %2421 = vmatpush.msra.mxu0 %v1591_v12  ;;  %v1413_v43 = vadd.f32 %v1412_v25, %v691_v38  ;;  %v1609_v12 = vld [vmem:[#allocation8 + $0x1a0] sm:$0xff]  ;;  %v1660_v25 = vld [vmem:[#allocation8 + $0x338] sm:$0xff] }
 0x1d6   :  { %2408 = vmatpush.msrb.mxu3 %v2088_v49  ;;  %2466 = vmatpush.msra.mxu2 %v1690_v55  ;;  %v1606_v49 = vld [vmem:[#allocation8 + $0x188] sm:$0xff] }
 0x1d7   :  { %2445 = vmatpush.msra.mxu1 %v1636_v36  ;;  %2422 = vmatpush.msra.mxu0 %v1588_v53  ;;  %v1435_v4 = vpop.f32.mrf.mxu3  ;;  %v1561_v36 = vld [vmem:[#allocation8 + $0x20] sm:$0xff]  ;;  %v1663_v53 = vld [vmem:[#allocation8 + $0x350] sm:$0xff] }
 0x1d8   :  { %2409 = vmatpush.msrb.mxu3 %v2085_v51  ;;  %2467 = vmatpush.msra.mxu2 %v1687_v8  ;;  %v1558_v51 = vld [vmem:[#allocation8 + $0x8] sm:$0xff]  ;;  %v1436_v8 = vadd.f32 %v1435_v4, %v1413_v43  ;;  %v1789_v4 = vld [vmem:[#allocation8 + $0x740] sm:$0xff] }
 0x1d9   :  { %2446 = vmatpush.msra.mxu1 %v1633_v63  ;;  %2423 = vmatpush.msra.mxu0 %v1585_v26  ;;  %v1723_v26 = vld [vmem:[#allocation8 + $0x530] sm:$0xff] }
 0x1da   :  { %2486 = vmatpush.msra.mxu3 %v1747_v10  ;;  %2367 = vmatmul.f32.gmra.mxu1 %v3544_v2 }
 0x1db   :  { %2447 = vmatpush.msra.mxu1 %v1630_v9  ;;  %2424 = vmatpush.msra.mxu0 %v1582_v34  ;;  %v692_v9 = vperm.slane %v3526_v30, 3  ;;  %v1795_v34 = vld [vmem:[#allocation8 + $0x770] sm:$0xff]  ;;  %v1774_v30 = vld [vmem:[#allocation8 + $0x6c8] sm:$0xff] }
 0x1dc   :  { %2468 = vmatpush.msra.mxu2 %v1684_v24  ;;  %2487 = vmatpush.msra.mxu3 %v1744_v0  ;;  %v1792_v0 = vld [vmem:[#allocation8 + $0x758] sm:$0xff] }
 0x1dd   :  { %2448 = vmatpush.msra.mxu1 %v1627_v41  ;;  %2425 = vmatpush.msra.mxu0 %v1579_v3  ;;  %v1415_v61 = vpop.f32.mrf.mxu2  ;;  %v1843_v41 = vld [vmem:[#allocation8 + $0x8f0] sm:$0xff]  ;;  %v1720_v3 = vld [vmem:[#allocation8 + $0x518] sm:$0xff] }
 0x1de   :  { %2469 = vmatpush.msra.mxu2 %v1681_v21  ;;  %2488 = vmatpush.msra.mxu3 %v1741_v19  ;;  %v1657_v21 = vld [vmem:[#allocation8 + $0x320] sm:$0xff] }
 0x1df   :  { %2449 = vmatpush.msra.mxu1 %v1624_v22  ;;  %2426 = vmatpush.msra.mxu0 %v1576_v56  ;;  %v1840_v22 = vld [vmem:[#allocation8 + $0x8d8] sm:$0xff]  ;;  %v1717_v56 = vld [vmem:[#allocation8 + $0x500] sm:$0xff] }
 0x1e0   :  { %2470 = vmatpush.msra.mxu2 %v1678_v11  ;;  %2489 = vmatpush.msra.mxu3 %v1738_v15  ;;  %v1438_v55 = vpop.f32.mrf.mxu3  ;;  %v1458_v63 = vpop.f32.mrf.mxu0  ;;  %v1416_v11 = vadd.f32 %v1415_v61, %v691_v38 }
 0x1e1   :  { %2450 = vmatpush.msra.mxu1 %v1621_v23  ;;  %2427 = vmatpush.msra.mxu0 %v1573_v48  ;;  %v1459_v24 = vadd.f32 %v1458_v63, %v1436_v8  ;;  %v1837_v48 = vld [vmem:[#allocation8 + $0x8c0] sm:$0xff] }
 0x1e2   :  { %2471 = vmatpush.msra.mxu2 %v1675_v18  ;;  %2490 = vmatpush.msra.mxu3 %v1735_v62  ;;  %v1714_v18 = vld [vmem:[#allocation8 + $0x4e8] sm:$0xff]  ;;  %v1777_v63 = vld [vmem:[#allocation8 + $0x6e0] sm:$0xff] }
 0x1e3   :  { %2451 = vmatpush.msra.mxu1 %v1618_v47  ;;  %2428 = vmatpush.msra.mxu0 %v1570_v44  ;;  %v3553_v15 = vmax.f32 %v1459_v24, 0.0  ;;  %v1654_v47 = vld [vmem:[#allocation8 + $0x308] sm:$0xff]  ;;  %v1825_v8 = vld [vmem:[#allocation8 + $0x860] sm:$0xff] }
 0x1e4   :  { %2472 = vmatpush.msra.mxu2 %v1672_v45  ;;  %2491 = vmatpush.msra.mxu3 %v1732_v57  ;;  %v1786_v44 = vld [vmem:[#allocation8 + $0x728] sm:$0xff]  ;;  %v1439_v57 = vadd.f32 %v1438_v55, %v1416_v11  ;;  %v1705_v55 = vld [vmem:[#allocation8 + $0x4a0] sm:$0xff]  ;;  %v1768_v11 = vld [vmem:[#allocation8 + $0x698] sm:$0xff] }
 0x1e5   :  { %2452 = vmatpush.msra.mxu1 %v1615_v29  ;;  %2429 = vmatpush.msra.mxu0 %v1567_v35  ;;  %v1481_v10 = vpop.f32.mrf.mxu1  ;;  %v1834_v62 = vld [vmem:[#allocation8 + $0x8a8] sm:$0xff]  ;;  %v1891_v29 = vld [vmem:[#allocation8 + $0xa70] sm:$0xff] }
 0x1e6   :  { %2473 = vmatpush.msra.mxu2 %v1669_v5  ;;  %2492 = vmatpush.msra.mxu3 %v1729_v14  ;;  %v1482_v19 = vadd.f32 %v1481_v10, %v692_v9  ;;  %v1504_v23 = vpop.f32.mrf.mxu2  ;;  %v1783_v5 = vld [vmem:[#allocation8 + $0x710] sm:$0xff]  ;;  %v1888_v14 = vld [vmem:[#allocation8 + $0xa58] sm:$0xff]  ;;  %v1882_v10 = vld [vmem:[#allocation8 + $0xa28] sm:$0xff] }
 0x1e7   :  { %2453 = vmatpush.msra.mxu1 %v1612_v6  ;;  %2430 = vmatpush.msra.mxu0 %v1564_v50  ;;  %v1711_v6 = vld [vmem:[#allocation8 + $0x4d0] sm:$0xff]  ;;  %v1822_v24 = vld [vmem:[#allocation8 + $0x848] sm:$0xff] }
 0x1e8   :  { %2474 = vmatpush.msra.mxu2 %v1666_v46  ;;  %2493 = vmatpush.msra.mxu3 %v1726_v32  ;;  %v1505_v45 = vadd.f32 %v1504_v23, %v1482_v19  ;;  %v1831_v50 = vld [vmem:[#allocation8 + $0x890] sm:$0xff]  ;;  %v1708_v46 = vld [vmem:[#allocation8 + $0x4b8] sm:$0xff] }
 0x1e9   :  { %2454 = vmatpush.msra.mxu1 %v1609_v12  ;;  %2431 = vmatpush.msra.mxu0 %v1561_v36  ;;  %v1527_v38 = vpop.f32.mrf.mxu3  ;;  %v1780_v36 = vld [vmem:[#allocation8 + $0x6f8] sm:$0xff] }
 0x1ea   :  { %2475 = vmatpush.msra.mxu2 %v1663_v53  ;;  %2494 = vmatpush.msra.mxu3 %v1723_v26  ;;  %v1461_v35 = vpop.f32.mrf.mxu0  ;;  %v1528_v12 = vadd.f32 %v1527_v38, %v1505_v45  ;;  %v1828_v32 = vld [vmem:[#allocation8 + $0x878] sm:$0xff]  ;;  %v1930_v45 = vld [vmem:[#allocation8 + $0xba8] sm:$0xff] }
 0x1eb   :  { %2455 = vmatpush.msra.mxu1 %v1606_v49  ;;  %2432 = vmatpush.msra.mxu0 %v1558_v51  ;;  %v1462_v43 = vadd.f32 %v1461_v35, %v1439_v57  ;;  %v1885_v49 = vld [vmem:[#allocation8 + $0xa40] sm:$0xff]  ;;  %v1936_v19 = vld [vmem:[#allocation8 + $0xbd8] sm:$0xff]  ;;  %v1762_v35 = vld [vmem:[#allocation8 + $0x668] sm:$0xff] }
 0x1ec   :  { %2433 = vmatmul.f32.vlgmr.msra.gmra.mxu0 %v3421_v58  ;;  %2456 = vmatmul.f32.vlgmr.msra.gmra.mxu1 %v3423_v13  ;;  %v1810_v38 = vld [vmem:[#allocation8 + $0x7e8] sm:$0xff]  ;;  %v1867_v57 = vld [vmem:[#allocation8 + $0x9b0] sm:$0xff] }
 0x1ed   :  { %2509 = vmatpush.msrb.mxu0 %v1795_v34  ;;  %2532 = vmatpush.msrb.mxu1 %v1843_v41  ;;  %v3560_v26 = vmax.f32 %v1462_v43, 0.0  ;;  %v3562_v34 = vmax.f32 %v1528_v12, 0.0  ;;  %v1702_v41 = vld [vmem:[#allocation8 + $0x488] sm:$0xff]  ;;  %v1756_v43 = vld [vmem:[#allocation8 + $0x638] sm:$0xff] }
 0x1ee   :  { %2476 = vmatpush.msra.mxu2 %v1660_v25  ;;  %2495 = vmatpush.msra.mxu3 %v1720_v3  ;;  %v1879_v25 = vld [vmem:[#allocation8 + $0xa10] sm:$0xff]  ;;  %v1804_v12 = vld [vmem:[#allocation8 + $0x7b8] sm:$0xff] }
 0x1ef   :  { %2510 = vmatpush.msrb.mxu0 %v1792_v0  ;;  %2533 = vmatpush.msrb.mxu1 %v1840_v22  ;;  %v1484_v61 = vpop.f32.mrf.mxu1  ;;  %v1939_v0 = vld [vmem:[#allocation8 + $0xbf0] sm:$0xff] }
 0x1f0   :  { %2477 = vmatpush.msra.mxu2 %v1657_v21  ;;  %2496 = vmatpush.msra.mxu3 %v1717_v56  ;;  %v1485_v53 = vadd.f32 %v1484_v61, %v692_v9  ;;  %v1507_v51 = vpop.f32.mrf.mxu2  ;;  %v1771_v22 = vld [vmem:[#allocation8 + $0x6b0] sm:$0xff]  ;;  %v1876_v56 = vld [vmem:[#allocation8 + $0x9f8] sm:$0xff] }
 0x1f1   :  { %2511 = vmatpush.msrb.mxu0 %v1789_v4  ;;  %2534 = vmatpush.msrb.mxu1 %v1837_v48  ;;  %v1819_v21 = vld [vmem:[#allocation8 + $0x830] sm:$0xff]  ;;  %v1816_v4 = vld [vmem:[#allocation8 + $0x818] sm:$0xff]  ;;  %v1873_v48 = vld [vmem:[#allocation8 + $0x9e0] sm:$0xff] }
 0x1f2   :  { %2478 = vmatpush.msra.mxu2 %v1654_v47  ;;  %2497 = vmatpush.msra.mxu3 %v1714_v18  ;;  %v1508_v9 = vadd.f32 %v1507_v51, %v1485_v53  ;;  %v1933_v47 = vld [vmem:[#allocation8 + $0xbc0] sm:$0xff]  ;;  %v1807_v61 = vld [vmem:[#allocation8 + $0x7d0] sm:$0xff]  ;;  %v1858_v53 = vld [vmem:[#allocation8 + $0x968] sm:$0xff] }
 0x1f3   :  { %2387 = vmatmul.f32.vlgmr.msrb.gmra.mxu2 %v3553_v15  ;;  %2512 = vmatpush.msrb.mxu0 %v1786_v44  ;;  %v1530_v3 = vpop.f32.mrf.mxu3  ;;  %v1765_v18 = vld [vmem:[#allocation8 + $0x680] sm:$0xff]  ;;  %v1798_v51 = vld [vmem:[#allocation8 + $0x788] sm:$0xff] }
 0x1f4   :  { %2535 = vmatpush.msrb.mxu1 %v1834_v62  ;;  %2555 = vmatpush.msrb.mxu2 %v1891_v29  ;;  %v1531_v23 = vadd.f32 %v1530_v3, %v1508_v9  ;;  %v1813_v44 = vld [vmem:[#allocation8 + $0x800] sm:$0xff]  ;;  %v1870_v62 = vld [vmem:[#allocation8 + $0x9c8] sm:$0xff]  ;;  %v1852_v9 = vld [vmem:[#allocation8 + $0x938] sm:$0xff] }
 0x1f5   :  { %2498 = vmatpush.msra.mxu3 %v1711_v6  ;;  %2436 = vmatmul.f32.gmra.mxu0 %v3449_v54  ;;  %v1927_v6 = vld [vmem:[#allocation8 + $0xb90] sm:$0xff]  ;;  %v2032_v3 = vld [vmem:[#allocation8 + $0xed8] sm:$0xff] }
 0x1f6   :  { %2459 = vmatmul.f32.gmra.mxu1 %v3451_v39  ;;  %2513 = vmatpush.msrb.mxu0 %v1783_v5  ;;  %v3566_v29 = vmax.f32 %v1531_v23, 0.0  ;;  %v1759_v5 = vld [vmem:[#allocation8 + $0x650] sm:$0xff]  ;;  %v1906_v23 = vld [vmem:[#allocation8 + $0xae8] sm:$0xff] }
 0x1f7   :  { %2536 = vmatpush.msrb.mxu1 %v1831_v50  ;;  %2556 = vmatpush.msrb.mxu2 %v1888_v14  ;;  %v1864_v50 = vld [vmem:[#allocation8 + $0x998] sm:$0xff] }
 0x1f8   :  { %2499 = vmatpush.msra.mxu3 %v1708_v46  ;;  %2514 = vmatpush.msrb.mxu0 %v1780_v36  ;;  %v1924_v14 = vld [vmem:[#allocation8 + $0xb78] sm:$0xff]  ;;  %v1861_v46 = vld [vmem:[#allocation8 + $0x980] sm:$0xff] }
 0x1f9   :  { %2537 = vmatpush.msrb.mxu1 %v1828_v32  ;;  %2557 = vmatpush.msrb.mxu2 %v1885_v49  ;;  %v1921_v36 = vld [vmem:[#allocation8 + $0xb60] sm:$0xff] }
 0x1fa   :  { %2500 = vmatpush.msra.mxu3 %v1705_v55  ;;  %2515 = vmatpush.msrb.mxu0 %v1777_v63  ;;  %v1753_v32 = vld [vmem:[#allocation8 + $0x620] sm:$0xff]  ;;  %v1918_v55 = vld [vmem:[#allocation8 + $0xb48] sm:$0xff] }
 0x1fb   :  { %2538 = vmatpush.msrb.mxu1 %v1825_v8  ;;  %2558 = vmatpush.msrb.mxu2 %v1882_v10  ;;  %v1801_v49 = vld [vmem:[#allocation8 + $0x7a0] sm:$0xff]  ;;  %v1750_v63 = vld [vmem:[#allocation8 + $0x608] sm:$0xff]  ;;  %v1855_v8 = vld [vmem:[#allocation8 + $0x950] sm:$0xff] }
 0x1fc   :  { %2501 = vmatpush.msra.mxu3 %v1702_v41  ;;  %2390 = vmatmul.f32.gmra.mxu2 %v3560_v26  ;;  %v1915_v10 = vld [vmem:[#allocation8 + $0xb30] sm:$0xff] }
 0x1fd   :  { %2410 = vmatmul.f32.vlgmr.msrb.gmra.mxu3 %v3562_v34  ;;  %2516 = vmatpush.msrb.mxu0 %v1774_v30  ;;  %v1987_v41 = vld [vmem:[#allocation8 + $0xd70] sm:$0xff] }
 0x1fe   :  { %2539 = vmatpush.msrb.mxu1 %v1822_v24  ;;  %2559 = vmatpush.msrb.mxu2 %v1879_v25  ;;  %v2035_v30 = vld [vmem:[#allocation8 + $0xef0] sm:$0xff]  ;;  %v1912_v24 = vld [vmem:[#allocation8 + $0xb18] sm:$0xff] }
 0x1ff   :  { %2578 = vmatpush.msrb.mxu3 %v1939_v0  ;;  %2517 = vmatpush.msrb.mxu0 %v1771_v22  ;;  %v1984_v25 = vld [vmem:[#allocation8 + $0xd58] sm:$0xff]  ;;  %v1849_v0 = vld [vmem:[#allocation8 + $0x920] sm:$0xff] }
 0x200   :  { %2540 = vmatpush.msrb.mxu1 %v1819_v21  ;;  %2560 = vmatpush.msrb.mxu2 %v1876_v56  ;;  %v1909_v22 = vld [vmem:[#allocation8 + $0xb00] sm:$0xff] }
 0x201   :  { %2579 = vmatpush.msrb.mxu3 %v1936_v19  ;;  %2518 = vmatpush.msrb.mxu0 %v1768_v11  ;;  %v1981_v21 = vld [vmem:[#allocation8 + $0xd40] sm:$0xff]  ;;  %v1846_v19 = vld [vmem:[#allocation8 + $0x908] sm:$0xff] }
 0x202   :  { %2541 = vmatpush.msrb.mxu1 %v1816_v4  ;;  %2561 = vmatpush.msrb.mxu2 %v1873_v48  ;;  %v2029_v56 = vld [vmem:[#allocation8 + $0xec0] sm:$0xff]  ;;  %v1978_v11 = vld [vmem:[#allocation8 + $0xd28] sm:$0xff]  ;;  %v2083_v48 = vld [vmem:[#allocation8 + $0x1070] sm:$0xff] }
 0x203   :  { %2580 = vmatpush.msrb.mxu3 %v1933_v47  ;;  %2519 = vmatpush.msrb.mxu0 %v1765_v18  ;;  %v2026_v4 = vld [vmem:[#allocation8 + $0xea8] sm:$0xff]  ;;  %v1903_v47 = vld [vmem:[#allocation8 + $0xad0] sm:$0xff] }
 0x204   :  { %2542 = vmatpush.msrb.mxu1 %v1813_v44  ;;  %2562 = vmatpush.msrb.mxu2 %v1870_v62  ;;  %v1975_v18 = vld [vmem:[#allocation8 + $0xd10] sm:$0xff]  ;;  %v2080_v62 = vld [vmem:[#allocation8 + $0x1058] sm:$0xff] }
 0x205   :  { %2581 = vmatpush.msrb.mxu3 %v1930_v45  ;;  %2479 = vmatmul.f32.vlgmr.msra.gmra.mxu2 %v3428_v59  ;;  %v2023_v44 = vld [vmem:[#allocation8 + $0xe90] sm:$0xff]  ;;  %v1900_v45 = vld [vmem:[#allocation8 + $0xab8] sm:$0xff] }
 0x206   :  { %2413 = vmatmul.f32.gmra.mxu3 %v3566_v29  ;;  %2520 = vmatpush.msrb.mxu0 %v1762_v35  ;;  %v1972_v35 = vld [vmem:[#allocation8 + $0xcf8] sm:$0xff] }
 0x207   :  { %2543 = vmatpush.msrb.mxu1 %v1810_v38  ;;  %2563 = vmatpush.msrb.mxu2 %v1867_v57  ;;  %v2020_v38 = vld [vmem:[#allocation8 + $0xe78] sm:$0xff]  ;;  %v2077_v57 = vld [vmem:[#allocation8 + $0x1040] sm:$0xff] }
 0x208   :  { %2582 = vmatpush.msrb.mxu3 %v1927_v6  ;;  %2521 = vmatpush.msrb.mxu0 %v1759_v5  ;;  %v1897_v6 = vld [vmem:[#allocation8 + $0xaa0] sm:$0xff] }
 0x209   :  { %2544 = vmatpush.msrb.mxu1 %v1807_v61  ;;  %2564 = vmatpush.msrb.mxu2 %v1864_v50  ;;  %v1969_v5 = vld [vmem:[#allocation8 + $0xce0] sm:$0xff]  ;;  %v2074_v50 = vld [vmem:[#allocation8 + $0x1028] sm:$0xff] }
 0x20a   :  { %2583 = vmatpush.msrb.mxu3 %v1924_v14  ;;  %2522 = vmatpush.msrb.mxu0 %v1756_v43  ;;  %v2017_v61 = vld [vmem:[#allocation8 + $0xe60] sm:$0xff]  ;;  %v1894_v14 = vld [vmem:[#allocation8 + $0xa88] sm:$0xff] }
 0x20b   :  { %2545 = vmatpush.msrb.mxu1 %v1804_v12  ;;  %2565 = vmatpush.msrb.mxu2 %v1861_v46  ;;  %v1966_v43 = vld [vmem:[#allocation8 + $0xcc8] sm:$0xff]  ;;  %v2071_v46 = vld [vmem:[#allocation8 + $0x1010] sm:$0xff] }
 0x20c   :  { %2584 = vmatpush.msrb.mxu3 %v1921_v36  ;;  %2523 = vmatpush.msrb.mxu0 %v1753_v32  ;;  %v2014_v12 = vld [vmem:[#allocation8 + $0xe48] sm:$0xff]  ;;  %v2131_v36 = vld [vmem:[#allocation8 + $0x11f0] sm:$0xff] }
 0x20d   :  { %2546 = vmatpush.msrb.mxu1 %v1801_v49  ;;  %2566 = vmatpush.msrb.mxu2 %v1858_v53  ;;  %v1963_v32 = vld [vmem:[#allocation8 + $0xcb0] sm:$0xff]  ;;  %v2068_v53 = vld [vmem:[#allocation8 + $0xff8] sm:$0xff] }
 0x20e   :  { %2585 = vmatpush.msrb.mxu3 %v1918_v55  ;;  %2482 = vmatmul.f32.gmra.mxu2 %v3453_v40  ;;  %v2011_v49 = vld [vmem:[#allocation8 + $0xe30] sm:$0xff]  ;;  %v2128_v55 = vld [vmem:[#allocation8 + $0x11d8] sm:$0xff] }
 0x20f   :  { %2502 = vmatmul.f32.vlgmr.msra.gmra.mxu3 %v3430_v1  ;;  %2524 = vmatpush.msrb.mxu0 %v1750_v63  ;;  %v1960_v63 = vld [vmem:[#allocation8 + $0xc98] sm:$0xff] }
 0x210   :  { %2547 = vmatpush.msrb.mxu1 %v1798_v51  ;;  %2567 = vmatpush.msrb.mxu2 %v1855_v8  ;;  %v2008_v51 = vld [vmem:[#allocation8 + $0xe18] sm:$0xff]  ;;  %v2065_v8 = vld [vmem:[#allocation8 + $0xfe0] sm:$0xff] }
 0x211   :  { %2586 = vmatpush.msrb.mxu3 %v1915_v10  ;;  %2525 = vmatmul.f32.vlgmr.msrb.gmra.mxu0 %v3498_v27  ;;  %v2125_v10 = vld [vmem:[#allocation8 + $0x11c0] sm:$0xff] }
 0x212   :  { %2548 = vmatmul.f32.vlgmr.msrb.gmra.mxu1 %v3502_v16  ;;  %2601 = vmatpush.msra.mxu0 %v1987_v41  ;;  %v1957_v41 = vld [vmem:[#allocation8 + $0xc80] sm:$0xff] }
 0x213   :  { %2624 = vmatpush.msra.mxu1 %v2035_v30  ;;  %2568 = vmatpush.msrb.mxu2 %v1852_v9  ;;  %v2005_v30 = vld [vmem:[#allocation8 + $0xe00] sm:$0xff]  ;;  %v2062_v9 = vld [vmem:[#allocation8 + $0xfc8] sm:$0xff] }
 0x214   :  { %2587 = vmatpush.msrb.mxu3 %v1912_v24  ;;  %2602 = vmatpush.msra.mxu0 %v1984_v25  ;;  %v2122_v24 = vld [vmem:[#allocation8 + $0x11a8] sm:$0xff] }
 0x215   :  { %2625 = vmatpush.msra.mxu1 %v2032_v3  ;;  %2569 = vmatpush.msrb.mxu2 %v1849_v0  ;;  %v1954_v25 = vld [vmem:[#allocation8 + $0xc68] sm:$0xff]  ;;  %v2059_v0 = vld [vmem:[#allocation8 + $0xfb0] sm:$0xff] }
 0x216   :  { %2588 = vmatpush.msrb.mxu3 %v1909_v22  ;;  %2603 = vmatpush.msra.mxu0 %v1981_v21  ;;  %v2002_v3 = vld [vmem:[#allocation8 + $0xde8] sm:$0xff]  ;;  %v2119_v22 = vld [vmem:[#allocation8 + $0x1190] sm:$0xff] }
 0x217   :  { %2626 = vmatpush.msra.mxu1 %v2029_v56  ;;  %2570 = vmatpush.msrb.mxu2 %v1846_v19  ;;  %v1951_v21 = vld [vmem:[#allocation8 + $0xc50] sm:$0xff]  ;;  %v2056_v19 = vld [vmem:[#allocation8 + $0xf98] sm:$0xff] }
 0x218   :  { %2589 = vmatpush.msrb.mxu3 %v1906_v23  ;;  %2604 = vmatpush.msra.mxu0 %v1978_v11  ;;  %v1999_v56 = vld [vmem:[#allocation8 + $0xdd0] sm:$0xff]  ;;  %v2116_v23 = vld [vmem:[#allocation8 + $0x1178] sm:$0xff] }
 0x219   :  { %2627 = vmatpush.msra.mxu1 %v2026_v4  ;;  %2647 = vmatpush.msra.mxu2 %v2083_v48  ;;  %v1948_v11 = vld [vmem:[#allocation8 + $0xc38] sm:$0xff]  ;;  %v2053_v48 = vld [vmem:[#allocation8 + $0xf80] sm:$0xff] }
 0x21a   :  { %2505 = vmatmul.f32.gmra.mxu3 %v3457_v52  ;;  %2571 = vmatmul.f32.vlgmr.msrb.gmra.mxu2 %v3504_v28  ;;  %v1996_v4 = vld [vmem:[#allocation8 + $0xdb8] sm:$0xff] }
 0x21b   :  { %2590 = vmatpush.msrb.mxu3 %v1903_v47  ;;  %2528 = vmatmul.f32.gmra.mxu0 %v3517_v17  ;;  %v2113_v47 = vld [vmem:[#allocation8 + $0x1160] sm:$0xff] }
 0x21c   :  { %2551 = vmatmul.f32.gmra.mxu1 %v3519_v37  ;;  %2605 = vmatpush.msra.mxu0 %v1975_v18  ;;  %v1945_v18 = vld [vmem:[#allocation8 + $0xc20] sm:$0xff] }
 0x21d   :  { %2628 = vmatpush.msra.mxu1 %v2023_v44  ;;  %2648 = vmatpush.msra.mxu2 %v2080_v62  ;;  %v1993_v44 = vld [vmem:[#allocation8 + $0xda0] sm:$0xff]  ;;  %v2050_v62 = vld [vmem:[#allocation8 + $0xf68] sm:$0xff] }
 0x21e   :  { %2591 = vmatpush.msrb.mxu3 %v1900_v45  ;;  %2606 = vmatpush.msra.mxu0 %v1972_v35  ;;  %v2110_v45 = vld [vmem:[#allocation8 + $0x1148] sm:$0xff] }
 0x21f   :  { %2629 = vmatpush.msra.mxu1 %v2020_v38  ;;  %2649 = vmatpush.msra.mxu2 %v2077_v57  ;;  %v1942_v35 = vld [vmem:[#allocation8 + $0xc08] sm:$0xff]  ;;  %v2047_v57 = vld [vmem:[#allocation8 + $0xf50] sm:$0xff] }
 0x220   :  { %2592 = vmatpush.msrb.mxu3 %v1897_v6  ;;  %2607 = vmatpush.msra.mxu0 %v1969_v5  ;;  %v1990_v38 = vld [vmem:[#allocation8 + $0xd88] sm:$0xff]  ;;  %v2107_v6 = vld [vmem:[#allocation8 + $0x1130] sm:$0xff]  ;;  %v1604_v5 = vld [vmem:[#allocation8 + $0x178] sm:$0xff] }
 0x221   :  { %2630 = vmatpush.msra.mxu1 %v2017_v61  ;;  %2650 = vmatpush.msra.mxu2 %v2074_v50  ;;  %v1652_v61 = vld [vmem:[#allocation8 + $0x2f8] sm:$0xff] }
 0x222   :  { %2593 = vmatpush.msrb.mxu3 %v1894_v14  ;;  %2608 = vmatpush.msra.mxu0 %v1966_v43  ;;  %v2044_v50 = vld [vmem:[#allocation8 + $0xf38] sm:$0xff]  ;;  %v1601_v43 = vld [vmem:[#allocation8 + $0x160] sm:$0xff] }
 0x223   :  { %2631 = vmatpush.msra.mxu1 %v2014_v12  ;;  %2651 = vmatpush.msra.mxu2 %v2071_v46  ;;  %v2104_v14 = vld [vmem:[#allocation8 + $0x1118] sm:$0xff]  ;;  %v1649_v12 = vld [vmem:[#allocation8 + $0x2e0] sm:$0xff] }
 0x224   :  { %2670 = vmatpush.msra.mxu3 %v2131_v36  ;;  %2574 = vmatmul.f32.gmra.mxu2 %v3515_v42  ;;  %v2041_v46 = vld [vmem:[#allocation8 + $0xf20] sm:$0xff] }
 0x225   :  { %2594 = vmatmul.f32.vlgmr.msrb.gmra.mxu3 %v3507_v60  ;;  %2609 = vmatpush.msra.mxu0 %v1963_v32  ;;  %v2101_v36 = vld [vmem:[#allocation8 + $0x1100] sm:$0xff]  ;;  %v1598_v32 = vld [vmem:[#allocation8 + $0x148] sm:$0xff] }
 0x226   :  { %2632 = vmatpush.msra.mxu1 %v2011_v49  ;;  %2652 = vmatpush.msra.mxu2 %v2068_v53  ;;  %v1646_v49 = vld [vmem:[#allocation8 + $0x2c8] sm:$0xff] }
 0x227   :  { %2671 = vmatpush.msra.mxu3 %v2128_v55  ;;  %2610 = vmatpush.msra.mxu0 %v1960_v63  ;;  %v2038_v53 = vld [vmem:[#allocation8 + $0xf08] sm:$0xff]  ;;  %v1595_v63 = vld [vmem:[#allocation8 + $0x130] sm:$0xff] }
 0x228   :  { %2633 = vmatpush.msra.mxu1 %v2008_v51  ;;  %2653 = vmatpush.msra.mxu2 %v2065_v8  ;;  %v2098_v55 = vld [vmem:[#allocation8 + $0x10e8] sm:$0xff]  ;;  %v1643_v51 = vld [vmem:[#allocation8 + $0x2b0] sm:$0xff]  ;;  %v1700_v8 = vld [vmem:[#allocation8 + $0x478] sm:$0xff] }
 0x229   :  { %2672 = vmatpush.msra.mxu3 %v2125_v10  ;;  %2611 = vmatpush.msra.mxu0 %v1957_v41  ;;  %v2095_v10 = vld [vmem:[#allocation8 + $0x10d0] sm:$0xff]  ;;  %v1592_v41 = vld [vmem:[#allocation8 + $0x118] sm:$0xff] }
 0x22a   :  { %2634 = vmatpush.msra.mxu1 %v2005_v30  ;;  %2654 = vmatpush.msra.mxu2 %v2062_v9  ;;  %v1640_v30 = vld [vmem:[#allocation8 + $0x298] sm:$0xff]  ;;  %v1697_v9 = vld [vmem:[#allocation8 + $0x460] sm:$0xff] }
 0x22b   :  { %2673 = vmatpush.msra.mxu3 %v2122_v24  ;;  %2612 = vmatpush.msra.mxu0 %v1954_v25  ;;  %v2092_v24 = vld [vmem:[#allocation8 + $0x10b8] sm:$0xff]  ;;  %v1589_v25 = vld [vmem:[#allocation8 + $0x100] sm:$0xff] }
 0x22c   :  { %2635 = vmatpush.msra.mxu1 %v2002_v3  ;;  %2655 = vmatpush.msra.mxu2 %v2059_v0  ;;  %v1637_v3 = vld [vmem:[#allocation8 + $0x280] sm:$0xff]  ;;  %v1694_v0 = vld [vmem:[#allocation8 + $0x448] sm:$0xff] }
 0x22d   :  { %2674 = vmatpush.msra.mxu3 %v2119_v22  ;;  %2613 = vmatpush.msra.mxu0 %v1951_v21  ;;  %v2089_v22 = vld [vmem:[#allocation8 + $0x10a0] sm:$0xff]  ;;  %v1586_v21 = vld [vmem:[#allocation8 + $0xe8] sm:$0xff] }
 0x22e   :  { %2597 = vmatmul.f32.gmra.mxu3 %v3521_v33  ;;  %2636 = vmatpush.msra.mxu1 %v1999_v56  ;;  %v1634_v56 = vld [vmem:[#allocation8 + $0x268] sm:$0xff] }
 0x22f   :  { %2656 = vmatpush.msra.mxu2 %v2056_v19  ;;  %2675 = vmatpush.msra.mxu3 %v2116_v23  ;;  %v1691_v19 = vld [vmem:[#allocation8 + $0x430] sm:$0xff]  ;;  %v2086_v23 = vld [vmem:[#allocation8 + $0x1088] sm:$0xff] }
 0x230   :  { %2614 = vmatpush.msra.mxu0 %v1948_v11  ;;  %2637 = vmatpush.msra.mxu1 %v1996_v4  ;;  %v1583_v11 = vld [vmem:[#allocation8 + $0xd0] sm:$0xff] }
 0x231   :  { %2657 = vmatpush.msra.mxu2 %v2053_v48  ;;  %2676 = vmatpush.msra.mxu3 %v2113_v47  ;;  %v1631_v4 = vld [vmem:[#allocation8 + $0x250] sm:$0xff]  ;;  %v1688_v48 = vld [vmem:[#allocation8 + $0x418] sm:$0xff] }
 0x232   :  { %2615 = vmatpush.msra.mxu0 %v1945_v18  ;;  %2638 = vmatpush.msra.mxu1 %v1993_v44  ;;  %v1748_v47 = vld [vmem:[#allocation8 + $0x5f8] sm:$0xff] }
 0x233   :  { %2658 = vmatpush.msra.mxu2 %v2050_v62  ;;  %2677 = vmatpush.msra.mxu3 %v2110_v45  ;;  %v1580_v18 = vld [vmem:[#allocation8 + $0xb8] sm:$0xff]  ;;  %v1685_v62 = vld [vmem:[#allocation8 + $0x400] sm:$0xff] }
 0x234   :  { %2616 = vmatpush.msra.mxu0 %v1942_v35  ;;  %2639 = vmatpush.msra.mxu1 %v1990_v38  ;;  %v1628_v44 = vld [vmem:[#allocation8 + $0x238] sm:$0xff]  ;;  %v1745_v45 = vld [vmem:[#allocation8 + $0x5e0] sm:$0xff] }
 0x235   :  { %2659 = vmatpush.msra.mxu2 %v2047_v57  ;;  %2678 = vmatpush.msra.mxu3 %v2107_v6  ;;  %v1577_v35 = vld [vmem:[#allocation8 + $0xa0] sm:$0xff]  ;;  %v1682_v57 = vld [vmem:[#allocation8 + $0x3e8] sm:$0xff] }
 0x236   :  { %2617 = vmatmul.f32.vlgmr.msra.gmra.mxu0 %v3533_v20  ;;  %2640 = vmatmul.f32.vlgmr.msra.gmra.mxu1 %v3538_v31  ;;  %v1625_v38 = vld [vmem:[#allocation8 + $0x220] sm:$0xff]  ;;  %v1742_v6 = vld [vmem:[#allocation8 + $0x5c8] sm:$0xff] }
 0x237   :  { %2693 = vmatpush.msrb.mxu0 %v1604_v5  ;;  %2716 = vmatpush.msrb.mxu1 %v1652_v61  ;;  %v1574_v5 = vld [vmem:[#allocation8 + $0x88] sm:$0xff] }
 0x238   :  { %2660 = vmatpush.msra.mxu2 %v2044_v50  ;;  %2679 = vmatpush.msra.mxu3 %v2104_v14  ;;  %v1622_v61 = vld [vmem:[#allocation8 + $0x208] sm:$0xff]  ;;  %v1679_v50 = vld [vmem:[#allocation8 + $0x3d0] sm:$0xff] }
 0x239   :  { %2694 = vmatpush.msrb.mxu0 %v1601_v43  ;;  %2717 = vmatpush.msrb.mxu1 %v1649_v12  ;;  %v1739_v14 = vld [vmem:[#allocation8 + $0x5b0] sm:$0xff] }
 0x23a   :  { %2661 = vmatpush.msra.mxu2 %v2041_v46  ;;  %2680 = vmatpush.msra.mxu3 %v2101_v36  ;;  %v1571_v43 = vld [vmem:[#allocation8 + $0x70] sm:$0xff]  ;;  %v1676_v46 = vld [vmem:[#allocation8 + $0x3b8] sm:$0xff] }
 0x23b   :  { %2695 = vmatpush.msrb.mxu0 %v1598_v32  ;;  %2718 = vmatpush.msrb.mxu1 %v1646_v49  ;;  %v1619_v12 = vld [vmem:[#allocation8 + $0x1f0] sm:$0xff]  ;;  %v1736_v36 = vld [vmem:[#allocation8 + $0x598] sm:$0xff] }
 0x23c   :  { %2662 = vmatpush.msra.mxu2 %v2038_v53  ;;  %2681 = vmatpush.msra.mxu3 %v2098_v55  ;;  %v1568_v32 = vld [vmem:[#allocation8 + $0x58] sm:$0xff]  ;;  %v1673_v53 = vld [vmem:[#allocation8 + $0x3a0] sm:$0xff] }
 0x23d   :  { %2663 = vmatmul.f32.vlgmr.msra.gmra.mxu2 %v3553_v15  ;;  %2696 = vmatpush.msrb.mxu0 %v1595_v63  ;;  %v1616_v49 = vld [vmem:[#allocation8 + $0x1d8] sm:$0xff]  ;;  %v1733_v55 = vld [vmem:[#allocation8 + $0x580] sm:$0xff] }
 0x23e   :  { %2719 = vmatpush.msrb.mxu1 %v1643_v51  ;;  %2739 = vmatpush.msrb.mxu2 %v1700_v8  ;;  %v1565_v63 = vld [vmem:[#allocation8 + $0x40] sm:$0xff]  ;;  %v1670_v8 = vld [vmem:[#allocation8 + $0x388] sm:$0xff] }
 0x23f   :  { %2682 = vmatpush.msra.mxu3 %v2095_v10  ;;  %2620 = vmatmul.f32.gmra.mxu0 %v3540_v7  ;;  %v1613_v51 = vld [vmem:[#allocation8 + $0x1c0] sm:$0xff]  ;;  %v1730_v10 = vld [vmem:[#allocation8 + $0x568] sm:$0xff] }
 0x240   :  { %2643 = vmatmul.f32.gmra.mxu1 %v3544_v2  ;;  %2697 = vmatpush.msrb.mxu0 %v1592_v41  ;;  %v3589_v41 = vpop.f32.mrf.mxu0 }
 0x241   :  { %2720 = vmatpush.msrb.mxu1 %v1640_v30  ;;  %2740 = vmatpush.msrb.mxu2 %v1697_v9  ;;  %v1562_v30 = vld [vmem:[#allocation8 + $0x28] sm:$0xff] }
 0x242   :  { %2683 = vmatpush.msra.mxu3 %v2092_v24  ;;  %2698 = vmatpush.msrb.mxu0 %v1589_v25  ;;  %v1610_v9 = vld [vmem:[#allocation8 + $0x1a8] sm:$0xff]  ;;  %v1667_v24 = vld [vmem:[#allocation8 + $0x370] sm:$0xff] }
 0x243   :  { %2721 = vmatpush.msrb.mxu1 %v1637_v3  ;;  %2741 = vmatpush.msrb.mxu2 %v1694_v0  ;;  %v1727_v25 = vld [vmem:[#allocation8 + $0x550] sm:$0xff]  ;;  %v3591_v3 = vpop.f32.mrf.mxu1 }
 0x244   :  { %2684 = vmatpush.msra.mxu3 %v2089_v22  ;;  %2699 = vmatpush.msrb.mxu0 %v1586_v21  ;;  %v1559_v0 = vld [vmem:[#allocation8 + $0x10] sm:$0xff]  ;;  %v1664_v21 = vld [vmem:[#allocation8 + $0x358] sm:$0xff] }
 0x245   :  { %2722 = vmatpush.msrb.mxu1 %v1634_v56  ;;  %2742 = vmatpush.msrb.mxu2 %v1691_v19  ;;  %v1607_v22 = vld [vmem:[#allocation8 + $0x190] sm:$0xff]  ;;  %v1724_v56 = vld [vmem:[#allocation8 + $0x538] sm:$0xff]  ;;  %v3593_v19 = vpop.f32.mrf.mxu2 }
 0x246   :  { %2685 = vmatpush.msra.mxu3 %v2086_v23  ;;  %2666 = vmatmul.f32.gmra.mxu2 %v3560_v26  ;;  %v1796_v23 = vld [vmem:[#allocation8 + $0x778] sm:$0xff] }
 0x247   :  { %2686 = vmatmul.f32.vlgmr.msra.gmra.mxu3 %v3562_v34  ;;  %2700 = vmatpush.msrb.mxu0 %v1583_v11  ;;  %v1844_v11 = vld [vmem:[#allocation8 + $0x8f8] sm:$0xff] }
 0x248   :  { %2723 = vmatpush.msrb.mxu1 %v1631_v4  ;;  %2743 = vmatpush.msrb.mxu2 %v1688_v48  ;;  %v1661_v4 = vld [vmem:[#allocation8 + $0x340] sm:$0xff] }
 0x249   :  { %2762 = vmatpush.msrb.mxu3 %v1748_v47  ;;  %2701 = vmatpush.msrb.mxu0 %v1580_v18  ;;  %v1721_v48 = vld [vmem:[#allocation8 + $0x520] sm:$0xff] }
 0x24a   :  { %2724 = vmatpush.msrb.mxu1 %v1628_v44  ;;  %2744 = vmatpush.msrb.mxu2 %v1685_v62  ;;  %v1793_v47 = vld [vmem:[#allocation8 + $0x760] sm:$0xff]  ;;  %v1658_v44 = vld [vmem:[#allocation8 + $0x328] sm:$0xff] }
 0x24b   :  { %2763 = vmatpush.msrb.mxu3 %v1745_v45  ;;  %2702 = vmatpush.msrb.mxu0 %v1577_v35  ;;  %v1841_v18 = vld [vmem:[#allocation8 + $0x8e0] sm:$0xff]  ;;  %v1718_v62 = vld [vmem:[#allocation8 + $0x508] sm:$0xff]  ;;  %v3599_v35 = vpop.f32.mrf.mxu3 }
 0x24c   :  { %2725 = vmatpush.msrb.mxu1 %v1625_v38  ;;  %2745 = vmatpush.msrb.mxu2 %v1682_v57  ;;  %v3597_v45 = vld [vmem:[#allocation10] sm:$0x7]  ;;  %v1790_v38 = vld [vmem:[#allocation8 + $0x748] sm:$0xff] }
 0x24d   :  { %2764 = vmatpush.msrb.mxu3 %v1742_v6  ;;  %2703 = vmatpush.msrb.mxu0 %v1574_v5  ;;  %v1838_v57 = vld [vmem:[#allocation8 + $0x8c8] sm:$0xff]  ;;  %v3601_v6 = vpop.f32.mrf.mxu0  ;;  %v1787_v5 = vld [vmem:[#allocation8 + $0x730] sm:$0xff] }
 0x24e   :  { %2726 = vmatpush.msrb.mxu1 %v1622_v61  ;;  %2746 = vmatpush.msrb.mxu2 %v1679_v50  ;;  %v2135_v61 = vperm.slane %v3597_v45, 0  ;;  %v3604_v50 = vpop.f32.mrf.mxu1 }
 0x24f   :  { %2765 = vmatpush.msrb.mxu3 %v1739_v14  ;;  %2704 = vmatpush.msrb.mxu0 %v1571_v43  ;;  %v1835_v14 = vld [vmem:[#allocation8 + $0x8b0] sm:$0xff]  ;;  %v1892_v43 = vld [vmem:[#allocation8 + $0xa78] sm:$0xff] }
 0x250   :  { %2689 = vmatmul.f32.gmra.mxu3 %v3566_v29  ;;  %2727 = vmatpush.msrb.mxu1 %v1619_v12  ;;  %v1712_v12 = vld [vmem:[#allocation8 + $0x4d8] sm:$0xff] }
 0x251   :  { %2747 = vmatpush.msrb.mxu2 %v1676_v46  ;;  %2766 = vmatpush.msrb.mxu3 %v1736_v36  ;;  %v3606_v46 = vpop.f32.mrf.mxu2  ;;  %v1784_v36 = vld [vmem:[#allocation8 + $0x718] sm:$0xff] }
 0x252   :  { %2705 = vmatpush.msrb.mxu0 %v1568_v32  ;;  %2728 = vmatpush.msrb.mxu1 %v1616_v49  ;;  %v1832_v32 = vld [vmem:[#allocation8 + $0x898] sm:$0xff]  ;;  %v1889_v49 = vld [vmem:[#allocation8 + $0xa60] sm:$0xff] }
 0x253   :  { %2748 = vmatpush.msrb.mxu2 %v1673_v53  ;;  %2767 = vmatpush.msrb.mxu3 %v1733_v55  ;;  %v2159_v53 = vadd.f32 %v3589_v41, %v2135_v61  ;;  %v1709_v55 = vld [vmem:[#allocation8 + $0x4c0] sm:$0xff]  ;;  %v1826_v41 = vld [vmem:[#allocation8 + $0x868] sm:$0xff] }
 0x254   :  { %2706 = vmatpush.msrb.mxu0 %v1565_v63  ;;  %2729 = vmatpush.msrb.mxu1 %v1613_v51  ;;  %v1781_v63 = vld [vmem:[#allocation8 + $0x700] sm:$0xff] }
 0x255   :  { %2749 = vmatpush.msrb.mxu2 %v1670_v8  ;;  %2768 = vmatpush.msrb.mxu3 %v1730_v10  ;;  %v1829_v51 = vld [vmem:[#allocation8 + $0x880] sm:$0xff]  ;;  %v1886_v8 = vld [vmem:[#allocation8 + $0xa48] sm:$0xff]  ;;  %v2250_v10 = vpop.f32.mrf.mxu0 }
 0x256   :  { %2707 = vmatpush.msrb.mxu0 %v1562_v30  ;;  %2730 = vmatpush.msrb.mxu1 %v1610_v9  ;;  %v1778_v30 = vld [vmem:[#allocation8 + $0x6e8] sm:$0xff]  ;;  %v3612_v9 = vpop.f32.mrf.mxu3 }
 0x257   :  { %2750 = vmatpush.msrb.mxu2 %v1667_v24  ;;  %2769 = vmatpush.msrb.mxu3 %v1727_v25  ;;  %v1883_v24 = vld [vmem:[#allocation8 + $0xa30] sm:$0xff]  ;;  %v2273_v25 = vpop.f32.mrf.mxu1 }
 0x258   :  { %2708 = vmatpush.msrb.mxu0 %v1559_v0  ;;  %2731 = vmatpush.msrb.mxu1 %v1607_v22  ;;  %v1775_v0 = vld [vmem:[#allocation8 + $0x6d0] sm:$0xff] }
 0x259   :  { %2751 = vmatpush.msrb.mxu2 %v1664_v21  ;;  %2770 = vmatpush.msrb.mxu3 %v1724_v56  ;;  %v2296_v21 = vpop.f32.mrf.mxu2  ;;  %v1823_v56 = vld [vmem:[#allocation8 + $0x850] sm:$0xff] }
 0x25a   :  { %2709 = vmatmul.f32.vlgmr.msrb.gmra.mxu0 %v3421_v58  ;;  %2732 = vmatmul.f32.vlgmr.msrb.gmra.mxu1 %v3423_v13  ;;  %v1655_v58 = vld [vmem:[#allocation8 + $0x310] sm:$0xff] }
 0x25b   :  { %2785 = vmatpush.msra.mxu0 %v1796_v23  ;;  %2808 = vmatpush.msra.mxu1 %v1844_v11  ;;  %v1715_v13 = vld [vmem:[#allocation8 + $0x4f0] sm:$0xff]  ;;  %v1880_v23 = vld [vmem:[#allocation8 + $0xa18] sm:$0xff] }
 0x25c   :  { %2752 = vmatpush.msrb.mxu2 %v1661_v4  ;;  %2771 = vmatpush.msrb.mxu3 %v1721_v48  ;;  %v1940_v11 = vld [vmem:[#allocation8 + $0xbf8] sm:$0xff]  ;;  %v1877_v48 = vld [vmem:[#allocation8 + $0xa00] sm:$0xff] }
 0x25d   :  { %2786 = vmatpush.msra.mxu0 %v1793_v47  ;;  %2809 = vmatpush.msra.mxu1 %v1841_v18  ;;  %v1772_v4 = vld [vmem:[#allocation8 + $0x6b8] sm:$0xff]  ;;  %v2162_v47 = vadd.f32 %v3601_v6, %v2135_v61  ;;  %v1769_v18 = vld [vmem:[#allocation8 + $0x6a0] sm:$0xff]  ;;  %v1814_v6 = vld [vmem:[#allocation8 + $0x808] sm:$0xff] }
 0x25e   :  { %2753 = vmatpush.msrb.mxu2 %v1658_v44  ;;  %2772 = vmatpush.msrb.mxu3 %v1718_v62  ;;  %v1817_v62 = vld [vmem:[#allocation8 + $0x820] sm:$0xff] }
 0x25f   :  { %2787 = vmatpush.msra.mxu0 %v1790_v38  ;;  %2810 = vmatpush.msra.mxu1 %v1838_v57  ;;  %v1874_v38 = vld [vmem:[#allocation8 + $0x9e8] sm:$0xff]  ;;  %v2185_v61 = vadd.f32 %v3604_v50, %v2162_v47  ;;  %v1808_v50 = vld [vmem:[#allocation8 + $0x7d8] sm:$0xff] }
 0x260   :  { %2754 = vmatpush.msrb.mxu2 %v1655_v58  ;;  %2773 = vmatpush.msrb.mxu3 %v1715_v13  ;;  %v1934_v57 = vld [vmem:[#allocation8 + $0xbc8] sm:$0xff]  ;;  %v2253_v13 = vpop.f32.mrf.mxu0 }
 0x261   :  { %2755 = vmatmul.f32.vlgmr.msrb.gmra.mxu2 %v3428_v59  ;;  %2788 = vmatpush.msra.mxu0 %v1787_v5  ;;  %v1706_v59 = vld [vmem:[#allocation8 + $0x4a8] sm:$0xff]  ;;  %v1871_v5 = vld [vmem:[#allocation8 + $0x9d0] sm:$0xff] }
 0x262   :  { %2811 = vmatpush.msra.mxu1 %v1835_v14  ;;  %2831 = vmatpush.msra.mxu2 %v1892_v43  ;;  %v1763_v14 = vld [vmem:[#allocation8 + $0x670] sm:$0xff]  ;;  %v2276_v43 = vpop.f32.mrf.mxu1 }
 0x263   :  { %2774 = vmatpush.msrb.mxu3 %v1712_v12  ;;  %2712 = vmatmul.f32.gmra.mxu0 %v3449_v54  ;;  %v2182_v54 = vadd.f32 %v3591_v3, %v2159_v53  ;;  %v1820_v3 = vld [vmem:[#allocation8 + $0x838] sm:$0xff]  ;;  %v1811_v12 = vld [vmem:[#allocation8 + $0x7f0] sm:$0xff] }
 0x264   :  { %2735 = vmatmul.f32.gmra.mxu1 %v3451_v39  ;;  %2789 = vmatpush.msra.mxu0 %v1784_v36  ;;  %v1703_v39 = vld [vmem:[#allocation8 + $0x490] sm:$0xff]  ;;  %v2208_v36 = vadd.f32 %v3606_v46, %v2185_v61  ;;  %v1805_v46 = vld [vmem:[#allocation8 + $0x7c0] sm:$0xff]  ;;  %v1982_v61 = vld [vmem:[#allocation8 + $0xd48] sm:$0xff] }
 0x265   :  { %2812 = vmatpush.msra.mxu1 %v1832_v32  ;;  %2832 = vmatpush.msra.mxu2 %v1889_v49  ;;  %v2205_v22 = vadd.f32 %v3593_v19, %v2182_v54  ;;  %v1937_v19 = vld [vmem:[#allocation8 + $0xbe0] sm:$0xff]  ;;  %v1868_v32 = vld [vmem:[#allocation8 + $0x9b8] sm:$0xff] }
 0x266   :  { %2775 = vmatpush.msrb.mxu3 %v1709_v55  ;;  %2790 = vmatpush.msra.mxu0 %v1781_v63  ;;  %v1928_v49 = vld [vmem:[#allocation8 + $0xb98] sm:$0xff]  ;;  %v2299_v55 = vpop.f32.mrf.mxu2 }
 0x267   :  { %2813 = vmatpush.msra.mxu1 %v1829_v51  ;;  %2833 = vmatpush.msra.mxu2 %v1886_v8  ;;  %v2228_v44 = vadd.f32 %v3599_v35, %v2205_v22  ;;  %v1931_v35 = vld [vmem:[#allocation8 + $0xbb0] sm:$0xff]  ;;  %v1760_v63 = vld [vmem:[#allocation8 + $0x658] sm:$0xff]  ;;  %v1865_v51 = vld [vmem:[#allocation8 + $0x9a0] sm:$0xff] }
 0x268   :  { %2776 = vmatpush.msrb.mxu3 %v1706_v59  ;;  %2791 = vmatpush.msra.mxu0 %v1778_v30  ;;  %v1925_v8 = vld [vmem:[#allocation8 + $0xb80] sm:$0xff]  ;;  %v2231_v30 = vadd.f32 %v3612_v9, %v2208_v36  ;;  %v2342_v54 = vpop.f32.mrf.mxu0  ;;  %v1859_v22 = vld [vmem:[#allocation8 + $0x970] sm:$0xff] }
 0x269   :  { %2814 = vmatpush.msra.mxu1 %v1826_v41  ;;  %2834 = vmatpush.msra.mxu2 %v1883_v24  ;;  %v2251_v58 = vadd.f32 %v2250_v10, %v2228_v44  ;;  %v1757_v59 = vld [vmem:[#allocation8 + $0x640] sm:$0xff]  ;;  %v1862_v41 = vld [vmem:[#allocation8 + $0x988] sm:$0xff]  ;;  %v1751_v9 = vld [vmem:[#allocation8 + $0x610] sm:$0xff] }
 0x26a   :  { %2777 = vmatpush.msrb.mxu3 %v1703_v39  ;;  %2758 = vmatmul.f32.gmra.mxu2 %v3453_v40  ;;  %v2319_v40 = vpop.f32.mrf.mxu3  ;;  %v1922_v24 = vld [vmem:[#allocation8 + $0xb68] sm:$0xff]  ;;  %v2036_v44 = vld [vmem:[#allocation8 + $0xef8] sm:$0xff]  ;;  %v1907_v36 = vld [vmem:[#allocation8 + $0xaf0] sm:$0xff] }
 0x26b   :  { %2778 = vmatmul.f32.vlgmr.msrb.gmra.mxu3 %v3430_v1  ;;  %2792 = vmatpush.msra.mxu0 %v1775_v0  ;;  %v1766_v1 = vld [vmem:[#allocation8 + $0x688] sm:$0xff]  ;;  %v2274_v53 = vadd.f32 %v2273_v25, %v2251_v58  ;;  %v2033_v58 = vld [vmem:[#allocation8 + $0xee0] sm:$0xff] }
 0x26c   :  { %2815 = vmatpush.msra.mxu1 %v1823_v56  ;;  %2835 = vmatpush.msra.mxu2 %v1880_v23  ;;  %v1754_v25 = vld [vmem:[#allocation8 + $0x628] sm:$0xff]  ;;  %v2365_v23 = vpop.f32.mrf.mxu1 }
 0x26d   :  { %2854 = vmatpush.msra.mxu3 %v1940_v11  ;;  %2793 = vmatpush.msra.mxu0 %v1772_v4  ;;  %v2297_v10 = vadd.f32 %v2296_v21, %v2274_v53  ;;  %v1802_v39 = vld [vmem:[#allocation8 + $0x7a8] sm:$0xff]  ;;  %v1919_v21 = vld [vmem:[#allocation8 + $0xb50] sm:$0xff]  ;;  %v1856_v4 = vld [vmem:[#allocation8 + $0x958] sm:$0xff] }
 0x26e   :  { %2816 = vmatpush.msra.mxu1 %v1820_v3  ;;  %2836 = vmatpush.msra.mxu2 %v1877_v48  ;;  %v1799_v11 = vld [vmem:[#allocation8 + $0x790] sm:$0xff]  ;;  %v1916_v3 = vld [vmem:[#allocation8 + $0xb38] sm:$0xff] }
 0x26f   :  { %2855 = vmatpush.msra.mxu3 %v1937_v19  ;;  %2794 = vmatpush.msra.mxu0 %v1769_v18  ;;  %v2320_v56 = vadd.f32 %v2319_v40, %v2297_v10  ;;  %v1988_v18 = vld [vmem:[#allocation8 + $0xd78] sm:$0xff]  ;;  %v1913_v40 = vld [vmem:[#allocation8 + $0xb20] sm:$0xff]  ;;  %v2027_v53 = vld [vmem:[#allocation8 + $0xeb0] sm:$0xff] }
 0x270   :  { %2817 = vmatpush.msra.mxu1 %v1817_v62  ;;  %2837 = vmatpush.msra.mxu2 %v1874_v38  ;;  %v1853_v38 = vld [vmem:[#allocation8 + $0x940] sm:$0xff] }
 0x271   :  { %2856 = vmatpush.msra.mxu3 %v1934_v57  ;;  %2795 = vmatpush.msra.mxu0 %v1766_v1  ;;  %v2343_v48 = vadd.f32 %v2342_v54, %v2320_v56  ;;  %v1985_v1 = vld [vmem:[#allocation8 + $0xd60] sm:$0xff]  ;;  %v2078_v54 = vld [vmem:[#allocation8 + $0x1048] sm:$0xff]  ;;  %v2015_v56 = vld [vmem:[#allocation8 + $0xe50] sm:$0xff] }
 0x272   :  { %2818 = vmatpush.msra.mxu1 %v1814_v6  ;;  %2838 = vmatpush.msra.mxu2 %v1871_v5  ;;  %v2322_v0 = vpop.f32.mrf.mxu3  ;;  %v1910_v6 = vld [vmem:[#allocation8 + $0xb08] sm:$0xff] }
 0x273   :  { %2857 = vmatpush.msra.mxu3 %v1931_v35  ;;  %2796 = vmatpush.msra.mxu0 %v1763_v14  ;;  %v2366_v62 = vadd.f32 %v2365_v23, %v2343_v48  ;;  %v2030_v35 = vld [vmem:[#allocation8 + $0xec8] sm:$0xff]  ;;  %v2072_v23 = vld [vmem:[#allocation8 + $0x1018] sm:$0xff]  ;;  %v2129_v48 = vld [vmem:[#allocation8 + $0x11e0] sm:$0xff] }
 0x274   :  { %2781 = vmatmul.f32.gmra.mxu3 %v3457_v52  ;;  %2819 = vmatpush.msra.mxu1 %v1811_v12  ;;  %v2254_v52 = vadd.f32 %v2253_v13, %v2231_v30  ;;  %v1850_v13 = vld [vmem:[#allocation8 + $0x928] sm:$0xff]  ;;  %v1847_v12 = vld [vmem:[#allocation8 + $0x910] sm:$0xff]  ;;  %v1901_v30 = vld [vmem:[#allocation8 + $0xac0] sm:$0xff] }
 0x275   :  { %2839 = vmatpush.msra.mxu2 %v1868_v32  ;;  %2858 = vmatpush.msra.mxu3 %v1928_v49  ;;  %v2368_v49 = vpop.f32.mrf.mxu1 }
 0x276   :  { %2797 = vmatpush.msra.mxu0 %v1760_v63  ;;  %2820 = vmatpush.msra.mxu1 %v1808_v50  ;;  %v2388_v47 = vpop.f32.mrf.mxu2  ;;  %v2277_v19 = vadd.f32 %v2276_v43, %v2254_v52  ;;  %v2345_v43 = vpop.f32.mrf.mxu0  ;;  %v1904_v50 = vld [vmem:[#allocation8 + $0xad8] sm:$0xff] }
 0x277   :  { %2840 = vmatpush.msra.mxu2 %v1865_v51  ;;  %2859 = vmatpush.msra.mxu3 %v1925_v8  ;;  %v2389_v5 = vadd.f32 %v2388_v47, %v2366_v62  ;;  %v1976_v51 = vld [vmem:[#allocation8 + $0xd18] sm:$0xff]  ;;  %v1961_v47 = vld [vmem:[#allocation8 + $0xca0] sm:$0xff]  ;;  %v1958_v62 = vld [vmem:[#allocation8 + $0xc88] sm:$0xff] }
 0x278   :  { %2798 = vmatpush.msra.mxu0 %v1757_v59  ;;  %2821 = vmatpush.msra.mxu1 %v1805_v46  ;;  %v2300_v57 = vadd.f32 %v2299_v55, %v2277_v19  ;;  %v2084_v55 = vld [vmem:[#allocation8 + $0x1078] sm:$0xff]  ;;  %v2081_v46 = vld [vmem:[#allocation8 + $0x1060] sm:$0xff] }
 0x279   :  { %2841 = vmatpush.msra.mxu2 %v1862_v41  ;;  %2860 = vmatpush.msra.mxu3 %v1922_v24  ;;  %v2024_v59 = vld [vmem:[#allocation8 + $0xe98] sm:$0xff]  ;;  %v1973_v41 = vld [vmem:[#allocation8 + $0xd00] sm:$0xff] }
 0x27a   :  { %2799 = vmatpush.msra.mxu0 %v1754_v25  ;;  %2822 = vmatpush.msra.mxu1 %v1802_v39  ;;  %v2323_v32 = vadd.f32 %v2322_v0, %v2300_v57  ;;  %v2021_v24 = vld [vmem:[#allocation8 + $0xe80] sm:$0xff]  ;;  %v1970_v39 = vld [vmem:[#allocation8 + $0xce8] sm:$0xff]  ;;  %v2003_v57 = vld [vmem:[#allocation8 + $0xdf0] sm:$0xff] }
 0x27b   :  { %2842 = vmatpush.msra.mxu2 %v1859_v22  ;;  %2861 = vmatpush.msra.mxu3 %v1919_v21  ;;  %v2018_v0 = vld [vmem:[#allocation8 + $0xe68] sm:$0xff]  ;;  %v2075_v22 = vld [vmem:[#allocation8 + $0x1030] sm:$0xff]  ;;  %v2009_v19 = vld [vmem:[#allocation8 + $0xe20] sm:$0xff] }
 0x27c   :  { %2800 = vmatpush.msra.mxu0 %v1751_v9  ;;  %2823 = vmatpush.msra.mxu1 %v1799_v11  ;;  %v2346_v63 = vadd.f32 %v2345_v43, %v2323_v32  ;;  %v2132_v9 = vld [vmem:[#allocation8 + $0x11f8] sm:$0xff]  ;;  %v2054_v43 = vld [vmem:[#allocation8 + $0xf88] sm:$0xff] }
 0x27d   :  { %2843 = vmatpush.msra.mxu2 %v1856_v4  ;;  %2862 = vmatpush.msra.mxu3 %v1916_v3  ;;  %v1964_v11 = vld [vmem:[#allocation8 + $0xcb8] sm:$0xff]  ;;  %v2069_v3 = vld [vmem:[#allocation8 + $0x1000] sm:$0xff]  ;;  %v1994_v32 = vld [vmem:[#allocation8 + $0xda8] sm:$0xff] }
 0x27e   :  { %2801 = vmatmul.f32.vlgmr.msra.gmra.mxu0 %v3498_v27  ;;  %2824 = vmatmul.f32.vlgmr.msra.gmra.mxu1 %v3502_v16  ;;  %v1979_v16 = vld [vmem:[#allocation8 + $0xd30] sm:$0xff]  ;;  %v2369_v10 = vadd.f32 %v2368_v49, %v2346_v63  ;;  %v2012_v4 = vld [vmem:[#allocation8 + $0xe38] sm:$0xff] }
 0x27f   :  { %2877 = vmatpush.msrb.mxu0 %v1988_v18  ;;  %2900 = vmatpush.msrb.mxu1 %v2036_v44  ;;  %v2391_v8 = vpop.f32.mrf.mxu2  ;;  %v2066_v18 = vld [vmem:[#allocation8 + $0xfe8] sm:$0xff]  ;;  %v1943_v49 = vld [vmem:[#allocation8 + $0xc10] sm:$0xff]  ;;  %v2108_v63 = vld [vmem:[#allocation8 + $0x1138] sm:$0xff] }
 0x280   :  { %2844 = vmatpush.msra.mxu2 %v1853_v38  ;;  %2863 = vmatpush.msra.mxu3 %v1913_v40  ;;  %v2411_v14 = vpop.f32.mrf.mxu3  ;;  %v2392_v25 = vadd.f32 %v2391_v8, %v2369_v10  ;;  %v2126_v44 = vld [vmem:[#allocation8 + $0x11c8] sm:$0xff]  ;;  %v2063_v38 = vld [vmem:[#allocation8 + $0xfd0] sm:$0xff]  ;;  %v2105_v8 = vld [vmem:[#allocation8 + $0x1120] sm:$0xff]  ;;  %v2457_v10 = vpop.f32.mrf.mxu1 }
 0x281   :  { %2878 = vmatpush.msrb.mxu0 %v1985_v1  ;;  %2901 = vmatpush.msrb.mxu1 %v2033_v58  ;;  %v2412_v27 = vadd.f32 %v2411_v14, %v2389_v5  ;;  %v1955_v40 = vld [vmem:[#allocation8 + $0xc70] sm:$0xff]  ;;  %v2060_v1 = vld [vmem:[#allocation8 + $0xfb8] sm:$0xff]  ;;  %v2057_v5 = vld [vmem:[#allocation8 + $0xfa0] sm:$0xff] }
 0x282   :  { %2845 = vmatpush.msra.mxu2 %v1850_v13  ;;  %2864 = vmatpush.msra.mxu3 %v1910_v6  ;;  %v2120_v58 = vld [vmem:[#allocation8 + $0x1198] sm:$0xff]  ;;  %v1997_v14 = vld [vmem:[#allocation8 + $0xdc0] sm:$0xff] }
 0x283   :  { %2879 = vmatpush.msrb.mxu0 %v1982_v61  ;;  %2902 = vmatpush.msrb.mxu1 %v2030_v35  ;;  %2969 = vst [vmem:[#allocation11] sm:$0xff] %v2412_v27  ;;  %v1952_v13 = vld [vmem:[#allocation8 + $0xc58] sm:$0xff]  ;;  %v2117_v61 = vld [vmem:[#allocation8 + $0x1180] sm:$0xff]  ;;  %v1946_v27 = vld [vmem:[#allocation8 + $0xc28] sm:$0xff] }
 0x284   :  { %2846 = vmatpush.msra.mxu2 %v1847_v12  ;;  %2865 = vmatpush.msra.mxu3 %v1907_v36  ;;  %v2000_v6 = vld [vmem:[#allocation8 + $0xdd8] sm:$0xff]  ;;  %v1949_v35 = vld [vmem:[#allocation8 + $0xc40] sm:$0xff]  ;;  %v2114_v12 = vld [vmem:[#allocation8 + $0x1168] sm:$0xff]  ;;  %v2434_v36 = vpop.f32.mrf.mxu0 }
 0x285   :  { %2847 = vmatmul.f32.vlgmr.msra.gmra.mxu2 %v3504_v28  ;;  %2880 = vmatpush.msrb.mxu0 %v1979_v16  ;;  %v1898_v28 = vld [vmem:[#allocation8 + $0xaa8] sm:$0xff]  ;;  %v2051_v16 = vld [vmem:[#allocation8 + $0xf70] sm:$0xff] }
 0x286   :  { %2903 = vmatpush.msrb.mxu1 %v2027_v53  ;;  %2923 = vmatpush.msrb.mxu2 %v2084_v55  ;;  %v1991_v53 = vld [vmem:[#allocation8 + $0xd90] sm:$0xff]  ;;  %v2048_v55 = vld [vmem:[#allocation8 + $0xf58] sm:$0xff] }
 0x287   :  { %2866 = vmatpush.msra.mxu3 %v1904_v50  ;;  %2804 = vmatmul.f32.gmra.mxu0 %v3517_v17  ;;  %v1895_v17 = vld [vmem:[#allocation8 + $0xa90] sm:$0xff] }
 0x288   :  { %2827 = vmatmul.f32.gmra.mxu1 %v3519_v37  ;;  %2881 = vmatpush.msrb.mxu0 %v1976_v51  ;;  %v1967_v37 = vld [vmem:[#allocation8 + $0xcd0] sm:$0xff]  ;;  %v2480_v50 = vpop.f32.mrf.mxu2  ;;  %v2045_v51 = vld [vmem:[#allocation8 + $0xf40] sm:$0xff] }
 0x289   :  { %2904 = vmatpush.msrb.mxu1 %v2024_v59  ;;  %2924 = vmatpush.msrb.mxu2 %v2081_v46  ;;  %v2414_v52 = vpop.f32.mrf.mxu3  ;;  %v2042_v59 = vld [vmem:[#allocation8 + $0xf28] sm:$0xff] }
 0x28a   :  { %2867 = vmatpush.msra.mxu3 %v1901_v30  ;;  %2882 = vmatpush.msrb.mxu0 %v1973_v41  ;;  %v2415_v21 = vadd.f32 %v2414_v52, %v2392_v25  ;;  %v2102_v46 = vld [vmem:[#allocation8 + $0x1108] sm:$0xff]  ;;  %v2039_v30 = vld [vmem:[#allocation8 + $0xf10] sm:$0xff]  ;;  %v2096_v25 = vld [vmem:[#allocation8 + $0x10d8] sm:$0xff]  ;;  %v2460_v52 = vpop.f32.mrf.mxu1 }
 0x28b   :  { %2905 = vmatpush.msrb.mxu1 %v2021_v24  ;;  %2925 = vmatpush.msrb.mxu2 %v2078_v54  ;;  %v2099_v41 = vld [vmem:[#allocation8 + $0x10f0] sm:$0xff] }
 0x28c   :  { %2868 = vmatpush.msra.mxu3 %v1898_v28  ;;  %2883 = vmatpush.msrb.mxu0 %v1970_v39  ;;  %2972 = vst [vmem:[#allocation11 + $0x18] sm:$0xff] %v2415_v21  ;;  %v2437_v54 = vpop.f32.mrf.mxu0  ;;  %v2093_v28 = vld [vmem:[#allocation8 + $0x10c0] sm:$0xff] }
 0x28d   :  { %2906 = vmatpush.msrb.mxu1 %v2018_v0  ;;  %2926 = vmatpush.msrb.mxu2 %v2075_v22  ;;  %v2087_v0 = vld [vmem:[#allocation8 + $0x1090] sm:$0xff] }
 0x28e   :  { %2869 = vmatpush.msra.mxu3 %v1895_v17  ;;  %2850 = vmatmul.f32.gmra.mxu2 %v3515_v42  ;;  %v2006_v42 = vld [vmem:[#allocation8 + $0xe08] sm:$0xff] }
 0x28f   :  { %2870 = vmatmul.f32.vlgmr.msra.gmra.mxu3 %v3507_v60  ;;  %2884 = vmatpush.msrb.mxu0 %v1967_v37  ;;  %v2123_v60 = vld [vmem:[#allocation8 + $0x11b0] sm:$0xff] }
 0x290   :  { %2907 = vmatpush.msrb.mxu1 %v2015_v56  ;;  %2927 = vmatpush.msrb.mxu2 %v2072_v23 }
 0x291   :  { %2946 = vmatpush.msrb.mxu3 %v2132_v9  ;;  %2885 = vmatpush.msrb.mxu0 %v1964_v11  ;;  %v2483_v39 = vpop.f32.mrf.mxu2 }
 0x292   :  { %2908 = vmatpush.msrb.mxu1 %v2012_v4  ;;  %2928 = vmatpush.msrb.mxu2 %v2069_v3  ;;  %v2503_v24 = vpop.f32.mrf.mxu3  ;;  %v2549_v56 = vpop.f32.mrf.mxu1 }
 0x293   :  { %2947 = vmatpush.msrb.mxu3 %v2129_v48  ;;  %2886 = vmatpush.msrb.mxu0 %v1961_v47 }
 0x294   :  { %2909 = vmatpush.msrb.mxu1 %v2009_v19  ;;  %2929 = vmatpush.msrb.mxu2 %v2066_v18  ;;  %v2526_v21 = vpop.f32.mrf.mxu0 }
 0x295   :  { %2948 = vmatpush.msrb.mxu3 %v2126_v44  ;;  %2887 = vmatpush.msrb.mxu0 %v1958_v62 }
 0x296   :  { %2910 = vmatpush.msrb.mxu1 %v2006_v42  ;;  %2930 = vmatpush.msrb.mxu2 %v2063_v38 }
 0x297   :  { %2949 = vmatpush.msrb.mxu3 %v2123_v60  ;;  %2888 = vmatpush.msrb.mxu0 %v1955_v40 }
 0x298   :  { %2873 = vmatmul.f32.gmra.mxu3 %v3521_v33  ;;  %2911 = vmatpush.msrb.mxu1 %v2003_v57  ;;  %v2111_v33 = vld [vmem:[#allocation8 + $0x1150] sm:$0xff] }
 0x299   :  { %2931 = vmatpush.msrb.mxu2 %v2060_v1  ;;  %2950 = vmatpush.msrb.mxu3 %v2120_v58 }
 0x29a   :  { %2889 = vmatpush.msrb.mxu0 %v1952_v13  ;;  %2912 = vmatpush.msrb.mxu1 %v2000_v6  ;;  %v2552_v47 = vpop.f32.mrf.mxu1 }
 0x29b   :  { %2932 = vmatpush.msrb.mxu2 %v2057_v5  ;;  %2951 = vmatpush.msrb.mxu3 %v2117_v61 }
 0x29c   :  { %2890 = vmatpush.msrb.mxu0 %v1949_v35  ;;  %2913 = vmatpush.msrb.mxu1 %v1997_v14 }
 0x29d   :  { %2933 = vmatpush.msrb.mxu2 %v2054_v43  ;;  %2952 = vmatpush.msrb.mxu3 %v2114_v12  ;;  %v2506_v17 = vpop.f32.mrf.mxu3  ;;  %v2572_v23 = vpop.f32.mrf.mxu2 }
 0x29e   :  { %2891 = vmatpush.msrb.mxu0 %v1946_v27  ;;  %2914 = vmatpush.msrb.mxu1 %v1994_v32 }
 0x29f   :  { %2934 = vmatpush.msrb.mxu2 %v2051_v16  ;;  %2953 = vmatpush.msrb.mxu3 %v2111_v33 }
 0x2a0   :  { %2892 = vmatpush.msrb.mxu0 %v1943_v49  ;;  %2915 = vmatpush.msrb.mxu1 %v1991_v53 }
 0x2a1   :  { %2935 = vmatpush.msrb.mxu2 %v2048_v55  ;;  %2954 = vmatpush.msrb.mxu3 %v2108_v63 }
 0x2a2   :  { %2893 = vmatmul.f32.vlgmr.msrb.gmra.mxu0 %v3533_v20  ;;  %2916 = vmatmul.f32.vlgmr.msrb.gmra.mxu1 %v3538_v31  ;;  %v2136_v20 = vperm.slane %v3597_v45, 1  ;;  %v2090_v31 = vld [vmem:[#allocation8 + $0x10a8] sm:$0xff] }
 0x2a3   :  { %2936 = vmatpush.msrb.mxu2 %v2045_v51  ;;  %2955 = vmatpush.msrb.mxu3 %v2105_v8  ;;  %v2137_v8 = vperm.slane %v3597_v45, 2 }
 0x2a4   :  { %v2435_v22 = vadd.f32 %v2434_v36, %v2136_v20  ;;  %v2438_v9 = vadd.f32 %v2437_v54, %v2136_v20 }
 0x2a5   :  { %2937 = vmatpush.msrb.mxu2 %v2042_v59  ;;  %2956 = vmatpush.msrb.mxu3 %v2102_v46 }
 0x2a6   :  { %v2461_v3 = vadd.f32 %v2460_v52, %v2438_v9 }
 0x2a7   :  { %2938 = vmatpush.msrb.mxu2 %v2039_v30  ;;  %2957 = vmatpush.msrb.mxu3 %v2099_v41  ;;  %v2575_v18 = vpop.f32.mrf.mxu2 }
 0x2a8   :  { %2939 = vmatmul.f32.vlgmr.msrb.gmra.mxu2 %v3553_v15  ;;  %v2458_v15 = vadd.f32 %v2457_v10, %v2435_v22  ;;  %v2595_v11 = vpop.f32.mrf.mxu3  ;;  %v2484_v48 = vadd.f32 %v2483_v39, %v2461_v3 }
 0x2a9   :  { %2958 = vmatpush.msrb.mxu3 %v2096_v25 }
 0x2aa   :  { %2896 = vmatmul.f32.gmra.mxu0 %v3540_v7  ;;  %2919 = vmatmul.f32.gmra.mxu1 %v3544_v2  ;;  %v2481_v37 = vadd.f32 %v2480_v50, %v2458_v15  ;;  %v2529_v2 = vpop.f32.mrf.mxu0  ;;  %v2507_v44 = vadd.f32 %v2506_v17, %v2484_v48 }
 0x2ab   :  { %2959 = vmatpush.msrb.mxu3 %v2093_v28 }
 0x2ac   :  { %v2504_v7 = vadd.f32 %v2503_v24, %v2481_v37  ;;  %v2530_v42 = vadd.f32 %v2529_v2, %v2507_v44 }
 0x2ad   :  { %2960 = vmatpush.msrb.mxu3 %v2090_v31 }
 0x2ae   :  { %v2527_v4 = vadd.f32 %v2526_v21, %v2504_v7  ;;  %v2553_v1 = vadd.f32 %v2552_v47, %v2530_v42 }
 0x2af   :  { %2961 = vmatpush.msrb.mxu3 %v2087_v0 }
 0x2b0   :  { %2942 = vmatmul.f32.gmra.mxu2 %v3560_v26  ;;  %2962 = vmatmul.f32.vlgmr.msrb.gmra.mxu3 %v3562_v34  ;;  %v2550_v19 = vadd.f32 %v2549_v56, %v2527_v4  ;;  %v2576_v13 = vadd.f32 %v2575_v18, %v2553_v1 }
 0x2b1   :  { %v2598_v38 = vpop.f32.mrf.mxu3 }
 0x2b2   :  { %v2573_v26 = vadd.f32 %v2572_v23, %v2550_v19  ;;  %v2599_v5 = vadd.f32 %v2598_v38, %v2576_v13 }
 0x2b3   :  { %v2618_v62 = vpop.f32.mrf.mxu0  ;;  %v2641_v40 = vpop.f32.mrf.mxu1 }
 0x2b4   :  { %v2596_v34 = vadd.f32 %v2595_v11, %v2573_v26 }
 0x2b6   :  { %v2619_v60 = vadd.f32 %v2618_v62, %v2596_v34 }
 0x2b8   :  { %2965 = vmatmul.f32.gmra.mxu3 %v3566_v29  ;;  %v2642_v58 = vadd.f32 %v2641_v40, %v2619_v60 }
 0x2bc   :  { %v2621_v6 = vpop.f32.mrf.mxu0 }
 0x2bd   :  { %v2622_v14 = vadd.f32 %v2621_v6, %v2599_v5  ;;  %v2644_v43 = vpop.f32.mrf.mxu1 }
 0x2bf   :  { %v2645_v36 = vadd.f32 %v2644_v43, %v2622_v14 }
 0x2c0   :  { %v2664_v57 = vpop.f32.mrf.mxu2 }
 0x2c1   :  { %v2665_v29 = vadd.f32 %v2664_v57, %v2642_v58 }
 0x2c9   :  { %v2667_v12 = vpop.f32.mrf.mxu2 }
 0x2ca   :  { %v2687_v61 = vpop.f32.mrf.mxu3  ;;  %v2668_v27 = vadd.f32 %v2667_v12, %v2645_v36 }
 0x2cb   :  { %v2688_v35 = vadd.f32 %v2687_v61, %v2665_v29 }
 0x2cd   :  { %2970 = vst [vmem:[#allocation11 + $0x8] sm:$0xff] %v2688_v35 }
 0x2d3   :  { %v2690_v32 = vpop.f32.mrf.mxu3 }
 0x2d4   :  { %v2691_v16 = vadd.f32 %v2690_v32, %v2668_v27 }
 0x2d6   :  { %2973 = vst [vmem:[#allocation11 + $0x20] sm:$0xff] %v2691_v16 }
 0x2d7   :  { %v2710_v33 = vpop.f32.mrf.mxu0  ;;  %v2733_v49 = vpop.f32.mrf.mxu1 }
 0x2d8   :  { %v2711_v59 = vadd.f32 %v2710_v33, %v2137_v8 }
 0x2da   :  { %v2734_v24 = vadd.f32 %v2733_v49, %v2711_v59 }
 0x2e0   :  { %v2713_v55 = vpop.f32.mrf.mxu0 }
 0x2e1   :  { %v2736_v50 = vpop.f32.mrf.mxu1  ;;  %v2714_v28 = vadd.f32 %v2713_v55, %v2137_v8 }
 0x2e3   :  { %v2737_v52 = vadd.f32 %v2736_v50, %v2714_v28 }
 0x2e4   :  { %v2756_v53 = vpop.f32.mrf.mxu2 }
 0x2e5   :  { %v2757_v54 = vadd.f32 %v2756_v53, %v2734_v24 }
 0x2ed   :  { %v2759_v51 = vpop.f32.mrf.mxu2 }
 0x2ee   :  { %v2779_v63 = vpop.f32.mrf.mxu3  ;;  %v2760_v21 = vadd.f32 %v2759_v51, %v2737_v52 }
 0x2ef   :  { %v2780_v20 = vadd.f32 %v2779_v63, %v2757_v54 }
 0x2f7   :  { %v2782_v46 = vpop.f32.mrf.mxu3 }
 0x2f8   :  { %v2783_v37 = vadd.f32 %v2782_v46, %v2760_v21 }
 0x2fb   :  { %v2802_v10 = vpop.f32.mrf.mxu0  ;;  %v2825_v30 = vpop.f32.mrf.mxu1 }
 0x2fc   :  { %v2803_v31 = vadd.f32 %v2802_v10, %v2780_v20 }
 0x2fe   :  { %v2826_v17 = vadd.f32 %v2825_v30, %v2803_v31 }
 0x304   :  { %v2805_v25 = vpop.f32.mrf.mxu0 }
 0x305   :  { %v2828_v0 = vpop.f32.mrf.mxu1  ;;  %v2806_v56 = vadd.f32 %v2805_v25, %v2783_v37 }
 0x307   :  { %v2829_v4 = vadd.f32 %v2828_v0, %v2806_v56 }
 0x308   :  { %v2848_v41 = vpop.f32.mrf.mxu2 }
 0x309   :  { %v2849_v45 = vadd.f32 %v2848_v41, %v2826_v17 }
 0x311   :  { %v2851_v22 = vpop.f32.mrf.mxu2 }
 0x312   :  { %v2871_v39 = vpop.f32.mrf.mxu3  ;;  %v2852_v3 = vadd.f32 %v2851_v22, %v2829_v4 }
 0x313   :  { %v2872_v23 = vadd.f32 %v2871_v39, %v2849_v45 }
 0x31b   :  { %v2874_v7 = vpop.f32.mrf.mxu3 }
 0x31c   :  { %v2875_v19 = vadd.f32 %v2874_v7, %v2852_v3 }
 0x31f   :  { %v2894_v15 = vpop.f32.mrf.mxu0  ;;  %v2917_v2 = vpop.f32.mrf.mxu1 }
 0x320   :  { %v2895_v9 = vadd.f32 %v2894_v15, %v2872_v23 }
 0x322   :  { %v2918_v48 = vadd.f32 %v2917_v2, %v2895_v9 }
 0x327   :  { %v2897_v47 = vpop.f32.mrf.mxu0  ;;  %v2920_v34 = vpop.f32.mrf.mxu1 }
 0x328   :  { %v2898_v26 = vadd.f32 %v2897_v47, %v2875_v19 }
 0x32a   :  { %v2921_v38 = vadd.f32 %v2920_v34, %v2898_v26 }
 0x32b   :  { %v2940_v11 = vpop.f32.mrf.mxu2 }
 0x32c   :  { %v2941_v18 = vadd.f32 %v2940_v11, %v2918_v48 }
 0x333   :  { %v2963_v44 = vpop.f32.mrf.mxu3  ;;  %v2943_v42 = vpop.f32.mrf.mxu2 }
 0x334   :  { %v2964_v62 = vadd.f32 %v2963_v44, %v2941_v18  ;;  %v2944_v60 = vadd.f32 %v2943_v42, %v2921_v38 }
 0x336   :  { %2971 = vst [vmem:[#allocation11 + $0x10] sm:$0xff] %v2964_v62 }
 0x33b   :  { %v2966_v40 = vpop.f32.mrf.mxu3 }
 0x33c   :  { %v2967_v57 = vadd.f32 %v2966_v40, %v2944_v60 }
 0x33e   :  { %2974 = vst [vmem:[#allocation11 + $0x28] sm:$0xff] %v2967_v57 }
 0x33f   :  { %2987 = dma.vmem_to_hbm [thread:$0]  %s2980_s4, 768, %s2982_s21, [#allocation4], %s3169_s1, %s3169_s1, %s3170_s8  }
 0x340   :  { %3163 = dma.done.wait [#allocation4], 768  }
 0x341   :  { %3164 = vsyncadd [#allocation4], 4294966528 }
 0x342   :  { %2992 = vsyncpa [#allocation3], 1 }
 0x343   :  { %2993 = vsyncpa [#allocation6], 1 }
 0x344   :  { %2994 = vsyncpa [#allocation9], 1 }
 0x345   :  { %2995 = vsyncpa [#allocation4], 1 }

</bundles_post_ra>
